<compile_context>
chip_gen: v5e
topology: v5e:2x2
jax: 0.10.0
libtpu: 0.0.40
codegen_flags: <defaults>
</compile_context>

<pallas_src>
import jax
import jax.numpy as jnp
from jax.experimental import pallas as pl
from jax.experimental.pallas import tpu as pltpu

EPS = 1e-5
HEAD_LANES = 128   # lane-dense head output width (column 0 is the real output)


# ----------------------------------------------------------------------------
# Pallas kernel
# ----------------------------------------------------------------------------
def critic_kernel(state_ref, hidden_ref,
                  w1_ref, b1_ref, w11_ref, b11_ref,
                  wih_ref, whh_ref, bg_ref, bhn_ref,
                  w2_ref, b2_ref, wout_ref, bout_ref,
                  out_ref, hidden2_ref,
                  seq_buf):
    SB, _ = state_ref.shape
    L, B, H = hidden_ref.shape          # B is already padded to a sublane group
    S = SB // B

    def dot(a, b):
        return jnp.dot(a, b, preferred_element_type=jnp.float32)

    def inorm_relu(y):
        # InstanceNorm1d semantics on (.., features): normalize last dim,
        # biased variance, eps=1e-5, no affine.  Then ReLU.
        m = jnp.mean(y, axis=-1, keepdims=True)
        c = y - m
        v = jnp.mean(c * c, axis=-1, keepdims=True)
        return jnp.maximum(c * jax.lax.rsqrt(v + EPS), 0.0)

    # ---- Time-independent input MLP, batched over all S*B rows at once ----
    x = state_ref[...]                                     # (SB, din)
    h = inorm_relu(dot(x, w1_ref[...]) + b1_ref[...])      # linear1 -> in1 -> relu
    seq0 = inorm_relu(dot(h, w11_ref[...]) + b11_ref[...])  # linear1_1 -> in1_1 -> relu

    # ---- Per-layer GRU weights (all layers are live across the wavefront) ----
    wih = [wih_ref[l] for l in range(L)]                   # (H, 3H)
    whh = [whh_ref[l] for l in range(L)]                   # (H, 3H)
    bg = [bg_ref[l] for l in range(L)]                     # (1, 3H) folded r|z|n bias
    bhn = [bhn_ref[l] for l in range(L)]                   # (1, H)  hidden-path n bias

    # Layer-0 input-path gates for the WHOLE sequence: one fused matmul,
    # off the serial chain.  Gate column order is [r | z | n] (PyTorch order).
    gi0 = dot(seq0, wih[0]) + bg[0]                        # (SB, 3H)

    hp = [hidden_ref[l] for l in range(L)]                 # current hidden, (B, H)
    cell_out = [[None] * S for _ in range(L)]              # per-cell outputs (values)

    def gru_cell(gi_t, l):
        gh = dot(hp[l], whh[l])                            # (B, 3H); r/z biases folded
        rz = jax.nn.sigmoid(gi_t[:, :2 * H] + gh[:, :2 * H])   # one sigmoid push
        r, z = rz[:, :H], rz[:, H:]
        n = jnp.tanh(gi_t[:, 2 * H:] + r * (gh[:, 2 * H:] + bhn[l]))
        return (1.0 - z) * n + z * hp[l]

    # ---- Stacked GRU as a layer-time wavefront ----
    # At wavefront step d, layer l processes t = d - l; dependencies are
    # satisfied because layer l-1 produced timestep t at step d-1.  The L
    # per-step chains are independent, so their MXU/EUP latencies overlap.
    for d in range(S + L - 1):
        for l in range(L):
            t = d - l
            if t < 0 or t >= S:
                continue
            if l == 0:
                gi_t = gi0[t * B:(t + 1) * B, :]           # aligned 8-row slice
            else:
                gi_t = dot(cell_out[l - 1][t], wih[l]) + bg[l]
            h_new = gru_cell(gi_t, l)
            hp[l] = h_new
            cell_out[l][t] = h_new
            if l == L - 1:
                # aligned store into the VMEM sequence slab (no concatenate)
                seq_buf[t * B:(t + 1) * B, :] = h_new

    for l in range(L):
        hidden2_ref[l] = hp[l]

    # ---- Time-independent output head, batched over S*B ----
    y = inorm_relu(dot(seq_buf[...], w2_ref[...]) + b2_ref[...])   # linear2 -> in2 -> relu
    # linear_out with lane-padded weight: full (SB, 128) unmasked store.
    out_ref[...] = dot(y, wout_ref[...]) + bout_ref[...]


# ----------------------------------------------------------------------------
# Wrapper
# ----------------------------------------------------------------------------
@jax.jit
def critic_forward(state, hidden, params):
    S, B, din = state.shape
    L, _, H = hidden.shape

    # Pad batch to a full f32 sublane group so every per-timestep tile/slice is
    # aligned.  Padding rows are zeros (InstanceNorm of a zero row stays zero).
    BP = max(8, ((B + 7) // 8) * 8)
    if BP != B:
        state_p = jnp.pad(state, ((0, 0), (0, BP - B), (0, 0)))
        hidden_p = jnp.pad(hidden, ((0, 0), (0, BP - B), (0, 0)))
    else:
        state_p, hidden_p = state, hidden
    state2d = state_p.reshape(S * BP, din)

    # Fold the r/z gate biases (and b_in) into the input-path bias once;
    # only b_hn must remain inside r * (gh_n + b_hn) in the recurrence.
    bih, bhh = params['bih'], params['bhh']                 # (L, 1, 3H)
    b_gate = bih + jnp.concatenate(
        [bhh[:, :, :2 * H], jnp.zeros_like(bhh[:, :, 2 * H:])], axis=-1)
    b_hn = bhh[:, :, 2 * H:]                                # (L, 1, H)

    # Lane-dense head: pad linear_out weight/bias (H,1)->(H,128), (1,1)->(1,128).
    wout_p = jnp.pad(params['wout'], ((0, 0), (0, HEAD_LANES - 1)))
    bout_p = jnp.pad(params['bout'], ((0, 0), (0, HEAD_LANES - 1)))

    vmem = pl.BlockSpec(memory_space=pltpu.MemorySpace.VMEM)

    # Advisory cost estimate so XLA can schedule neighbors around this call.
    SBp = S * BP
    flops = (2 * SBp * din * H                # linear1
             + 2 * SBp * H * H                # linear1_1
             + L * 2 * SBp * H * 3 * H        # GRU input-path gates
             + L * 2 * SBp * H * 3 * H        # GRU hidden-path gates
             + 2 * SBp * H * H                # linear2
             + 2 * SBp * H * HEAD_LANES)      # linear_out (lane-padded)
    transcendentals = L * SBp * 3 * H + 3 * SBp
    in_elems = (state2d.size + hidden_p.size + params['w1'].size + params['b1'].size
                + params['w11'].size + params['b11'].size + params['wih'].size
                + params['whh'].size + b_gate.size + b_hn.size + params['w2'].size
                + params['b2'].size + wout_p.size + bout_p.size)
    out_elems = SBp * HEAD_LANES + L * BP * H
    cost = pl.CostEstimate(flops=int(flops), transcendentals=int(transcendentals),
                           bytes_accessed=int(4 * (in_elems + out_elems)))

    out2d, hidden2 = pl.pallas_call(
        critic_kernel,
        out_shape=(jax.ShapeDtypeStruct((SBp, HEAD_LANES), jnp.float32),
                   jax.ShapeDtypeStruct((L, BP, H), jnp.float32)),
        in_specs=[vmem] * 14,
        out_specs=(vmem, vmem),
        scratch_shapes=[pltpu.VMEM((SBp, H), jnp.float32)],   # last-layer seq slab
        input_output_aliases={1: 1},            # hidden (in) aliases hidden2 (out)
        compiler_params=pltpu.CompilerParams(vmem_limit_bytes=32 * 1024 * 1024),
        cost_estimate=cost,
    )(state2d, hidden_p,
      params['w1'], params['b1'], params['w11'], params['b11'],
      params['wih'], params['whh'], b_gate, b_hn,
      params['w2'], params['b2'], wout_p, bout_p)

    # torch: self.linear_out(out).view(-1, batch_size); strip batch padding.
    out = out2d[:, 0].reshape(S, BP)[:, :B]
    hidden2 = hidden2[:, :B, :]
    return out, hidden2


# ----------------------------------------------------------------------------
# Deterministic parameter init (orthogonal weights, zero biases, like
# critic_network.init_weights).  Weights are pre-transposed so the kernel
# right-multiplies (x @ W); the three GRU gate matrices per path are fused
# into a single (H, 3H) matrix with column blocks [r | z | n].
# ----------------------------------------------------------------------------
def orthogonal(key, shape):
    r, c = shape
    a = jax.random.normal(key, (max(r, c), min(r, c)), dtype=jnp.float32)
    q, rr = jnp.linalg.qr(a)
    q = q * jnp.sign(jnp.diagonal(rr))
    if r < c:
        q = q.T
    return q[:r, :c].astype(jnp.float32)


def make_params(key, input_num, n_hid, n_layers):
    din, H, L = input_num + 1, n_hid, n_layers
    keys = jax.random.split(key, 4 + 2 * L)

    W1 = orthogonal(keys[0], (H, din))
    W11 = orthogonal(keys[1], (H, H))
    W2 = orthogonal(keys[2], (H, H))
    Wout = orthogonal(keys[3], (1, H))

    # torch weight_ih_l{l} / weight_hh_l{l} are (3H, H) with row blocks
    # [r | z | n]; transposing gives the fused (H, 3H) right-multiply form.
    wih = jnp.stack([orthogonal(keys[4 + 2 * l], (3 * H, H)).T for l in range(L)], 0)
    whh = jnp.stack([orthogonal(keys[5 + 2 * l], (3 * H, H)).T for l in range(L)], 0)

    z = jnp.zeros
    return dict(
        w1=W1.T, b1=z((1, H), jnp.float32),
        w11=W11.T, b11=z((1, H), jnp.float32),
        wih=wih, whh=whh,                                   # (L, H, 3H)
        bih=z((L, 1, 3 * H), jnp.float32), bhh=z((L, 1, 3 * H), jnp.float32),
        w2=W2.T, b2=z((1, H), jnp.float32),
        wout=Wout.T, bout=z((1, 1), jnp.float32))


# ----------------------------------------------------------------------------
# Pure-JAX reference (mirrors the torch forward) for verification
# ----------------------------------------------------------------------------
def reference(state, hidden, p):
    S, B, _ = state.shape
    L, _, H = hidden.shape

    def inorm_relu(y):
        m = y.mean(-1, keepdims=True)
        v = ((y - m) ** 2).mean(-1, keepdims=True)
        return jnp.maximum((y - m) * jax.lax.rsqrt(v + EPS), 0.0)

    h = inorm_relu(state @ p['w1'] + p['b1'])
    seq = inorm_relu(h @ p['w11'] + p['b11'])
    hidden2 = []
    for l in range(L):
        wih, whh = p['wih'][l], p['whh'][l]
        bih, bhh = p['bih'][l], p['bhh'][l]
        hp = hidden[l]
        outs = []
        for t in range(S):
            gi = seq[t] @ wih + bih
            gh = hp @ whh + bhh
            r = jax.nn.sigmoid(gi[:, :H] + gh[:, :H])
            zt = jax.nn.sigmoid(gi[:, H:2 * H] + gh[:, H:2 * H])
            n = jnp.tanh(gi[:, 2 * H:] + r * gh[:, 2 * H:])
            hp = (1.0 - zt) * n + zt * hp
            outs.append(hp)
        hidden2.append(hp)
        seq = jnp.stack(outs, 0)
    y = inorm_relu(seq @ p['w2'] + p['b2'])
    out = (y @ p['wout'] + p['bout']).reshape(-1, B)
    return out, jnp.stack(hidden2, 0)


# ----------------------------------------------------------------------------
if __name__ == "__main__":
    input_num, n_hid, n_layers = 4, 32, 2
    S, B = 8, 2

    key = jax.random.PRNGKey(0)
    kp, ks, kh = jax.random.split(key, 3)
    params = make_params(kp, input_num, n_hid, n_layers)
    state = jax.random.normal(ks, (S, B, input_num + 1), dtype=jnp.float32)
    hidden = jax.random.normal(kh, (n_layers, B, n_hid), dtype=jnp.float32)

    out, hidden2 = critic_forward(state, hidden, params)
    jax.block_until_ready((out, hidden2))

    ref_out, ref_h2 = reference(state, hidden, params)
    assert out.shape == (S, B) and hidden2.shape == (n_layers, B, n_hid)
    assert jnp.allclose(out, ref_out, atol=1e-4, rtol=1e-4)
    assert jnp.allclose(hidden2, ref_h2, atol=1e-4, rtol=1e-4)

    print("KERNEL_OK")
</pallas_src>

<mosaic_0001>
module attributes {stable_mosaic.version = 11 : i64} {
  func.func @critic_kernel(%arg0: memref<64x5xf32, #tpu.memory_space<vmem>>, %arg1: memref<2x8x32xf32, #tpu.memory_space<vmem>>, %arg2: memref<5x32xf32, #tpu.memory_space<vmem>>, %arg3: memref<1x32xf32, #tpu.memory_space<vmem>>, %arg4: memref<32x32xf32, #tpu.memory_space<vmem>>, %arg5: memref<1x32xf32, #tpu.memory_space<vmem>>, %arg6: memref<2x32x96xf32, #tpu.memory_space<vmem>>, %arg7: memref<2x32x96xf32, #tpu.memory_space<vmem>>, %arg8: memref<2x1x96xf32, #tpu.memory_space<vmem>>, %arg9: memref<2x1x32xf32, #tpu.memory_space<vmem>>, %arg10: memref<32x32xf32, #tpu.memory_space<vmem>>, %arg11: memref<1x32xf32, #tpu.memory_space<vmem>>, %arg12: memref<32x128xf32, #tpu.memory_space<vmem>>, %arg13: memref<1x128xf32, #tpu.memory_space<vmem>>, %arg14: memref<64x128xf32, #tpu.memory_space<vmem>>, %arg15: memref<2x8x32xf32, #tpu.memory_space<vmem>>, %arg16: memref<64x32xf32, #tpu.memory_space<vmem>>) attributes {dimension_semantics = [], scalar_prefetch = 0 : i64, scratch_operands = 1 : i64, tpu.core_type = #tpu.core_type<tc>} {
    %c0 = arith.constant 0 : index
    %c0_0 = arith.constant 0 : index
    %0 = vector.load %arg0[%c0, %c0_0] : memref<64x5xf32, #tpu.memory_space<vmem>>, vector<64x5xf32>
    %c0_1 = arith.constant 0 : index
    %c0_2 = arith.constant 0 : index
    %1 = vector.load %arg2[%c0_1, %c0_2] : memref<5x32xf32, #tpu.memory_space<vmem>>, vector<5x32xf32>
    %cst = arith.constant dense<0.000000e+00> : vector<64x32xf32>
    %2 = tpu.matmul %0, %1, %cst {dimension_numbers = #tpu.dot_dimension_numbers<[1], [0], [0], [1], [0, 0, 1, 1], [], []>} : vector<64x5xf32>, vector<5x32xf32>, vector<64x32xf32> -> vector<64x32xf32>
    %c0_3 = arith.constant 0 : index
    %c0_4 = arith.constant 0 : index
    %3 = vector.load %arg3[%c0_3, %c0_4] : memref<1x32xf32, #tpu.memory_space<vmem>>, vector<1x32xf32>
    %4 = vector.broadcast %3 : vector<1x32xf32> to vector<64x32xf32>
    %5 = arith.addf %2, %4 : vector<64x32xf32>
    %cst_5 = arith.constant dense<0.000000e+00> : vector<64xf32>
    %6 = vector.multi_reduction <add>, %5, %cst_5 [1] : vector<64x32xf32> to vector<64xf32>
    %7 = vector.shape_cast %6 : vector<64xf32> to vector<64x1xf32>
    %cst_6 = arith.constant 3.200000e+01 : f32
    %8 = vector.broadcast %cst_6 : f32 to vector<64x1xf32>
    %9 = arith.divf %7, %8 : vector<64x1xf32>
    %10 = vector.broadcast %9 : vector<64x1xf32> to vector<64x32xf32>
    %11 = arith.subf %5, %10 : vector<64x32xf32>
    %12 = arith.mulf %11, %11 : vector<64x32xf32>
    %cst_7 = arith.constant dense<0.000000e+00> : vector<64xf32>
    %13 = vector.multi_reduction <add>, %12, %cst_7 [1] : vector<64x32xf32> to vector<64xf32>
    %14 = vector.shape_cast %13 : vector<64xf32> to vector<64x1xf32>
    %cst_8 = arith.constant 3.200000e+01 : f32
    %15 = vector.broadcast %cst_8 : f32 to vector<64x1xf32>
    %16 = arith.divf %14, %15 : vector<64x1xf32>
    %cst_9 = arith.constant 9.99999974E-6 : f32
    %17 = vector.broadcast %cst_9 : f32 to vector<64x1xf32>
    %18 = arith.addf %16, %17 : vector<64x1xf32>
    %19 = math.rsqrt %18 : vector<64x1xf32>
    %20 = vector.broadcast %19 : vector<64x1xf32> to vector<64x32xf32>
    %21 = arith.mulf %11, %20 : vector<64x32xf32>
    %cst_10 = arith.constant 0.000000e+00 : f32
    %22 = vector.broadcast %cst_10 : f32 to vector<64x32xf32>
    %23 = arith.maximumf %21, %22 : vector<64x32xf32>
    %c0_11 = arith.constant 0 : index
    %c0_12 = arith.constant 0 : index
    %24 = vector.load %arg4[%c0_11, %c0_12] : memref<32x32xf32, #tpu.memory_space<vmem>>, vector<32x32xf32>
    %cst_13 = arith.constant dense<0.000000e+00> : vector<64x32xf32>
    %25 = tpu.matmul %23, %24, %cst_13 {dimension_numbers = #tpu.dot_dimension_numbers<[1], [0], [0], [1], [0, 0, 1, 1], [], []>} : vector<64x32xf32>, vector<32x32xf32>, vector<64x32xf32> -> vector<64x32xf32>
    %c0_14 = arith.constant 0 : index
    %c0_15 = arith.constant 0 : index
    %26 = vector.load %arg5[%c0_14, %c0_15] : memref<1x32xf32, #tpu.memory_space<vmem>>, vector<1x32xf32>
    %27 = vector.broadcast %26 : vector<1x32xf32> to vector<64x32xf32>
    %28 = arith.addf %25, %27 : vector<64x32xf32>
    %cst_16 = arith.constant dense<0.000000e+00> : vector<64xf32>
    %29 = vector.multi_reduction <add>, %28, %cst_16 [1] : vector<64x32xf32> to vector<64xf32>
    %30 = vector.shape_cast %29 : vector<64xf32> to vector<64x1xf32>
    %cst_17 = arith.constant 3.200000e+01 : f32
    %31 = vector.broadcast %cst_17 : f32 to vector<64x1xf32>
    %32 = arith.divf %30, %31 : vector<64x1xf32>
    %33 = vector.broadcast %32 : vector<64x1xf32> to vector<64x32xf32>
    %34 = arith.subf %28, %33 : vector<64x32xf32>
    %35 = arith.mulf %34, %34 : vector<64x32xf32>
    %cst_18 = arith.constant dense<0.000000e+00> : vector<64xf32>
    %36 = vector.multi_reduction <add>, %35, %cst_18 [1] : vector<64x32xf32> to vector<64xf32>
    %37 = vector.shape_cast %36 : vector<64xf32> to vector<64x1xf32>
    %cst_19 = arith.constant 3.200000e+01 : f32
    %38 = vector.broadcast %cst_19 : f32 to vector<64x1xf32>
    %39 = arith.divf %37, %38 : vector<64x1xf32>
    %cst_20 = arith.constant 9.99999974E-6 : f32
    %40 = vector.broadcast %cst_20 : f32 to vector<64x1xf32>
    %41 = arith.addf %39, %40 : vector<64x1xf32>
    %42 = math.rsqrt %41 : vector<64x1xf32>
    %43 = vector.broadcast %42 : vector<64x1xf32> to vector<64x32xf32>
    %44 = arith.mulf %34, %43 : vector<64x32xf32>
    %cst_21 = arith.constant 0.000000e+00 : f32
    %45 = vector.broadcast %cst_21 : f32 to vector<64x32xf32>
    %46 = arith.maximumf %44, %45 : vector<64x32xf32>
    %c0_22 = arith.constant 0 : index
    %c0_23 = arith.constant 0 : index
    %c0_24 = arith.constant 0 : index
    %47 = vector.load %arg6[%c0_22, %c0_23, %c0_24] : memref<2x32x96xf32, #tpu.memory_space<vmem>>, vector<1x32x96xf32>
    %48 = vector.shape_cast %47 : vector<1x32x96xf32> to vector<32x96xf32>
    %c1 = arith.constant 1 : index
    %c0_25 = arith.constant 0 : index
    %c0_26 = arith.constant 0 : index
    %49 = vector.load %arg6[%c1, %c0_25, %c0_26] : memref<2x32x96xf32, #tpu.memory_space<vmem>>, vector<1x32x96xf32>
    %50 = vector.shape_cast %49 : vector<1x32x96xf32> to vector<32x96xf32>
    %c0_27 = arith.constant 0 : index
    %c0_28 = arith.constant 0 : index
    %c0_29 = arith.constant 0 : index
    %51 = vector.load %arg7[%c0_27, %c0_28, %c0_29] : memref<2x32x96xf32, #tpu.memory_space<vmem>>, vector<1x32x96xf32>
    %52 = vector.shape_cast %51 : vector<1x32x96xf32> to vector<32x96xf32>
    %c1_30 = arith.constant 1 : index
    %c0_31 = arith.constant 0 : index
    %c0_32 = arith.constant 0 : index
    %53 = vector.load %arg7[%c1_30, %c0_31, %c0_32] : memref<2x32x96xf32, #tpu.memory_space<vmem>>, vector<1x32x96xf32>
    %54 = vector.shape_cast %53 : vector<1x32x96xf32> to vector<32x96xf32>
    %c0_33 = arith.constant 0 : index
    %c0_34 = arith.constant 0 : index
    %c0_35 = arith.constant 0 : index
    %55 = vector.load %arg8[%c0_33, %c0_34, %c0_35] : memref<2x1x96xf32, #tpu.memory_space<vmem>>, vector<1x1x96xf32>
    %56 = vector.shape_cast %55 : vector<1x1x96xf32> to vector<1x96xf32>
    %c1_36 = arith.constant 1 : index
    %c0_37 = arith.constant 0 : index
    %c0_38 = arith.constant 0 : index
    %57 = vector.load %arg8[%c1_36, %c0_37, %c0_38] : memref<2x1x96xf32, #tpu.memory_space<vmem>>, vector<1x1x96xf32>
    %58 = vector.shape_cast %57 : vector<1x1x96xf32> to vector<1x96xf32>
    %c0_39 = arith.constant 0 : index
    %c0_40 = arith.constant 0 : index
    %c0_41 = arith.constant 0 : index
    %59 = vector.load %arg9[%c0_39, %c0_40, %c0_41] : memref<2x1x32xf32, #tpu.memory_space<vmem>>, vector<1x1x32xf32>
    %60 = vector.shape_cast %59 : vector<1x1x32xf32> to vector<1x32xf32>
    %c1_42 = arith.constant 1 : index
    %c0_43 = arith.constant 0 : index
    %c0_44 = arith.constant 0 : index
    %61 = vector.load %arg9[%c1_42, %c0_43, %c0_44] : memref<2x1x32xf32, #tpu.memory_space<vmem>>, vector<1x1x32xf32>
    %62 = vector.shape_cast %61 : vector<1x1x32xf32> to vector<1x32xf32>
    %cst_45 = arith.constant dense<0.000000e+00> : vector<64x96xf32>
    %63 = tpu.matmul %46, %48, %cst_45 {dimension_numbers = #tpu.dot_dimension_numbers<[1], [0], [0], [1], [0, 0, 1, 1], [], []>} : vector<64x32xf32>, vector<32x96xf32>, vector<64x96xf32> -> vector<64x96xf32>
    %64 = vector.broadcast %56 : vector<1x96xf32> to vector<64x96xf32>
    %65 = arith.addf %63, %64 : vector<64x96xf32>
    %c0_46 = arith.constant 0 : index
    %c0_47 = arith.constant 0 : index
    %c0_48 = arith.constant 0 : index
    %66 = vector.load %arg1[%c0_46, %c0_47, %c0_48] : memref<2x8x32xf32, #tpu.memory_space<vmem>>, vector<1x8x32xf32>
    %67 = vector.shape_cast %66 : vector<1x8x32xf32> to vector<8x32xf32>
    %c1_49 = arith.constant 1 : index
    %c0_50 = arith.constant 0 : index
    %c0_51 = arith.constant 0 : index
    %68 = vector.load %arg1[%c1_49, %c0_50, %c0_51] : memref<2x8x32xf32, #tpu.memory_space<vmem>>, vector<1x8x32xf32>
    %69 = vector.shape_cast %68 : vector<1x8x32xf32> to vector<8x32xf32>
    %70 = vector.extract_strided_slice %65 {offsets = [0, 0], sizes = [8, 96], strides = [1, 1]} : vector<64x96xf32> to vector<8x96xf32>
    %cst_52 = arith.constant dense<0.000000e+00> : vector<8x96xf32>
    %71 = tpu.matmul %67, %52, %cst_52 {dimension_numbers = #tpu.dot_dimension_numbers<[1], [0], [0], [1], [0, 0, 1, 1], [], []>} : vector<8x32xf32>, vector<32x96xf32>, vector<8x96xf32> -> vector<8x96xf32>
    %72 = vector.extract_strided_slice %70 {offsets = [0, 0], sizes = [8, 64], strides = [1, 1]} : vector<8x96xf32> to vector<8x64xf32>
    %73 = vector.extract_strided_slice %71 {offsets = [0, 0], sizes = [8, 64], strides = [1, 1]} : vector<8x96xf32> to vector<8x64xf32>
    %74 = arith.addf %72, %73 : vector<8x64xf32>
    %75 = arith.negf %74 : vector<8x64xf32>
    %76 = math.exp %75 : vector<8x64xf32>
    %cst_53 = arith.constant 1.000000e+00 : f32
    %77 = vector.broadcast %cst_53 : f32 to vector<8x64xf32>
    %78 = arith.addf %77, %76 : vector<8x64xf32>
    %79 = arith.divf %77, %78 : vector<8x64xf32>
    %80 = vector.extract_strided_slice %79 {offsets = [0, 0], sizes = [8, 32], strides = [1, 1]} : vector<8x64xf32> to vector<8x32xf32>
    %81 = vector.extract_strided_slice %79 {offsets = [0, 32], sizes = [8, 32], strides = [1, 1]} : vector<8x64xf32> to vector<8x32xf32>
    %82 = vector.extract_strided_slice %70 {offsets = [0, 64], sizes = [8, 32], strides = [1, 1]} : vector<8x96xf32> to vector<8x32xf32>
    %83 = vector.extract_strided_slice %71 {offsets = [0, 64], sizes = [8, 32], strides = [1, 1]} : vector<8x96xf32> to vector<8x32xf32>
    %84 = vector.broadcast %60 : vector<1x32xf32> to vector<8x32xf32>
    %85 = arith.addf %83, %84 : vector<8x32xf32>
    %86 = arith.mulf %80, %85 : vector<8x32xf32>
    %87 = arith.addf %82, %86 : vector<8x32xf32>
    %88 = math.tanh %87 : vector<8x32xf32>
    %cst_54 = arith.constant 1.000000e+00 : f32
    %89 = vector.broadcast %cst_54 : f32 to vector<8x32xf32>
    %90 = arith.subf %89, %81 : vector<8x32xf32>
    %91 = arith.mulf %90, %88 : vector<8x32xf32>
    %92 = arith.mulf %81, %67 : vector<8x32xf32>
    %93 = arith.addf %91, %92 : vector<8x32xf32>
    %94 = vector.extract_strided_slice %65 {offsets = [8, 0], sizes = [8, 96], strides = [1, 1]} : vector<64x96xf32> to vector<8x96xf32>
    %cst_55 = arith.constant dense<0.000000e+00> : vector<8x96xf32>
    %95 = tpu.matmul %93, %52, %cst_55 {dimension_numbers = #tpu.dot_dimension_numbers<[1], [0], [0], [1], [0, 0, 1, 1], [], []>} : vector<8x32xf32>, vector<32x96xf32>, vector<8x96xf32> -> vector<8x96xf32>
    %96 = vector.extract_strided_slice %94 {offsets = [0, 0], sizes = [8, 64], strides = [1, 1]} : vector<8x96xf32> to vector<8x64xf32>
    %97 = vector.extract_strided_slice %95 {offsets = [0, 0], sizes = [8, 64], strides = [1, 1]} : vector<8x96xf32> to vector<8x64xf32>
    %98 = arith.addf %96, %97 : vector<8x64xf32>
    %99 = arith.negf %98 : vector<8x64xf32>
    %100 = math.exp %99 : vector<8x64xf32>
    %cst_56 = arith.constant 1.000000e+00 : f32
    %101 = vector.broadcast %cst_56 : f32 to vector<8x64xf32>
    %102 = arith.addf %101, %100 : vector<8x64xf32>
    %103 = arith.divf %101, %102 : vector<8x64xf32>
    %104 = vector.extract_strided_slice %103 {offsets = [0, 0], sizes = [8, 32], strides = [1, 1]} : vector<8x64xf32> to vector<8x32xf32>
    %105 = vector.extract_strided_slice %103 {offsets = [0, 32], sizes = [8, 32], strides = [1, 1]} : vector<8x64xf32> to vector<8x32xf32>
    %106 = vector.extract_strided_slice %94 {offsets = [0, 64], sizes = [8, 32], strides = [1, 1]} : vector<8x96xf32> to vector<8x32xf32>
    %107 = vector.extract_strided_slice %95 {offsets = [0, 64], sizes = [8, 32], strides = [1, 1]} : vector<8x96xf32> to vector<8x32xf32>
    %108 = vector.broadcast %60 : vector<1x32xf32> to vector<8x32xf32>
    %109 = arith.addf %107, %108 : vector<8x32xf32>
    %110 = arith.mulf %104, %109 : vector<8x32xf32>
    %111 = arith.addf %106, %110 : vector<8x32xf32>
    %112 = math.tanh %111 : vector<8x32xf32>
    %cst_57 = arith.constant 1.000000e+00 : f32
    %113 = vector.broadcast %cst_57 : f32 to vector<8x32xf32>
    %114 = arith.subf %113, %105 : vector<8x32xf32>
    %115 = arith.mulf %114, %112 : vector<8x32xf32>
    %116 = arith.mulf %105, %93 : vector<8x32xf32>
    %117 = arith.addf %115, %116 : vector<8x32xf32>
    %cst_58 = arith.constant dense<0.000000e+00> : vector<8x96xf32>
    %118 = tpu.matmul %93, %50, %cst_58 {dimension_numbers = #tpu.dot_dimension_numbers<[1], [0], [0], [1], [0, 0, 1, 1], [], []>} : vector<8x32xf32>, vector<32x96xf32>, vector<8x96xf32> -> vector<8x96xf32>
    %119 = vector.broadcast %58 : vector<1x96xf32> to vector<8x96xf32>
    %120 = arith.addf %118, %119 : vector<8x96xf32>
    %cst_59 = arith.constant dense<0.000000e+00> : vector<8x96xf32>
    %121 = tpu.matmul %69, %54, %cst_59 {dimension_numbers = #tpu.dot_dimension_numbers<[1], [0], [0], [1], [0, 0, 1, 1], [], []>} : vector<8x32xf32>, vector<32x96xf32>, vector<8x96xf32> -> vector<8x96xf32>
    %122 = vector.extract_strided_slice %120 {offsets = [0, 0], sizes = [8, 64], strides = [1, 1]} : vector<8x96xf32> to vector<8x64xf32>
    %123 = vector.extract_strided_slice %121 {offsets = [0, 0], sizes = [8, 64], strides = [1, 1]} : vector<8x96xf32> to vector<8x64xf32>
    %124 = arith.addf %122, %123 : vector<8x64xf32>
    %125 = arith.negf %124 : vector<8x64xf32>
    %126 = math.exp %125 : vector<8x64xf32>
    %cst_60 = arith.constant 1.000000e+00 : f32
    %127 = vector.broadcast %cst_60 : f32 to vector<8x64xf32>
    %128 = arith.addf %127, %126 : vector<8x64xf32>
    %129 = arith.divf %127, %128 : vector<8x64xf32>
    %130 = vector.extract_strided_slice %129 {offsets = [0, 0], sizes = [8, 32], strides = [1, 1]} : vector<8x64xf32> to vector<8x32xf32>
    %131 = vector.extract_strided_slice %129 {offsets = [0, 32], sizes = [8, 32], strides = [1, 1]} : vector<8x64xf32> to vector<8x32xf32>
    %132 = vector.extract_strided_slice %120 {offsets = [0, 64], sizes = [8, 32], strides = [1, 1]} : vector<8x96xf32> to vector<8x32xf32>
    %133 = vector.extract_strided_slice %121 {offsets = [0, 64], sizes = [8, 32], strides = [1, 1]} : vector<8x96xf32> to vector<8x32xf32>
    %134 = vector.broadcast %62 : vector<1x32xf32> to vector<8x32xf32>
    %135 = arith.addf %133, %134 : vector<8x32xf32>
    %136 = arith.mulf %130, %135 : vector<8x32xf32>
    %137 = arith.addf %132, %136 : vector<8x32xf32>
    %138 = math.tanh %137 : vector<8x32xf32>
    %cst_61 = arith.constant 1.000000e+00 : f32
    %139 = vector.broadcast %cst_61 : f32 to vector<8x32xf32>
    %140 = arith.subf %139, %131 : vector<8x32xf32>
    %141 = arith.mulf %140, %138 : vector<8x32xf32>
    %142 = arith.mulf %131, %69 : vector<8x32xf32>
    %143 = arith.addf %141, %142 : vector<8x32xf32>
    %c0_62 = arith.constant 0 : index
    %c0_63 = arith.constant 0 : index
    %144 = vector.load %arg16[%c0_62, %c0_63] : memref<64x32xf32, #tpu.memory_space<vmem>>, vector<8x32xf32>
    tpu.vector_store %arg16[%c0_62, %c0_63], %143 {strides = array<i32>} : memref<64x32xf32, #tpu.memory_space<vmem>>, vector<8x32xf32>,
    %145 = vector.extract_strided_slice %65 {offsets = [16, 0], sizes = [8, 96], strides = [1, 1]} : vector<64x96xf32> to vector<8x96xf32>
    %cst_64 = arith.constant dense<0.000000e+00> : vector<8x96xf32>
    %146 = tpu.matmul %117, %52, %cst_64 {dimension_numbers = #tpu.dot_dimension_numbers<[1], [0], [0], [1], [0, 0, 1, 1], [], []>} : vector<8x32xf32>, vector<32x96xf32>, vector<8x96xf32> -> vector<8x96xf32>
    %147 = vector.extract_strided_slice %145 {offsets = [0, 0], sizes = [8, 64], strides = [1, 1]} : vector<8x96xf32> to vector<8x64xf32>
    %148 = vector.extract_strided_slice %146 {offsets = [0, 0], sizes = [8, 64], strides = [1, 1]} : vector<8x96xf32> to vector<8x64xf32>
    %149 = arith.addf %147, %148 : vector<8x64xf32>
    %150 = arith.negf %149 : vector<8x64xf32>
    %151 = math.exp %150 : vector<8x64xf32>
    %cst_65 = arith.constant 1.000000e+00 : f32
    %152 = vector.broadcast %cst_65 : f32 to vector<8x64xf32>
    %153 = arith.addf %152, %151 : vector<8x64xf32>
    %154 = arith.divf %152, %153 : vector<8x64xf32>
    %155 = vector.extract_strided_slice %154 {offsets = [0, 0], sizes = [8, 32], strides = [1, 1]} : vector<8x64xf32> to vector<8x32xf32>
    %156 = vector.extract_strided_slice %154 {offsets = [0, 32], sizes = [8, 32], strides = [1, 1]} : vector<8x64xf32> to vector<8x32xf32>
    %157 = vector.extract_strided_slice %145 {offsets = [0, 64], sizes = [8, 32], strides = [1, 1]} : vector<8x96xf32> to vector<8x32xf32>
    %158 = vector.extract_strided_slice %146 {offsets = [0, 64], sizes = [8, 32], strides = [1, 1]} : vector<8x96xf32> to vector<8x32xf32>
    %159 = vector.broadcast %60 : vector<1x32xf32> to vector<8x32xf32>
    %160 = arith.addf %158, %159 : vector<8x32xf32>
    %161 = arith.mulf %155, %160 : vector<8x32xf32>
    %162 = arith.addf %157, %161 : vector<8x32xf32>
    %163 = math.tanh %162 : vector<8x32xf32>
    %cst_66 = arith.constant 1.000000e+00 : f32
    %164 = vector.broadcast %cst_66 : f32 to vector<8x32xf32>
    %165 = arith.subf %164, %156 : vector<8x32xf32>
    %166 = arith.mulf %165, %163 : vector<8x32xf32>
    %167 = arith.mulf %156, %117 : vector<8x32xf32>
    %168 = arith.addf %166, %167 : vector<8x32xf32>
    %cst_67 = arith.constant dense<0.000000e+00> : vector<8x96xf32>
    %169 = tpu.matmul %117, %50, %cst_67 {dimension_numbers = #tpu.dot_dimension_numbers<[1], [0], [0], [1], [0, 0, 1, 1], [], []>} : vector<8x32xf32>, vector<32x96xf32>, vector<8x96xf32> -> vector<8x96xf32>
    %170 = vector.broadcast %58 : vector<1x96xf32> to vector<8x96xf32>
    %171 = arith.addf %169, %170 : vector<8x96xf32>
    %cst_68 = arith.constant dense<0.000000e+00> : vector<8x96xf32>
    %172 = tpu.matmul %143, %54, %cst_68 {dimension_numbers = #tpu.dot_dimension_numbers<[1], [0], [0], [1], [0, 0, 1, 1], [], []>} : vector<8x32xf32>, vector<32x96xf32>, vector<8x96xf32> -> vector<8x96xf32>
    %173 = vector.extract_strided_slice %171 {offsets = [0, 0], sizes = [8, 64], strides = [1, 1]} : vector<8x96xf32> to vector<8x64xf32>
    %174 = vector.extract_strided_slice %172 {offsets = [0, 0], sizes = [8, 64], strides = [1, 1]} : vector<8x96xf32> to vector<8x64xf32>
    %175 = arith.addf %173, %174 : vector<8x64xf32>
    %176 = arith.negf %175 : vector<8x64xf32>
    %177 = math.exp %176 : vector<8x64xf32>
    %cst_69 = arith.constant 1.000000e+00 : f32
    %178 = vector.broadcast %cst_69 : f32 to vector<8x64xf32>
    %179 = arith.addf %178, %177 : vector<8x64xf32>
    %180 = arith.divf %178, %179 : vector<8x64xf32>
    %181 = vector.extract_strided_slice %180 {offsets = [0, 0], sizes = [8, 32], strides = [1, 1]} : vector<8x64xf32> to vector<8x32xf32>
    %182 = vector.extract_strided_slice %180 {offsets = [0, 32], sizes = [8, 32], strides = [1, 1]} : vector<8x64xf32> to vector<8x32xf32>
    %183 = vector.extract_strided_slice %171 {offsets = [0, 64], sizes = [8, 32], strides = [1, 1]} : vector<8x96xf32> to vector<8x32xf32>
    %184 = vector.extract_strided_slice %172 {offsets = [0, 64], sizes = [8, 32], strides = [1, 1]} : vector<8x96xf32> to vector<8x32xf32>
    %185 = vector.broadcast %62 : vector<1x32xf32> to vector<8x32xf32>
    %186 = arith.addf %184, %185 : vector<8x32xf32>
    %187 = arith.mulf %181, %186 : vector<8x32xf32>
    %188 = arith.addf %183, %187 : vector<8x32xf32>
    %189 = math.tanh %188 : vector<8x32xf32>
    %cst_70 = arith.constant 1.000000e+00 : f32
    %190 = vector.broadcast %cst_70 : f32 to vector<8x32xf32>
    %191 = arith.subf %190, %182 : vector<8x32xf32>
    %192 = arith.mulf %191, %189 : vector<8x32xf32>
    %193 = arith.mulf %182, %143 : vector<8x32xf32>
    %194 = arith.addf %192, %193 : vector<8x32xf32>
    %c8 = arith.constant 8 : index
    %c0_71 = arith.constant 0 : index
    %195 = vector.load %arg16[%c8, %c0_71] : memref<64x32xf32, #tpu.memory_space<vmem>>, vector<8x32xf32>
    tpu.vector_store %arg16[%c8, %c0_71], %194 {strides = array<i32>} : memref<64x32xf32, #tpu.memory_space<vmem>>, vector<8x32xf32>,
    %196 = vector.extract_strided_slice %65 {offsets = [24, 0], sizes = [8, 96], strides = [1, 1]} : vector<64x96xf32> to vector<8x96xf32>
    %cst_72 = arith.constant dense<0.000000e+00> : vector<8x96xf32>
    %197 = tpu.matmul %168, %52, %cst_72 {dimension_numbers = #tpu.dot_dimension_numbers<[1], [0], [0], [1], [0, 0, 1, 1], [], []>} : vector<8x32xf32>, vector<32x96xf32>, vector<8x96xf32> -> vector<8x96xf32>
    %198 = vector.extract_strided_slice %196 {offsets = [0, 0], sizes = [8, 64], strides = [1, 1]} : vector<8x96xf32> to vector<8x64xf32>
    %199 = vector.extract_strided_slice %197 {offsets = [0, 0], sizes = [8, 64], strides = [1, 1]} : vector<8x96xf32> to vector<8x64xf32>
    %200 = arith.addf %198, %199 : vector<8x64xf32>
    %201 = arith.negf %200 : vector<8x64xf32>
    %202 = math.exp %201 : vector<8x64xf32>
    %cst_73 = arith.constant 1.000000e+00 : f32
    %203 = vector.broadcast %cst_73 : f32 to vector<8x64xf32>
    %204 = arith.addf %203, %202 : vector<8x64xf32>
    %205 = arith.divf %203, %204 : vector<8x64xf32>
    %206 = vector.extract_strided_slice %205 {offsets = [0, 0], sizes = [8, 32], strides = [1, 1]} : vector<8x64xf32> to vector<8x32xf32>
    %207 = vector.extract_strided_slice %205 {offsets = [0, 32], sizes = [8, 32], strides = [1, 1]} : vector<8x64xf32> to vector<8x32xf32>
    %208 = vector.extract_strided_slice %196 {offsets = [0, 64], sizes = [8, 32], strides = [1, 1]} : vector<8x96xf32> to vector<8x32xf32>
    %209 = vector.extract_strided_slice %197 {offsets = [0, 64], sizes = [8, 32], strides = [1, 1]} : vector<8x96xf32> to vector<8x32xf32>
    %210 = vector.broadcast %60 : vector<1x32xf32> to vector<8x32xf32>
    %211 = arith.addf %209, %210 : vector<8x32xf32>
    %212 = arith.mulf %206, %211 : vector<8x32xf32>
    %213 = arith.addf %208, %212 : vector<8x32xf32>
    %214 = math.tanh %213 : vector<8x32xf32>
    %cst_74 = arith.constant 1.000000e+00 : f32
    %215 = vector.broadcast %cst_74 : f32 to vector<8x32xf32>
    %216 = arith.subf %215, %207 : vector<8x32xf32>
    %217 = arith.mulf %216, %214 : vector<8x32xf32>
    %218 = arith.mulf %207, %168 : vector<8x32xf32>
    %219 = arith.addf %217, %218 : vector<8x32xf32>
    %cst_75 = arith.constant dense<0.000000e+00> : vector<8x96xf32>
    %220 = tpu.matmul %168, %50, %cst_75 {dimension_numbers = #tpu.dot_dimension_numbers<[1], [0], [0], [1], [0, 0, 1, 1], [], []>} : vector<8x32xf32>, vector<32x96xf32>, vector<8x96xf32> -> vector<8x96xf32>
    %221 = vector.broadcast %58 : vector<1x96xf32> to vector<8x96xf32>
    %222 = arith.addf %220, %221 : vector<8x96xf32>
    %cst_76 = arith.constant dense<0.000000e+00> : vector<8x96xf32>
    %223 = tpu.matmul %194, %54, %cst_76 {dimension_numbers = #tpu.dot_dimension_numbers<[1], [0], [0], [1], [0, 0, 1, 1], [], []>} : vector<8x32xf32>, vector<32x96xf32>, vector<8x96xf32> -> vector<8x96xf32>
    %224 = vector.extract_strided_slice %222 {offsets = [0, 0], sizes = [8, 64], strides = [1, 1]} : vector<8x96xf32> to vector<8x64xf32>
    %225 = vector.extract_strided_slice %223 {offsets = [0, 0], sizes = [8, 64], strides = [1, 1]} : vector<8x96xf32> to vector<8x64xf32>
    %226 = arith.addf %224, %225 : vector<8x64xf32>
    %227 = arith.negf %226 : vector<8x64xf32>
    %228 = math.exp %227 : vector<8x64xf32>
    %cst_77 = arith.constant 1.000000e+00 : f32
    %229 = vector.broadcast %cst_77 : f32 to vector<8x64xf32>
    %230 = arith.addf %229, %228 : vector<8x64xf32>
    %231 = arith.divf %229, %230 : vector<8x64xf32>
    %232 = vector.extract_strided_slice %231 {offsets = [0, 0], sizes = [8, 32], strides = [1, 1]} : vector<8x64xf32> to vector<8x32xf32>
    %233 = vector.extract_strided_slice %231 {offsets = [0, 32], sizes = [8, 32], strides = [1, 1]} : vector<8x64xf32> to vector<8x32xf32>
    %234 = vector.extract_strided_slice %222 {offsets = [0, 64], sizes = [8, 32], strides = [1, 1]} : vector<8x96xf32> to vector<8x32xf32>
    %235 = vector.extract_strided_slice %223 {offsets = [0, 64], sizes = [8, 32], strides = [1, 1]} : vector<8x96xf32> to vector<8x32xf32>
    %236 = vector.broadcast %62 : vector<1x32xf32> to vector<8x32xf32>
    %237 = arith.addf %235, %236 : vector<8x32xf32>
    %238 = arith.mulf %232, %237 : vector<8x32xf32>
    %239 = arith.addf %234, %238 : vector<8x32xf32>
    %240 = math.tanh %239 : vector<8x32xf32>
    %cst_78 = arith.constant 1.000000e+00 : f32
    %241 = vector.broadcast %cst_78 : f32 to vector<8x32xf32>
    %242 = arith.subf %241, %233 : vector<8x32xf32>
    %243 = arith.mulf %242, %240 : vector<8x32xf32>
    %244 = arith.mulf %233, %194 : vector<8x32xf32>
    %245 = arith.addf %243, %244 : vector<8x32xf32>
    %c16 = arith.constant 16 : index
    %c0_79 = arith.constant 0 : index
    %246 = vector.load %arg16[%c16, %c0_79] : memref<64x32xf32, #tpu.memory_space<vmem>>, vector<8x32xf32>
    tpu.vector_store %arg16[%c16, %c0_79], %245 {strides = array<i32>} : memref<64x32xf32, #tpu.memory_space<vmem>>, vector<8x32xf32>,
    %247 = vector.extract_strided_slice %65 {offsets = [32, 0], sizes = [8, 96], strides = [1, 1]} : vector<64x96xf32> to vector<8x96xf32>
    %cst_80 = arith.constant dense<0.000000e+00> : vector<8x96xf32>
    %248 = tpu.matmul %219, %52, %cst_80 {dimension_numbers = #tpu.dot_dimension_numbers<[1], [0], [0], [1], [0, 0, 1, 1], [], []>} : vector<8x32xf32>, vector<32x96xf32>, vector<8x96xf32> -> vector<8x96xf32>
    %249 = vector.extract_strided_slice %247 {offsets = [0, 0], sizes = [8, 64], strides = [1, 1]} : vector<8x96xf32> to vector<8x64xf32>
    %250 = vector.extract_strided_slice %248 {offsets = [0, 0], sizes = [8, 64], strides = [1, 1]} : vector<8x96xf32> to vector<8x64xf32>
    %251 = arith.addf %249, %250 : vector<8x64xf32>
    %252 = arith.negf %251 : vector<8x64xf32>
    %253 = math.exp %252 : vector<8x64xf32>
    %cst_81 = arith.constant 1.000000e+00 : f32
    %254 = vector.broadcast %cst_81 : f32 to vector<8x64xf32>
    %255 = arith.addf %254, %253 : vector<8x64xf32>
    %256 = arith.divf %254, %255 : vector<8x64xf32>
    %257 = vector.extract_strided_slice %256 {offsets = [0, 0], sizes = [8, 32], strides = [1, 1]} : vector<8x64xf32> to vector<8x32xf32>
    %258 = vector.extract_strided_slice %256 {offsets = [0, 32], sizes = [8, 32], strides = [1, 1]} : vector<8x64xf32> to vector<8x32xf32>
    %259 = vector.extract_strided_slice %247 {offsets = [0, 64], sizes = [8, 32], strides = [1, 1]} : vector<8x96xf32> to vector<8x32xf32>
    %260 = vector.extract_strided_slice %248 {offsets = [0, 64], sizes = [8, 32], strides = [1, 1]} : vector<8x96xf32> to vector<8x32xf32>
    %261 = vector.broadcast %60 : vector<1x32xf32> to vector<8x32xf32>
    %262 = arith.addf %260, %261 : vector<8x32xf32>
    %263 = arith.mulf %257, %262 : vector<8x32xf32>
    %264 = arith.addf %259, %263 : vector<8x32xf32>
    %265 = math.tanh %264 : vector<8x32xf32>
    %cst_82 = arith.constant 1.000000e+00 : f32
    %266 = vector.broadcast %cst_82 : f32 to vector<8x32xf32>
    %267 = arith.subf %266, %258 : vector<8x32xf32>
    %268 = arith.mulf %267, %265 : vector<8x32xf32>
    %269 = arith.mulf %258, %219 : vector<8x32xf32>
    %270 = arith.addf %268, %269 : vector<8x32xf32>
    %cst_83 = arith.constant dense<0.000000e+00> : vector<8x96xf32>
    %271 = tpu.matmul %219, %50, %cst_83 {dimension_numbers = #tpu.dot_dimension_numbers<[1], [0], [0], [1], [0, 0, 1, 1], [], []>} : vector<8x32xf32>, vector<32x96xf32>, vector<8x96xf32> -> vector<8x96xf32>
    %272 = vector.broadcast %58 : vector<1x96xf32> to vector<8x96xf32>
    %273 = arith.addf %271, %272 : vector<8x96xf32>
    %cst_84 = arith.constant dense<0.000000e+00> : vector<8x96xf32>
    %274 = tpu.matmul %245, %54, %cst_84 {dimension_numbers = #tpu.dot_dimension_numbers<[1], [0], [0], [1], [0, 0, 1, 1], [], []>} : vector<8x32xf32>, vector<32x96xf32>, vector<8x96xf32> -> vector<8x96xf32>
    %275 = vector.extract_strided_slice %273 {offsets = [0, 0], sizes = [8, 64], strides = [1, 1]} : vector<8x96xf32> to vector<8x64xf32>
    %276 = vector.extract_strided_slice %274 {offsets = [0, 0], sizes = [8, 64], strides = [1, 1]} : vector<8x96xf32> to vector<8x64xf32>
    %277 = arith.addf %275, %276 : vector<8x64xf32>
    %278 = arith.negf %277 : vector<8x64xf32>
    %279 = math.exp %278 : vector<8x64xf32>
    %cst_85 = arith.constant 1.000000e+00 : f32
    %280 = vector.broadcast %cst_85 : f32 to vector<8x64xf32>
    %281 = arith.addf %280, %279 : vector<8x64xf32>
    %282 = arith.divf %280, %281 : vector<8x64xf32>
    %283 = vector.extract_strided_slice %282 {offsets = [0, 0], sizes = [8, 32], strides = [1, 1]} : vector<8x64xf32> to vector<8x32xf32>
    %284 = vector.extract_strided_slice %282 {offsets = [0, 32], sizes = [8, 32], strides = [1, 1]} : vector<8x64xf32> to vector<8x32xf32>
    %285 = vector.extract_strided_slice %273 {offsets = [0, 64], sizes = [8, 32], strides = [1, 1]} : vector<8x96xf32> to vector<8x32xf32>
    %286 = vector.extract_strided_slice %274 {offsets = [0, 64], sizes = [8, 32], strides = [1, 1]} : vector<8x96xf32> to vector<8x32xf32>
    %287 = vector.broadcast %62 : vector<1x32xf32> to vector<8x32xf32>
    %288 = arith.addf %286, %287 : vector<8x32xf32>
    %289 = arith.mulf %283, %288 : vector<8x32xf32>
    %290 = arith.addf %285, %289 : vector<8x32xf32>
    %291 = math.tanh %290 : vector<8x32xf32>
    %cst_86 = arith.constant 1.000000e+00 : f32
    %292 = vector.broadcast %cst_86 : f32 to vector<8x32xf32>
    %293 = arith.subf %292, %284 : vector<8x32xf32>
    %294 = arith.mulf %293, %291 : vector<8x32xf32>
    %295 = arith.mulf %284, %245 : vector<8x32xf32>
    %296 = arith.addf %294, %295 : vector<8x32xf32>
    %c24 = arith.constant 24 : index
    %c0_87 = arith.constant 0 : index
    %297 = vector.load %arg16[%c24, %c0_87] : memref<64x32xf32, #tpu.memory_space<vmem>>, vector<8x32xf32>
    tpu.vector_store %arg16[%c24, %c0_87], %296 {strides = array<i32>} : memref<64x32xf32, #tpu.memory_space<vmem>>, vector<8x32xf32>,
    %298 = vector.extract_strided_slice %65 {offsets = [40, 0], sizes = [8, 96], strides = [1, 1]} : vector<64x96xf32> to vector<8x96xf32>
    %cst_88 = arith.constant dense<0.000000e+00> : vector<8x96xf32>
    %299 = tpu.matmul %270, %52, %cst_88 {dimension_numbers = #tpu.dot_dimension_numbers<[1], [0], [0], [1], [0, 0, 1, 1], [], []>} : vector<8x32xf32>, vector<32x96xf32>, vector<8x96xf32> -> vector<8x96xf32>
    %300 = vector.extract_strided_slice %298 {offsets = [0, 0], sizes = [8, 64], strides = [1, 1]} : vector<8x96xf32> to vector<8x64xf32>
    %301 = vector.extract_strided_slice %299 {offsets = [0, 0], sizes = [8, 64], strides = [1, 1]} : vector<8x96xf32> to vector<8x64xf32>
    %302 = arith.addf %300, %301 : vector<8x64xf32>
    %303 = arith.negf %302 : vector<8x64xf32>
    %304 = math.exp %303 : vector<8x64xf32>
    %cst_89 = arith.constant 1.000000e+00 : f32
    %305 = vector.broadcast %cst_89 : f32 to vector<8x64xf32>
    %306 = arith.addf %305, %304 : vector<8x64xf32>
    %307 = arith.divf %305, %306 : vector<8x64xf32>
    %308 = vector.extract_strided_slice %307 {offsets = [0, 0], sizes = [8, 32], strides = [1, 1]} : vector<8x64xf32> to vector<8x32xf32>
    %309 = vector.extract_strided_slice %307 {offsets = [0, 32], sizes = [8, 32], strides = [1, 1]} : vector<8x64xf32> to vector<8x32xf32>
    %310 = vector.extract_strided_slice %298 {offsets = [0, 64], sizes = [8, 32], strides = [1, 1]} : vector<8x96xf32> to vector<8x32xf32>
    %311 = vector.extract_strided_slice %299 {offsets = [0, 64], sizes = [8, 32], strides = [1, 1]} : vector<8x96xf32> to vector<8x32xf32>
    %312 = vector.broadcast %60 : vector<1x32xf32> to vector<8x32xf32>
    %313 = arith.addf %311, %312 : vector<8x32xf32>
    %314 = arith.mulf %308, %313 : vector<8x32xf32>
    %315 = arith.addf %310, %314 : vector<8x32xf32>
    %316 = math.tanh %315 : vector<8x32xf32>
    %cst_90 = arith.constant 1.000000e+00 : f32
    %317 = vector.broadcast %cst_90 : f32 to vector<8x32xf32>
    %318 = arith.subf %317, %309 : vector<8x32xf32>
    %319 = arith.mulf %318, %316 : vector<8x32xf32>
    %320 = arith.mulf %309, %270 : vector<8x32xf32>
    %321 = arith.addf %319, %320 : vector<8x32xf32>
    %cst_91 = arith.constant dense<0.000000e+00> : vector<8x96xf32>
    %322 = tpu.matmul %270, %50, %cst_91 {dimension_numbers = #tpu.dot_dimension_numbers<[1], [0], [0], [1], [0, 0, 1, 1], [], []>} : vector<8x32xf32>, vector<32x96xf32>, vector<8x96xf32> -> vector<8x96xf32>
    %323 = vector.broadcast %58 : vector<1x96xf32> to vector<8x96xf32>
    %324 = arith.addf %322, %323 : vector<8x96xf32>
    %cst_92 = arith.constant dense<0.000000e+00> : vector<8x96xf32>
    %325 = tpu.matmul %296, %54, %cst_92 {dimension_numbers = #tpu.dot_dimension_numbers<[1], [0], [0], [1], [0, 0, 1, 1], [], []>} : vector<8x32xf32>, vector<32x96xf32>, vector<8x96xf32> -> vector<8x96xf32>
    %326 = vector.extract_strided_slice %324 {offsets = [0, 0], sizes = [8, 64], strides = [1, 1]} : vector<8x96xf32> to vector<8x64xf32>
    %327 = vector.extract_strided_slice %325 {offsets = [0, 0], sizes = [8, 64], strides = [1, 1]} : vector<8x96xf32> to vector<8x64xf32>
    %328 = arith.addf %326, %327 : vector<8x64xf32>
    %329 = arith.negf %328 : vector<8x64xf32>
    %330 = math.exp %329 : vector<8x64xf32>
    %cst_93 = arith.constant 1.000000e+00 : f32
    %331 = vector.broadcast %cst_93 : f32 to vector<8x64xf32>
    %332 = arith.addf %331, %330 : vector<8x64xf32>
    %333 = arith.divf %331, %332 : vector<8x64xf32>
    %334 = vector.extract_strided_slice %333 {offsets = [0, 0], sizes = [8, 32], strides = [1, 1]} : vector<8x64xf32> to vector<8x32xf32>
    %335 = vector.extract_strided_slice %333 {offsets = [0, 32], sizes = [8, 32], strides = [1, 1]} : vector<8x64xf32> to vector<8x32xf32>
    %336 = vector.extract_strided_slice %324 {offsets = [0, 64], sizes = [8, 32], strides = [1, 1]} : vector<8x96xf32> to vector<8x32xf32>
    %337 = vector.extract_strided_slice %325 {offsets = [0, 64], sizes = [8, 32], strides = [1, 1]} : vector<8x96xf32> to vector<8x32xf32>
    %338 = vector.broadcast %62 : vector<1x32xf32> to vector<8x32xf32>
    %339 = arith.addf %337, %338 : vector<8x32xf32>
    %340 = arith.mulf %334, %339 : vector<8x32xf32>
    %341 = arith.addf %336, %340 : vector<8x32xf32>
    %342 = math.tanh %341 : vector<8x32xf32>
    %cst_94 = arith.constant 1.000000e+00 : f32
    %343 = vector.broadcast %cst_94 : f32 to vector<8x32xf32>
    %344 = arith.subf %343, %335 : vector<8x32xf32>
    %345 = arith.mulf %344, %342 : vector<8x32xf32>
    %346 = arith.mulf %335, %296 : vector<8x32xf32>
    %347 = arith.addf %345, %346 : vector<8x32xf32>
    %c32 = arith.constant 32 : index
    %c0_95 = arith.constant 0 : index
    %348 = vector.load %arg16[%c32, %c0_95] : memref<64x32xf32, #tpu.memory_space<vmem>>, vector<8x32xf32>
    tpu.vector_store %arg16[%c32, %c0_95], %347 {strides = array<i32>} : memref<64x32xf32, #tpu.memory_space<vmem>>, vector<8x32xf32>,
    %349 = vector.extract_strided_slice %65 {offsets = [48, 0], sizes = [8, 96], strides = [1, 1]} : vector<64x96xf32> to vector<8x96xf32>
    %cst_96 = arith.constant dense<0.000000e+00> : vector<8x96xf32>
    %350 = tpu.matmul %321, %52, %cst_96 {dimension_numbers = #tpu.dot_dimension_numbers<[1], [0], [0], [1], [0, 0, 1, 1], [], []>} : vector<8x32xf32>, vector<32x96xf32>, vector<8x96xf32> -> vector<8x96xf32>
    %351 = vector.extract_strided_slice %349 {offsets = [0, 0], sizes = [8, 64], strides = [1, 1]} : vector<8x96xf32> to vector<8x64xf32>
    %352 = vector.extract_strided_slice %350 {offsets = [0, 0], sizes = [8, 64], strides = [1, 1]} : vector<8x96xf32> to vector<8x64xf32>
    %353 = arith.addf %351, %352 : vector<8x64xf32>
    %354 = arith.negf %353 : vector<8x64xf32>
    %355 = math.exp %354 : vector<8x64xf32>
    %cst_97 = arith.constant 1.000000e+00 : f32
    %356 = vector.broadcast %cst_97 : f32 to vector<8x64xf32>
    %357 = arith.addf %356, %355 : vector<8x64xf32>
    %358 = arith.divf %356, %357 : vector<8x64xf32>
    %359 = vector.extract_strided_slice %358 {offsets = [0, 0], sizes = [8, 32], strides = [1, 1]} : vector<8x64xf32> to vector<8x32xf32>
    %360 = vector.extract_strided_slice %358 {offsets = [0, 32], sizes = [8, 32], strides = [1, 1]} : vector<8x64xf32> to vector<8x32xf32>
    %361 = vector.extract_strided_slice %349 {offsets = [0, 64], sizes = [8, 32], strides = [1, 1]} : vector<8x96xf32> to vector<8x32xf32>
    %362 = vector.extract_strided_slice %350 {offsets = [0, 64], sizes = [8, 32], strides = [1, 1]} : vector<8x96xf32> to vector<8x32xf32>
    %363 = vector.broadcast %60 : vector<1x32xf32> to vector<8x32xf32>
    %364 = arith.addf %362, %363 : vector<8x32xf32>
    %365 = arith.mulf %359, %364 : vector<8x32xf32>
    %366 = arith.addf %361, %365 : vector<8x32xf32>
    %367 = math.tanh %366 : vector<8x32xf32>
    %cst_98 = arith.constant 1.000000e+00 : f32
    %368 = vector.broadcast %cst_98 : f32 to vector<8x32xf32>
    %369 = arith.subf %368, %360 : vector<8x32xf32>
    %370 = arith.mulf %369, %367 : vector<8x32xf32>
    %371 = arith.mulf %360, %321 : vector<8x32xf32>
    %372 = arith.addf %370, %371 : vector<8x32xf32>
    %cst_99 = arith.constant dense<0.000000e+00> : vector<8x96xf32>
    %373 = tpu.matmul %321, %50, %cst_99 {dimension_numbers = #tpu.dot_dimension_numbers<[1], [0], [0], [1], [0, 0, 1, 1], [], []>} : vector<8x32xf32>, vector<32x96xf32>, vector<8x96xf32> -> vector<8x96xf32>
    %374 = vector.broadcast %58 : vector<1x96xf32> to vector<8x96xf32>
    %375 = arith.addf %373, %374 : vector<8x96xf32>
    %cst_100 = arith.constant dense<0.000000e+00> : vector<8x96xf32>
    %376 = tpu.matmul %347, %54, %cst_100 {dimension_numbers = #tpu.dot_dimension_numbers<[1], [0], [0], [1], [0, 0, 1, 1], [], []>} : vector<8x32xf32>, vector<32x96xf32>, vector<8x96xf32> -> vector<8x96xf32>
    %377 = vector.extract_strided_slice %375 {offsets = [0, 0], sizes = [8, 64], strides = [1, 1]} : vector<8x96xf32> to vector<8x64xf32>
    %378 = vector.extract_strided_slice %376 {offsets = [0, 0], sizes = [8, 64], strides = [1, 1]} : vector<8x96xf32> to vector<8x64xf32>
    %379 = arith.addf %377, %378 : vector<8x64xf32>
    %380 = arith.negf %379 : vector<8x64xf32>
    %381 = math.exp %380 : vector<8x64xf32>
    %cst_101 = arith.constant 1.000000e+00 : f32
    %382 = vector.broadcast %cst_101 : f32 to vector<8x64xf32>
    %383 = arith.addf %382, %381 : vector<8x64xf32>
    %384 = arith.divf %382, %383 : vector<8x64xf32>
    %385 = vector.extract_strided_slice %384 {offsets = [0, 0], sizes = [8, 32], strides = [1, 1]} : vector<8x64xf32> to vector<8x32xf32>
    %386 = vector.extract_strided_slice %384 {offsets = [0, 32], sizes = [8, 32], strides = [1, 1]} : vector<8x64xf32> to vector<8x32xf32>
    %387 = vector.extract_strided_slice %375 {offsets = [0, 64], sizes = [8, 32], strides = [1, 1]} : vector<8x96xf32> to vector<8x32xf32>
    %388 = vector.extract_strided_slice %376 {offsets = [0, 64], sizes = [8, 32], strides = [1, 1]} : vector<8x96xf32> to vector<8x32xf32>
    %389 = vector.broadcast %62 : vector<1x32xf32> to vector<8x32xf32>
    %390 = arith.addf %388, %389 : vector<8x32xf32>
    %391 = arith.mulf %385, %390 : vector<8x32xf32>
    %392 = arith.addf %387, %391 : vector<8x32xf32>
    %393 = math.tanh %392 : vector<8x32xf32>
    %cst_102 = arith.constant 1.000000e+00 : f32
    %394 = vector.broadcast %cst_102 : f32 to vector<8x32xf32>
    %395 = arith.subf %394, %386 : vector<8x32xf32>
    %396 = arith.mulf %395, %393 : vector<8x32xf32>
    %397 = arith.mulf %386, %347 : vector<8x32xf32>
    %398 = arith.addf %396, %397 : vector<8x32xf32>
    %c40 = arith.constant 40 : index
    %c0_103 = arith.constant 0 : index
    %399 = vector.load %arg16[%c40, %c0_103] : memref<64x32xf32, #tpu.memory_space<vmem>>, vector<8x32xf32>
    tpu.vector_store %arg16[%c40, %c0_103], %398 {strides = array<i32>} : memref<64x32xf32, #tpu.memory_space<vmem>>, vector<8x32xf32>,
    %400 = vector.extract_strided_slice %65 {offsets = [56, 0], sizes = [8, 96], strides = [1, 1]} : vector<64x96xf32> to vector<8x96xf32>
    %cst_104 = arith.constant dense<0.000000e+00> : vector<8x96xf32>
    %401 = tpu.matmul %372, %52, %cst_104 {dimension_numbers = #tpu.dot_dimension_numbers<[1], [0], [0], [1], [0, 0, 1, 1], [], []>} : vector<8x32xf32>, vector<32x96xf32>, vector<8x96xf32> -> vector<8x96xf32>
    %402 = vector.extract_strided_slice %400 {offsets = [0, 0], sizes = [8, 64], strides = [1, 1]} : vector<8x96xf32> to vector<8x64xf32>
    %403 = vector.extract_strided_slice %401 {offsets = [0, 0], sizes = [8, 64], strides = [1, 1]} : vector<8x96xf32> to vector<8x64xf32>
    %404 = arith.addf %402, %403 : vector<8x64xf32>
    %405 = arith.negf %404 : vector<8x64xf32>
    %406 = math.exp %405 : vector<8x64xf32>
    %cst_105 = arith.constant 1.000000e+00 : f32
    %407 = vector.broadcast %cst_105 : f32 to vector<8x64xf32>
    %408 = arith.addf %407, %406 : vector<8x64xf32>
    %409 = arith.divf %407, %408 : vector<8x64xf32>
    %410 = vector.extract_strided_slice %409 {offsets = [0, 0], sizes = [8, 32], strides = [1, 1]} : vector<8x64xf32> to vector<8x32xf32>
    %411 = vector.extract_strided_slice %409 {offsets = [0, 32], sizes = [8, 32], strides = [1, 1]} : vector<8x64xf32> to vector<8x32xf32>
    %412 = vector.extract_strided_slice %400 {offsets = [0, 64], sizes = [8, 32], strides = [1, 1]} : vector<8x96xf32> to vector<8x32xf32>
    %413 = vector.extract_strided_slice %401 {offsets = [0, 64], sizes = [8, 32], strides = [1, 1]} : vector<8x96xf32> to vector<8x32xf32>
    %414 = vector.broadcast %60 : vector<1x32xf32> to vector<8x32xf32>
    %415 = arith.addf %413, %414 : vector<8x32xf32>
    %416 = arith.mulf %410, %415 : vector<8x32xf32>
    %417 = arith.addf %412, %416 : vector<8x32xf32>
    %418 = math.tanh %417 : vector<8x32xf32>
    %cst_106 = arith.constant 1.000000e+00 : f32
    %419 = vector.broadcast %cst_106 : f32 to vector<8x32xf32>
    %420 = arith.subf %419, %411 : vector<8x32xf32>
    %421 = arith.mulf %420, %418 : vector<8x32xf32>
    %422 = arith.mulf %411, %372 : vector<8x32xf32>
    %423 = arith.addf %421, %422 : vector<8x32xf32>
    %cst_107 = arith.constant dense<0.000000e+00> : vector<8x96xf32>
    %424 = tpu.matmul %372, %50, %cst_107 {dimension_numbers = #tpu.dot_dimension_numbers<[1], [0], [0], [1], [0, 0, 1, 1], [], []>} : vector<8x32xf32>, vector<32x96xf32>, vector<8x96xf32> -> vector<8x96xf32>
    %425 = vector.broadcast %58 : vector<1x96xf32> to vector<8x96xf32>
    %426 = arith.addf %424, %425 : vector<8x96xf32>
    %cst_108 = arith.constant dense<0.000000e+00> : vector<8x96xf32>
    %427 = tpu.matmul %398, %54, %cst_108 {dimension_numbers = #tpu.dot_dimension_numbers<[1], [0], [0], [1], [0, 0, 1, 1], [], []>} : vector<8x32xf32>, vector<32x96xf32>, vector<8x96xf32> -> vector<8x96xf32>
    %428 = vector.extract_strided_slice %426 {offsets = [0, 0], sizes = [8, 64], strides = [1, 1]} : vector<8x96xf32> to vector<8x64xf32>
    %429 = vector.extract_strided_slice %427 {offsets = [0, 0], sizes = [8, 64], strides = [1, 1]} : vector<8x96xf32> to vector<8x64xf32>
    %430 = arith.addf %428, %429 : vector<8x64xf32>
    %431 = arith.negf %430 : vector<8x64xf32>
    %432 = math.exp %431 : vector<8x64xf32>
    %cst_109 = arith.constant 1.000000e+00 : f32
    %433 = vector.broadcast %cst_109 : f32 to vector<8x64xf32>
    %434 = arith.addf %433, %432 : vector<8x64xf32>
    %435 = arith.divf %433, %434 : vector<8x64xf32>
    %436 = vector.extract_strided_slice %435 {offsets = [0, 0], sizes = [8, 32], strides = [1, 1]} : vector<8x64xf32> to vector<8x32xf32>
    %437 = vector.extract_strided_slice %435 {offsets = [0, 32], sizes = [8, 32], strides = [1, 1]} : vector<8x64xf32> to vector<8x32xf32>
    %438 = vector.extract_strided_slice %426 {offsets = [0, 64], sizes = [8, 32], strides = [1, 1]} : vector<8x96xf32> to vector<8x32xf32>
    %439 = vector.extract_strided_slice %427 {offsets = [0, 64], sizes = [8, 32], strides = [1, 1]} : vector<8x96xf32> to vector<8x32xf32>
    %440 = vector.broadcast %62 : vector<1x32xf32> to vector<8x32xf32>
    %441 = arith.addf %439, %440 : vector<8x32xf32>
    %442 = arith.mulf %436, %441 : vector<8x32xf32>
    %443 = arith.addf %438, %442 : vector<8x32xf32>
    %444 = math.tanh %443 : vector<8x32xf32>
    %cst_110 = arith.constant 1.000000e+00 : f32
    %445 = vector.broadcast %cst_110 : f32 to vector<8x32xf32>
    %446 = arith.subf %445, %437 : vector<8x32xf32>
    %447 = arith.mulf %446, %444 : vector<8x32xf32>
    %448 = arith.mulf %437, %398 : vector<8x32xf32>
    %449 = arith.addf %447, %448 : vector<8x32xf32>
    %c48 = arith.constant 48 : index
    %c0_111 = arith.constant 0 : index
    %450 = vector.load %arg16[%c48, %c0_111] : memref<64x32xf32, #tpu.memory_space<vmem>>, vector<8x32xf32>
    tpu.vector_store %arg16[%c48, %c0_111], %449 {strides = array<i32>} : memref<64x32xf32, #tpu.memory_space<vmem>>, vector<8x32xf32>,
    %cst_112 = arith.constant dense<0.000000e+00> : vector<8x96xf32>
    %451 = tpu.matmul %423, %50, %cst_112 {dimension_numbers = #tpu.dot_dimension_numbers<[1], [0], [0], [1], [0, 0, 1, 1], [], []>} : vector<8x32xf32>, vector<32x96xf32>, vector<8x96xf32> -> vector<8x96xf32>
    %452 = vector.broadcast %58 : vector<1x96xf32> to vector<8x96xf32>
    %453 = arith.addf %451, %452 : vector<8x96xf32>
    %cst_113 = arith.constant dense<0.000000e+00> : vector<8x96xf32>
    %454 = tpu.matmul %449, %54, %cst_113 {dimension_numbers = #tpu.dot_dimension_numbers<[1], [0], [0], [1], [0, 0, 1, 1], [], []>} : vector<8x32xf32>, vector<32x96xf32>, vector<8x96xf32> -> vector<8x96xf32>
    %455 = vector.extract_strided_slice %453 {offsets = [0, 0], sizes = [8, 64], strides = [1, 1]} : vector<8x96xf32> to vector<8x64xf32>
    %456 = vector.extract_strided_slice %454 {offsets = [0, 0], sizes = [8, 64], strides = [1, 1]} : vector<8x96xf32> to vector<8x64xf32>
    %457 = arith.addf %455, %456 : vector<8x64xf32>
    %458 = arith.negf %457 : vector<8x64xf32>
    %459 = math.exp %458 : vector<8x64xf32>
    %cst_114 = arith.constant 1.000000e+00 : f32
    %460 = vector.broadcast %cst_114 : f32 to vector<8x64xf32>
    %461 = arith.addf %460, %459 : vector<8x64xf32>
    %462 = arith.divf %460, %461 : vector<8x64xf32>
    %463 = vector.extract_strided_slice %462 {offsets = [0, 0], sizes = [8, 32], strides = [1, 1]} : vector<8x64xf32> to vector<8x32xf32>
    %464 = vector.extract_strided_slice %462 {offsets = [0, 32], sizes = [8, 32], strides = [1, 1]} : vector<8x64xf32> to vector<8x32xf32>
    %465 = vector.extract_strided_slice %453 {offsets = [0, 64], sizes = [8, 32], strides = [1, 1]} : vector<8x96xf32> to vector<8x32xf32>
    %466 = vector.extract_strided_slice %454 {offsets = [0, 64], sizes = [8, 32], strides = [1, 1]} : vector<8x96xf32> to vector<8x32xf32>
    %467 = vector.broadcast %62 : vector<1x32xf32> to vector<8x32xf32>
    %468 = arith.addf %466, %467 : vector<8x32xf32>
    %469 = arith.mulf %463, %468 : vector<8x32xf32>
    %470 = arith.addf %465, %469 : vector<8x32xf32>
    %471 = math.tanh %470 : vector<8x32xf32>
    %cst_115 = arith.constant 1.000000e+00 : f32
    %472 = vector.broadcast %cst_115 : f32 to vector<8x32xf32>
    %473 = arith.subf %472, %464 : vector<8x32xf32>
    %474 = arith.mulf %473, %471 : vector<8x32xf32>
    %475 = arith.mulf %464, %449 : vector<8x32xf32>
    %476 = arith.addf %474, %475 : vector<8x32xf32>
    %c56 = arith.constant 56 : index
    %c0_116 = arith.constant 0 : index
    %477 = vector.load %arg16[%c56, %c0_116] : memref<64x32xf32, #tpu.memory_space<vmem>>, vector<8x32xf32>
    tpu.vector_store %arg16[%c56, %c0_116], %476 {strides = array<i32>} : memref<64x32xf32, #tpu.memory_space<vmem>>, vector<8x32xf32>,
    %c0_117 = arith.constant 0 : index
    %c0_118 = arith.constant 0 : index
    %c0_119 = arith.constant 0 : index
    %478 = vector.load %arg15[%c0_117, %c0_118, %c0_119] : memref<2x8x32xf32, #tpu.memory_space<vmem>>, vector<1x8x32xf32>
    %479 = vector.shape_cast %478 : vector<1x8x32xf32> to vector<8x32xf32>
    %480 = vector.shape_cast %423 : vector<8x32xf32> to vector<1x8x32xf32>
    tpu.vector_store %arg15[%c0_117, %c0_118, %c0_119], %480 {strides = array<i32>} : memref<2x8x32xf32, #tpu.memory_space<vmem>>, vector<1x8x32xf32>,
    %c1_120 = arith.constant 1 : index
    %c0_121 = arith.constant 0 : index
    %c0_122 = arith.constant 0 : index
    %481 = vector.load %arg15[%c1_120, %c0_121, %c0_122] : memref<2x8x32xf32, #tpu.memory_space<vmem>>, vector<1x8x32xf32>
    %482 = vector.shape_cast %481 : vector<1x8x32xf32> to vector<8x32xf32>
    %483 = vector.shape_cast %476 : vector<8x32xf32> to vector<1x8x32xf32>
    tpu.vector_store %arg15[%c1_120, %c0_121, %c0_122], %483 {strides = array<i32>} : memref<2x8x32xf32, #tpu.memory_space<vmem>>, vector<1x8x32xf32>,
    %c0_123 = arith.constant 0 : index
    %c0_124 = arith.constant 0 : index
    %484 = vector.load %arg16[%c0_123, %c0_124] : memref<64x32xf32, #tpu.memory_space<vmem>>, vector<64x32xf32>
    %c0_125 = arith.constant 0 : index
    %c0_126 = arith.constant 0 : index
    %485 = vector.load %arg10[%c0_125, %c0_126] : memref<32x32xf32, #tpu.memory_space<vmem>>, vector<32x32xf32>
    %cst_127 = arith.constant dense<0.000000e+00> : vector<64x32xf32>
    %486 = tpu.matmul %484, %485, %cst_127 {dimension_numbers = #tpu.dot_dimension_numbers<[1], [0], [0], [1], [0, 0, 1, 1], [], []>} : vector<64x32xf32>, vector<32x32xf32>, vector<64x32xf32> -> vector<64x32xf32>
    %c0_128 = arith.constant 0 : index
    %c0_129 = arith.constant 0 : index
    %487 = vector.load %arg11[%c0_128, %c0_129] : memref<1x32xf32, #tpu.memory_space<vmem>>, vector<1x32xf32>
    %488 = vector.broadcast %487 : vector<1x32xf32> to vector<64x32xf32>
    %489 = arith.addf %486, %488 : vector<64x32xf32>
    %cst_130 = arith.constant dense<0.000000e+00> : vector<64xf32>
    %490 = vector.multi_reduction <add>, %489, %cst_130 [1] : vector<64x32xf32> to vector<64xf32>
    %491 = vector.shape_cast %490 : vector<64xf32> to vector<64x1xf32>
    %cst_131 = arith.constant 3.200000e+01 : f32
    %492 = vector.broadcast %cst_131 : f32 to vector<64x1xf32>
    %493 = arith.divf %491, %492 : vector<64x1xf32>
    %494 = vector.broadcast %493 : vector<64x1xf32> to vector<64x32xf32>
    %495 = arith.subf %489, %494 : vector<64x32xf32>
    %496 = arith.mulf %495, %495 : vector<64x32xf32>
    %cst_132 = arith.constant dense<0.000000e+00> : vector<64xf32>
    %497 = vector.multi_reduction <add>, %496, %cst_132 [1] : vector<64x32xf32> to vector<64xf32>
    %498 = vector.shape_cast %497 : vector<64xf32> to vector<64x1xf32>
    %cst_133 = arith.constant 3.200000e+01 : f32
    %499 = vector.broadcast %cst_133 : f32 to vector<64x1xf32>
    %500 = arith.divf %498, %499 : vector<64x1xf32>
    %cst_134 = arith.constant 9.99999974E-6 : f32
    %501 = vector.broadcast %cst_134 : f32 to vector<64x1xf32>
    %502 = arith.addf %500, %501 : vector<64x1xf32>
    %503 = math.rsqrt %502 : vector<64x1xf32>
    %504 = vector.broadcast %503 : vector<64x1xf32> to vector<64x32xf32>
    %505 = arith.mulf %495, %504 : vector<64x32xf32>
    %cst_135 = arith.constant 0.000000e+00 : f32
    %506 = vector.broadcast %cst_135 : f32 to vector<64x32xf32>
    %507 = arith.maximumf %505, %506 : vector<64x32xf32>
    %c0_136 = arith.constant 0 : index
    %c0_137 = arith.constant 0 : index
    %508 = vector.load %arg12[%c0_136, %c0_137] : memref<32x128xf32, #tpu.memory_space<vmem>>, vector<32x128xf32>
    %cst_138 = arith.constant dense<0.000000e+00> : vector<64x128xf32>
    %509 = tpu.matmul %507, %508, %cst_138 {dimension_numbers = #tpu.dot_dimension_numbers<[1], [0], [0], [1], [0, 0, 1, 1], [], []>} : vector<64x32xf32>, vector<32x128xf32>, vector<64x128xf32> -> vector<64x128xf32>
    %c0_139 = arith.constant 0 : index
    %c0_140 = arith.constant 0 : index
    %510 = vector.load %arg13[%c0_139, %c0_140] : memref<1x128xf32, #tpu.memory_space<vmem>>, vector<1x128xf32>
    %511 = vector.broadcast %510 : vector<1x128xf32> to vector<64x128xf32>
    %512 = arith.addf %509, %511 : vector<64x128xf32>
    %c0_141 = arith.constant 0 : index
    %c0_142 = arith.constant 0 : index
    %513 = vector.load %arg14[%c0_141, %c0_142] : memref<64x128xf32, #tpu.memory_space<vmem>>, vector<64x128xf32>
    tpu.vector_store %arg14[%c0_141, %c0_142], %512 {strides = array<i32>} : memref<64x128xf32, #tpu.memory_space<vmem>>, vector<64x128xf32>,
    return
  }
}

</mosaic_0001>

<bundles_post_ra>
// kernel: squeeze.1
= control target key start
LH: loop header
LB: loop body
LE: loop exit
PB: predicated region body
PF: predicated region fallthrough
CT: control target
= control target key end

     0   :  { %s66_s8 = smov 104   ;;  %s67_s9 = smov 88   ;;  %vm7_vm0 = vcmask 64512   ;;  %s117_s0 = inlined_call_operand.vmem [shape: f32[64], index: 0, kind: input, shape index: {}]   ;;  %s118_s1 = inlined_call_operand.vmem [shape: f32[8,8], index: 1, kind: output, shape index: {}]  }
   0x1   :  { %v4_v0 = vld [vmem:[%s117_s0] sm:$0x1]  ;;  %s65_s0 = smov 120   ;;  %s68_s10 = smov 112  }
   0x2   :  { %5 = vst [vmem:[#allocation0] sm:$0x1] %v4_v0  ;;  %s69_s11 = smov 96   ;;  %s70_s12 = smov 80  }
   0x3   :  { %s71_s13 = smov 72  }
   0x9   :  { %v9_v1 = vld [vmem:[#allocation0] sm:$0x1]  }
   0xa   :  { %v21_v2 = vld [vmem:[#allocation0] sm:$0x1]   ;;  %10 = vrot.lane.b32.xlu0 %v9_v1, %s65_s0 }
   0xb   :  { %22 = vrot.lane.b32.xlu1 %v21_v2, %s66_s8  ;;  %v33_v3 = vld [vmem:[#allocation0] sm:$0x1]  }
   0xc   :  { %34 = vrot.lane.b32.xlu2 %v33_v3, %s67_s9  ;;  %v15_v4 = vld [vmem:[#allocation0] sm:$0x1]  }
   0xd   :  { %v27_v5 = vld [vmem:[#allocation0] sm:$0x1]  }
   0xe   :  { %v39_v6 = vld [vmem:[#allocation0] sm:$0x1]  }
   0xf   :  { %v45_v7 = vld [vmem:[#allocation0] sm:$0x1]  }
  0x10   :  { %v6_v8 = vld [vmem:[#allocation0] sm:$0x1]  }
  0x11   :  { %8 = vst.msk [vmem:[%s118_s1] sm:$0x1] %vm7_vm0, %v6_v8  }
  0x12   :  { %16 = vrot.lane.b32.xlu0 %v15_v4, %s68_s10 }
  0x13   :  { %28 = vrot.lane.b32.xlu1 %v27_v5, %s69_s11 }
  0x14   :  { %40 = vrot.lane.b32.xlu2 %v39_v6, %s70_s12 }
  0x1a   :  { %46 = vrot.lane.b32.xlu0 %v45_v7, %s71_s13 }
  0x66   :  { %v35_v9 = vpop.permute.xlu2 %34  }
  0x67   :  { %55 = vst.msk [vmem:[%s118_s1 + $0x5] sm:$0x1] %vm7_vm0, %v35_v9  }
  0x6e   :  { %v41_v10 = vpop.permute.xlu2 %40  }
  0x6f   :  { %56 = vst.msk [vmem:[%s118_s1 + $0x6] sm:$0x1] %vm7_vm0, %v41_v10  }
  0x7c   :  { %v11_v11 = vpop.permute.xlu0 %10  }
  0x7d   :  { %v23_v12 = vpop.permute.xlu1 %22   ;;  %51 = vst.msk [vmem:[%s118_s1 + $0x1] sm:$0x1] %vm7_vm0, %v11_v11  }
  0x7e   :  { %53 = vst.msk [vmem:[%s118_s1 + $0x3] sm:$0x1] %vm7_vm0, %v23_v12  }
  0x84   :  { %v17_v13 = vpop.permute.xlu0 %16  }
  0x85   :  { %v29_v14 = vpop.permute.xlu1 %28   ;;  %52 = vst.msk [vmem:[%s118_s1 + $0x2] sm:$0x1] %vm7_vm0, %v17_v13  }
  0x86   :  { %54 = vst.msk [vmem:[%s118_s1 + $0x4] sm:$0x1] %vm7_vm0, %v29_v14  }
  0x8c   :  { %v47_v15 = vpop.permute.xlu0 %46  }
  0x8d   :  { %57 = vst.msk [vmem:[%s118_s1 + $0x7] sm:$0x1] %vm7_vm0, %v47_v15  }

// kernel: critic_forward.1
= control target key start
LH: loop header
LB: loop body
LE: loop exit
PB: predicated region body
PF: predicated region fallthrough
CT: control target
= control target key end

     0   :  { %vm87_vm0 = vcmask 1044480   ;;  %vm62_vm1 = vcmask 39936   ;;  %vm132_vm2 = vcmask 261120   ;;  %v2544_v27 = vmov 32.0   ;;  %s2545_s25 = smov 64   ;;  %s2546_s17 = smov 32   ;;  %s3514_s2 = inlined_call_operand.vmem [shape: f32[5,32], index: 2, kind: input, shape index: {}]   ;;  %s3515_s0 = inlined_call_operand.vmem [shape: f32[64,5], index: 0, kind: input, shape index: {}]   ;;  %s3516_s3 = inlined_call_operand.vmem [shape: f32[1,32], index: 3, kind: input, shape index: {}]   ;;  %s3517_s4 = inlined_call_operand.vmem [shape: f32[32,32], index: 4, kind: input, shape index: {}]   ;;  %s3518_s5 = inlined_call_operand.vmem [shape: f32[1,32], index: 5, kind: input, shape index: {}]   ;;  %s3519_s9 = inlined_call_operand.vmem [shape: f32[2,1,32], index: 9, kind: input, shape index: {}]   ;;  %s3520_s7 = inlined_call_operand.vmem [shape: f32[2,32,96], index: 7, kind: input, shape index: {}]   ;;  %s3521_s6 = inlined_call_operand.vmem [shape: f32[2,32,96], index: 6, kind: input, shape index: {}]   ;;  %s3522_s1 = inlined_call_operand.vmem [shape: f32[2,8,32], index: 1, kind: input, shape index: {}, may-alias: {1,15}]   ;;  %s3523_s8 = inlined_call_operand.vmem [shape: f32[2,1,96], index: 8, kind: input, shape index: {}]   ;;  %s3524_s10 = inlined_call_operand.vmem [shape: f32[32,32], index: 10, kind: input, shape index: {}]   ;;  %s3525_s11 = inlined_call_operand.vmem [shape: f32[1,32], index: 11, kind: input, shape index: {}]   ;;  %s3526_s15 = inlined_call_operand.vmem [shape: f32[2,8,32], index: 15, kind: output, shape index: {1}, may-alias: {1,15}]   ;;  %s3527_s12 = inlined_call_operand.vmem [shape: f32[32,128], index: 12, kind: input, shape index: {}]   ;;  %s3528_s13 = inlined_call_operand.vmem [shape: f32[1,128], index: 13, kind: input, shape index: {}]   ;;  %s3529_s14 = inlined_call_operand.vmem [shape: f32[64,128], index: 14, kind: output, shape index: {0}]  }
   0x1   :  { %v57_v0 = vld [vmem:[%s3514_s2] sm:$0x1f]  ;;  %v54_v2 = vld [vmem:[%s3515_s0 + $0x28] sm:$0xff]  ;;  %v55_v4 = vld [vmem:[%s3515_s0 + $0x30] sm:$0xff]  ;;  %2383 = vrcp.f32 %v2544_v27  ;;  %s2547_s18 = smov 96  }
   0x2   :  { %v49_v1 = vld [vmem:[%s3515_s0] sm:$0xff]  ;;  %2273 = vmatpush.msk.msra.mxu0 %vm87_vm0, %v57_v0  ;;  %2366 = vmatpush.msk.msra.mxu3 %vm87_vm0, %v57_v0  ;;  %v50_v3 = vld [vmem:[%s3515_s0 + $0x8] sm:$0xff]  ;;  %v51_v5 = vld [vmem:[%s3515_s0 + $0x10] sm:$0xff] }
   0x3   :  { %2274 = vmatmul.msk.f32.vlgmr.msra.gmra.mxu0 %vm62_vm1, %v49_v1  ;;  %2279 = vmatmul.msk.f32.vlgmr.msra.gmra.mxu3 %vm62_vm1, %v54_v2  ;;  %v56_v6 = vld [vmem:[%s3515_s0 + $0x38] sm:$0xff]  ;;  %v53_v8 = vld [vmem:[%s3515_s0 + $0x20] sm:$0xff]  ;;  %v326_v57 = vld [vmem:[%s3517_s4 + $0x10] sm:$0xff] }
   0x4   :  { %v52_v7 = vld [vmem:[%s3515_s0 + $0x18] sm:$0xff]  ;;  %v2666_v9 = vld [vmem:[%s3516_s3] ss:$0 sm:$0xff]  ;;  %v325_v58 = vld [vmem:[%s3517_s4 + $0x8] sm:$0xff] }
   0x5   :  { %v327_v56 = vld [vmem:[%s3517_s4 + $0x18] sm:$0xff]  ;;  %v324_v59 = vld [vmem:[%s3517_s4] sm:$0xff] }
   0x6   :  { %368 = vmatpush.msra.mxu1 %v327_v56  ;;  %2367 = vmatpush.msra.mxu2 %v327_v56 }
   0x7   :  { %v2384_v29 = vpop.eup %2383 }
   0x8   :  { %v158_v30 = vmul.f32 32.0, %v2384_v29  ;;  %vm162_vm3 = vweird.f32 %v2384_v29  ;;  %369 = vmatpush.msra.mxu1 %v326_v57  ;;  %2368 = vmatpush.msra.mxu2 %v326_v57 }
   0xa   :  { %v159_v31 = vsub.f32 1.0, %v158_v30  ;;  %370 = vmatpush.msra.mxu1 %v325_v58  ;;  %2369 = vmatpush.msra.mxu2 %v325_v58 }
   0xb   :  { %2275 = vmatmul.msk.f32.gmra.mxu0 %vm62_vm1, %v50_v3  ;;  %2280 = vmatmul.msk.f32.gmra.mxu3 %vm62_vm1, %v55_v4 }
   0xc   :  { %v160_v32 = vmul.f32 %v2384_v29, %v159_v31  ;;  %371 = vmatpush.msra.mxu1 %v324_v59  ;;  %2370 = vmatpush.msra.mxu2 %v324_v59 }
   0xe   :  { %v161_v33 = vadd.f32 %v2384_v29, %v160_v32 }
  0x10   :  { %v2687_v34 = vsel %vm162_vm3, %v2384_v29, %v161_v33 }
  0x13   :  { %2276 = vmatmul.msk.f32.gmra.mxu0 %vm62_vm1, %v51_v5  ;;  %2281 = vmatmul.msk.f32.gmra.mxu3 %vm62_vm1, %v56_v6 }
  0x1b   :  { %2277 = vmatmul.msk.f32.gmra.mxu0 %vm62_vm1, %v52_v7 }
  0x23   :  { %2278 = vmatmul.msk.f32.gmra.mxu0 %vm62_vm1, %v53_v8 }
  0x80   :  { %v108_v10 = vpop.f32.mrf.mxu0 }
  0x81   :  { %v109_v11 = vadd.f32 %v2666_v9, %v108_v10 }
  0x83   :  { %v133_v12 = vsel %vm132_vm2, %v109_v11, 0.0 }
  0x84   :  { %134 = vadd.xlane.f32.xlu0 %v133_v12 }
  0x86   :  { %v123_v18 = vpop.f32.mrf.mxu3 }
  0x87   :  { %v124_v20 = vadd.f32 %v2666_v9, %v123_v18 }
  0x88   :  { %v2670_v13 = vpop.f32.mrf.mxu0 }
  0x89   :  { %v148_v21 = vsel %vm132_vm2, %v124_v20, 0.0 }
  0x8e   :  { %v126_v22 = vpop.f32.mrf.mxu3 }
  0x8f   :  { %v2681_v23 = vadd.f32 %v2666_v9, %v126_v22 }
  0x90   :  { %v2672_v14 = vpop.f32.mrf.mxu0 }
  0x91   :  { %v151_v24 = vsel %vm132_vm2, %v2681_v23, 0.0 }
  0x92   :  { %152 = vadd.xlane.f32.xlu2 %v151_v24 }
  0x96   :  { %v129_v25 = vpop.f32.mrf.mxu3 }
  0x97   :  { %v130_v26 = vadd.f32 %v2666_v9, %v129_v25 }
  0x98   :  { %v2674_v15 = vpop.f32.mrf.mxu0 }
  0x99   :  { %v154_v28 = vsel %vm132_vm2, %v130_v26, 0.0 }
  0x9a   :  { %155 = vadd.xlane.f32.xlu2 %v154_v28 }
  0xa0   :  { %v120_v16 = vpop.f32.mrf.mxu0 }
  0xa1   :  { %v121_v17 = vadd.f32 %v2666_v9, %v120_v16 }
  0xa3   :  { %v145_v19 = vsel %vm132_vm2, %v121_v17, 0.0 }
  0xa4   :  { %146 = vadd.xlane.f32.xlu1 %v145_v19 }
  0xac   :  { %149 = vadd.xlane.f32.xlu1 %v148_v21 }
  0xf7   :  { %v135_v35 = vpop.xlane.xlu0 %134 }
  0xf8   :  { %v164_v36 = vmul.f32 %v2687_v34, %v135_v35 }
  0xfa   :  { %v172_v37 = vsub.f32 %v109_v11, %v164_v36 }
  0xfc   :  { %v180_v38 = vmul.f32 %v172_v37, %v172_v37 }
  0xfe   :  { %v188_v39 = vsel %vm132_vm2, %v180_v38, 0.0  ;;  %v2734_v38 = vld [vmem:[%s3518_s5] ss:$0 sm:$0xff] }
  0xff   :  { %189 = vadd.xlane.f32.xlu0 %v188_v39 }
 0x105   :  { %v2703_v50 = vpop.xlane.xlu2 %152 }
 0x106   :  { %v170_v39 = vmul.f32 %v2687_v34, %v2703_v50 }
 0x10d   :  { %v156_v51 = vpop.xlane.xlu2 %155 }
 0x10e   :  { %v171_v52 = vmul.f32 %v2687_v34, %v156_v51 }
 0x110   :  { %v2706_v53 = vsub.f32 %v130_v26, %v171_v52 }
 0x112   :  { %v187_v54 = vmul.f32 %v2706_v53, %v2706_v53 }
 0x114   :  { %v209_v55 = vsel %vm132_vm2, %v187_v54, 0.0  ;;  %v2756_v54 = vld [vmem:[%s3520_s7 + $0x18] sm:$0xff] }
 0x115   :  { %691 = vmatpush.msrb.mxu3 %v2756_v54 }
 0x117   :  { %v147_v40 = vpop.xlane.xlu1 %146 }
 0x118   :  { %v168_v41 = vmul.f32 %v2687_v34, %v147_v40 }
 0x11a   :  { %v2692_v42 = vsub.f32 %v121_v17, %v168_v41 }
 0x11c   :  { %v184_v43 = vmul.f32 %v2692_v42, %v2692_v42 }
 0x11e   :  { %v200_v44 = vsel %vm132_vm2, %v184_v43, 0.0 }
 0x11f   :  { %201 = vadd.xlane.f32.xlu1 %v200_v44  ;;  %v150_v45 = vpop.xlane.xlu1 %149 }
 0x120   :  { %v169_v46 = vmul.f32 %v2687_v34, %v150_v45 }
 0x122   :  { %v2698_v47 = vsub.f32 %v124_v20, %v169_v46  ;;  %v112_v46 = vadd.f32 %v2666_v9, %v2670_v13 }
 0x124   :  { %v185_v48 = vmul.f32 %v2698_v47, %v2698_v47 }
 0x126   :  { %v203_v49 = vsel %vm132_vm2, %v185_v48, 0.0 }
 0x127   :  { %204 = vadd.xlane.f32.xlu2 %v203_v49  ;;  %210 = vadd.xlane.f32.xlu1 %v209_v55 }
 0x172   :  { %v190_v60 = vpop.xlane.xlu0 %189 }
 0x173   :  { %v212_v61 = vmul.f32 %v190_v60, %v2687_v34  ;;  %v2766_v60 = vld [vmem:[%s3520_s7 + $0x10] sm:$0xff] }
 0x174   :  { %692 = vmatpush.msrb.mxu3 %v2766_v60 }
 0x175   :  { %v220_v62 = vadd.f32 1e-05, %v212_v61  ;;  %v2771_v61 = vld [vmem:[%s3520_s7 + $0x8] sm:$0xff] }
 0x176   :  { %693 = vmatpush.msrb.mxu3 %v2771_v61 }
 0x177   :  { %2385 = vrsqrt.f32 %v220_v62  ;;  %vm234_vm5 = vweird.f32 %v220_v62 }
 0x17d   :  { %v2386_v63 = vpop.eup %2385 }
 0x17e   :  { %v229_v0 = vmul.f32 %v2386_v63, %v220_v62  ;;  %vm235_vm4 = vweird.f32 %v2386_v63  ;;  %v2777_v62 = vld [vmem:[%s3520_s7] sm:$0xff] }
 0x17f   :  { %vm236_vm6 = vmor %vm234_vm5, %vm235_vm4  ;;  %694 = vmatpush.msrb.mxu3 %v2777_v62 }
 0x180   :  { %v230_v1 = vmul.f32 %v2386_v63, %v229_v0 }
 0x181   :  { %764 = vmatpush.msra.mxu3 %v2756_v54 }
 0x182   :  { %v231_v2 = vmul.f32 0.5, %v230_v1  ;;  %v2786_v1 = vld [vmem:[%s3522_s1] sm:$0xff] }
 0x183   :  { %2309 = vmatmul.msk.f32.vlgmr.msrb.gmra.mxu3 %vm132_vm2, %v2786_v1 }
 0x184   :  { %v232_v3 = vsub.f32 1.5, %v231_v2  ;;  %765 = vmatpush.msra.mxu3 %v2766_v60 }
 0x186   :  { %v233_v4 = vmul.f32 %v2386_v63, %v232_v3  ;;  %766 = vmatpush.msra.mxu3 %v2771_v61 }
 0x188   :  { %v237_v5 = vsel %vm236_vm6, %v2386_v63, %v233_v4  ;;  %v584_v63 = vld [vmem:[%s3521_s6 + $0x18] sm:$0xff]  ;;  %767 = vmatpush.msra.mxu3 %v2777_v62 }
 0x189   :  { %v308_v6 = vmul.f32 %v237_v5, %v172_v37  ;;  %644 = vmatpush.msrb.mxu2 %v584_v63 }
 0x18b   :  { %v316_v7 = vmax.f32 %v308_v6, 0.0 }
 0x18d   :  { %2282 = vmatmul.msk.f32.vlgmr.msra.gmra.mxu1 %vm132_vm2, %v316_v7 }
 0x192   :  { %v202_v8 = vpop.xlane.xlu1 %201 }
 0x193   :  { %v216_v10 = vmul.f32 %v202_v8, %v2687_v34 }
 0x195   :  { %v224_v11 = vadd.f32 1e-05, %v216_v10 }
 0x197   :  { %2387 = vrsqrt.f32 %v224_v11  ;;  %vm274_vm7 = vweird.f32 %v224_v11 }
 0x19a   :  { %v205_v12 = vpop.xlane.xlu2 %204  ;;  %v211_v48 = vpop.xlane.xlu1 %210 }
 0x19b   :  { %v217_v16 = vmul.f32 %v205_v12, %v2687_v34  ;;  %v219_v49 = vmul.f32 %v211_v48, %v2687_v34 }
 0x19d   :  { %v225_v17 = vadd.f32 1e-05, %v217_v16  ;;  %v2388_v18 = vpop.eup %2387  ;;  %v227_v50 = vadd.f32 1e-05, %v219_v49 }
 0x19e   :  { %v269_v20 = vmul.f32 %v2388_v18, %v224_v11  ;;  %vm275_vm8 = vweird.f32 %v2388_v18 }
 0x19f   :  { %2389 = vrsqrt.f32 %v225_v17  ;;  %vm284_vm9 = vweird.f32 %v225_v17  ;;  %vm276_vm11 = vmor %vm274_vm7, %vm275_vm8  ;;  %vm304_vm14 = vweird.f32 %v227_v50 }
 0x1a0   :  { %v270_v22 = vmul.f32 %v2388_v18, %v269_v20  ;;  %2391 = vrsqrt.f32 %v227_v50  ;;  %v2377_v20 = vld [vmem:[%s3519_s9] ss:$0 sm:$0xff] }
 0x1a2   :  { %v271_v25 = vmul.f32 0.5, %v270_v22 }
 0x1a4   :  { %v272_v27 = vsub.f32 1.5, %v271_v25 }
 0x1a5   :  { %v2390_v19 = vpop.eup %2389 }
 0x1a6   :  { %v279_v21 = vmul.f32 %v2390_v19, %v225_v17  ;;  %vm285_vm10 = vweird.f32 %v2390_v19  ;;  %v273_v29 = vmul.f32 %v2388_v18, %v272_v27  ;;  %v2392_v58 = vpop.eup %2391 }
 0x1a7   :  { %vm286_vm12 = vmor %vm284_vm9, %vm285_vm10  ;;  %v299_v0 = vmul.f32 %v2392_v58, %v227_v50  ;;  %vm305_vm15 = vweird.f32 %v2392_v58 }
 0x1a8   :  { %v280_v24 = vmul.f32 %v2390_v19, %v279_v21  ;;  %v277_v31 = vsel %vm276_vm11, %v2388_v18, %v273_v29  ;;  %vm306_vm3 = vmor %vm304_vm14, %vm305_vm15  ;;  %v583_v29 = vld [vmem:[%s3521_s6 + $0x10] sm:$0xff] }
 0x1a9   :  { %v312_v32 = vmul.f32 %v277_v31, %v2692_v42  ;;  %v2740_v42 = vsub.f32 %v2681_v23, %v170_v39  ;;  %v300_v4 = vmul.f32 %v2392_v58, %v299_v0  ;;  %645 = vmatpush.msrb.mxu2 %v583_v29  ;;  %v581_v31 = vld [vmem:[%s3521_s6] sm:$0xff] }
 0x1aa   :  { %v281_v26 = vmul.f32 0.5, %v280_v24 }
 0x1ab   :  { %v320_v35 = vmax.f32 %v312_v32, 0.0  ;;  %v186_v44 = vmul.f32 %v2740_v42, %v2740_v42  ;;  %v301_v10 = vmul.f32 0.5, %v300_v4  ;;  %v2843_v4 = vld [vmem:[%s3523_s8] ss:$0 sm:$0xff] }
 0x1ac   :  { %v282_v28 = vsub.f32 1.5, %v281_v26 }
 0x1ad   :  { %2286 = vmatmul.msk.f32.vlgmr.msra.gmra.mxu2 %vm132_vm2, %v320_v35  ;;  %v206_v45 = vsel %vm132_vm2, %v186_v44, 0.0  ;;  %v302_v17 = vsub.f32 1.5, %v301_v10 }
 0x1ae   :  { %v283_v30 = vmul.f32 %v2390_v19, %v282_v28 }
 0x1af   :  { %v303_v22 = vmul.f32 %v2392_v58, %v302_v17 }
 0x1b0   :  { %v287_v33 = vsel %vm286_vm12, %v2390_v19, %v283_v30  ;;  %v582_v30 = vld [vmem:[%s3521_s6 + $0x8] sm:$0xff] }
 0x1b1   :  { %v313_v36 = vmul.f32 %v287_v33, %v2698_v47  ;;  %v136_v47 = vsel %vm132_vm2, %v112_v46, 0.0  ;;  %v307_v26 = vsel %vm306_vm3, %v2392_v58, %v303_v22  ;;  %646 = vmatpush.msrb.mxu2 %v582_v30 }
 0x1b2   :  { %v315_v27 = vmul.f32 %v307_v26, %v2706_v53 }
 0x1b3   :  { %v321_v37 = vmax.f32 %v313_v36, 0.0  ;;  %647 = vmatpush.msrb.mxu2 %v581_v31 }
 0x1b4   :  { %v323_v28 = vmax.f32 %v315_v27, 0.0 }
 0x1b5   :  { %2287 = vmatmul.msk.f32.gmra.mxu2 %vm132_vm2, %v321_v37 }
 0x1b6   :  { %1232 = vmatpush.msra.mxu2 %v2756_v54 }
 0x1b8   :  { %1233 = vmatpush.msra.mxu2 %v2766_v60 }
 0x1ba   :  { %1234 = vmatpush.msra.mxu2 %v2771_v61 }
 0x1bc   :  { %1235 = vmatpush.msra.mxu2 %v2777_v62 }
 0x206   :  { %v696_v49 = vpop.f32.mrf.mxu3 }
 0x20a   :  { %v373_v40 = vpop.f32.mrf.mxu1 }
 0x20b   :  { %v374_v41 = vadd.f32 %v2734_v38, %v373_v40 }
 0x20d   :  { %v397_v43 = vsel %vm132_vm2, %v374_v41, 0.0 }
 0x20e   :  { %398 = vadd.xlane.f32.xlu0 %v397_v43 }
 0x216   :  { %207 = vadd.xlane.f32.xlu0 %v206_v45 }
 0x21e   :  { %137 = vadd.xlane.f32.xlu0 %v136_v47 }
 0x230   :  { %v2832_v63 = vpop.f32.mrf.mxu2 }
 0x238   :  { %v2834_v0 = vpop.f32.mrf.mxu2 }
 0x281   :  { %v399_v23 = vpop.xlane.xlu0 %398 }
 0x282   :  { %v421_v51 = vmul.f32 %v399_v23, %v2687_v34 }
 0x284   :  { %v2751_v52 = vsub.f32 %v374_v41, %v421_v51 }
 0x286   :  { %v437_v13 = vmul.f32 %v2751_v52, %v2751_v52 }
 0x288   :  { %v445_v55 = vsel %vm132_vm2, %v437_v13, 0.0 }
 0x289   :  { %446 = vadd.xlane.f32.xlu2 %v445_v55  ;;  %v208_v56 = vpop.xlane.xlu0 %207 }
 0x28a   :  { %v218_v57 = vmul.f32 %v208_v56, %v2687_v34 }
 0x28c   :  { %v226_v59 = vadd.f32 1e-05, %v218_v57 }
 0x28e   :  { %2393 = vrsqrt.f32 %v226_v59  ;;  %vm294_vm0 = vweird.f32 %v226_v59 }
 0x291   :  { %v138_v2 = vpop.xlane.xlu0 %137 }
 0x292   :  { %v165_v3 = vmul.f32 %v2687_v34, %v138_v2 }
 0x294   :  { %v2394_v5 = vpop.eup %2393  ;;  %v2793_v6 = vsub.f32 %v112_v46, %v165_v3 }
 0x295   :  { %v289_v7 = vmul.f32 %v2394_v5, %v226_v59  ;;  %vm295_vm13 = vweird.f32 %v2394_v5 }
 0x296   :  { %v181_v8 = vmul.f32 %v2793_v6, %v2793_v6  ;;  %vm296_vm1 = vmor %vm294_vm0, %vm295_vm13 }
 0x297   :  { %v290_v11 = vmul.f32 %v2394_v5, %v289_v7 }
 0x298   :  { %v191_v12 = vsel %vm132_vm2, %v181_v8, 0.0 }
 0x299   :  { %v291_v16 = vmul.f32 0.5, %v290_v11  ;;  %192 = vadd.xlane.f32.xlu1 %v191_v12 }
 0x29b   :  { %v292_v18 = vsub.f32 1.5, %v291_v16 }
 0x29d   :  { %v293_v19 = vmul.f32 %v2394_v5, %v292_v18 }
 0x29f   :  { %v297_v21 = vsel %vm296_vm1, %v2394_v5, %v293_v19 }
 0x2a0   :  { %v314_v24 = vmul.f32 %v297_v21, %v2740_v42 }
 0x2a1   :  { %721 = vrot.lane.b32.xlu2 %v2377_v20, %s2545_s25 }
 0x2a2   :  { %v322_v25 = vmax.f32 %v314_v24, 0.0 }
 0x2a4   :  { %2288 = vmatmul.msk.f32.gmra.mxu2 %vm132_vm2, %v322_v25 }
 0x2ac   :  { %2289 = vmatmul.msk.f32.gmra.mxu2 %vm132_vm2, %v323_v28 }
 0x2fc   :  { %v447_v53 = vpop.xlane.xlu2 %446 }
 0x2fd   :  { %v469_v32 = vmul.f32 %v447_v53, %v2687_v34 }
 0x2ff   :  { %v477_v33 = vadd.f32 1e-05, %v469_v32 }
 0x301   :  { %2395 = vrsqrt.f32 %v477_v33  ;;  %vm491_vm5 = vweird.f32 %v477_v33 }
 0x304   :  { %v2825_v47 = vpop.permute.xlu2 %721 }
 0x305   :  { %v724_v23 = vadd.f32 %v2825_v47, %v696_v49 }
 0x307   :  { %v2396_v35 = vpop.eup %2395  ;;  %726 = vrot.lane.b32.xlu0 %v724_v23, %s2545_s25 }
 0x308   :  { %v486_v36 = vmul.f32 %v2396_v35, %v477_v33  ;;  %vm492_vm4 = vweird.f32 %v2396_v35 }
 0x309   :  { %vm493_vm6 = vmor %vm491_vm5, %vm492_vm4 }
 0x30a   :  { %v487_v37 = vmul.f32 %v2396_v35, %v486_v36 }
 0x30c   :  { %v488_v39 = vmul.f32 0.5, %v487_v37  ;;  %v193_v40 = vpop.xlane.xlu1 %192 }
 0x30d   :  { %v213_v41 = vmul.f32 %v193_v40, %v2687_v34 }
 0x30e   :  { %v489_v42 = vsub.f32 1.5, %v488_v39 }
 0x30f   :  { %v221_v43 = vadd.f32 1e-05, %v213_v41 }
 0x310   :  { %v490_v44 = vmul.f32 %v2396_v35, %v489_v42 }
 0x311   :  { %2397 = vrsqrt.f32 %v221_v43  ;;  %vm244_vm8 = vweird.f32 %v221_v43 }
 0x312   :  { %v494_v45 = vsel %vm493_vm6, %v2396_v35, %v490_v44 }
 0x313   :  { %v565_v46 = vmul.f32 %v494_v45, %v2751_v52  ;;  %v2860_v45 = vadd.f32 %v2666_v9, %v2672_v14 }
 0x315   :  { %v573_v48 = vmax.f32 %v565_v46, 0.0  ;;  %v139_v23 = vsel %vm132_vm2, %v2860_v45, 0.0 }
 0x317   :  { %v2398_v50 = vpop.eup %2397  ;;  %2300 = vmatmul.msk.f32.vlgmr.msrb.gmra.mxu2 %vm132_vm2, %v573_v48 }
 0x318   :  { %v239_v51 = vmul.f32 %v2398_v50, %v221_v43  ;;  %vm245_vm7 = vweird.f32 %v2398_v50 }
 0x319   :  { %vm246_vm9 = vmor %vm244_vm8, %vm245_vm7 }
 0x31a   :  { %v240_v13 = vmul.f32 %v2398_v50, %v239_v51 }
 0x31c   :  { %v241_v55 = vmul.f32 0.5, %v240_v13 }
 0x31e   :  { %v242_v56 = vsub.f32 1.5, %v241_v55 }
 0x320   :  { %v243_v57 = vmul.f32 %v2398_v50, %v242_v56 }
 0x322   :  { %v247_v52 = vsel %vm246_vm9, %v2398_v50, %v243_v57 }
 0x323   :  { %v309_v58 = vmul.f32 %v247_v52, %v2793_v6 }
 0x325   :  { %v317_v59 = vmax.f32 %v309_v58, 0.0 }
 0x327   :  { %2283 = vmatmul.msk.f32.gmra.mxu1 %vm132_vm2, %v317_v59  ;;  %v2836_v2 = vpop.f32.mrf.mxu2  ;;  %v2869_v59 = vld [vmem:[%s3521_s6 + $0x38] sm:$0xff] }
 0x328   :  { %827 = vmatpush.msrb.mxu3 %v2869_v59  ;;  %1444 = vmatpush.msrb.mxu2 %v2869_v59 }
 0x32f   :  { %v2838_v3 = vpop.f32.mrf.mxu2 }
 0x379   :  { %v727_v27 = vpop.permute.xlu0 %726 }
 0x39a   :  { %v649_v5 = vpop.f32.mrf.mxu2 }
 0x39b   :  { %v650_v7 = vadd.f32 %v2843_v4, %v649_v5  ;;  %v2874_v5 = vld [vmem:[%s3521_s6 + $0x30] sm:$0xff] }
 0x39c   :  { %828 = vmatpush.msrb.mxu3 %v2874_v5  ;;  %1445 = vmatpush.msrb.mxu2 %v2874_v5 }
 0x39d   :  { %v699_v6 = vadd.f32 %v696_v49, %v650_v7 }
 0x39f   :  { %v2310_v8 = vmul.f32 -1.442695, %v699_v6  ;;  %v2888_v6 = vld [vmem:[%s3521_s6 + $0x20] sm:$0xff] }
 0x3a1   :  { %2399 = vpow2.f32 %v2310_v8  ;;  %v2897_v8 = vld [vmem:[%s3520_s7 + $0x38] sm:$0xff] }
 0x3a2   :  { %1162 = vmatpush.msrb.mxu1 %v2897_v8  ;;  %1314 = vmatpush.msrb.mxu0 %v2897_v8 }
 0x3a4   :  { %v376_v10 = vpop.f32.mrf.mxu1 }
 0x3a5   :  { %v377_v11 = vadd.f32 %v2734_v38, %v376_v10  ;;  %v2904_v10 = vld [vmem:[%s3520_s7 + $0x30] sm:$0xff] }
 0x3a6   :  { %1163 = vmatpush.msrb.mxu1 %v2904_v10  ;;  %1315 = vmatpush.msrb.mxu0 %v2904_v10 }
 0x3a7   :  { %v2400_v12 = vpop.eup %2399  ;;  %v400_v16 = vsel %vm132_vm2, %v377_v11, 0.0 }
 0x3a8   :  { %v703_v17 = vadd.f32 1.0, %v2400_v12  ;;  %401 = vadd.xlane.f32.xlu2 %v400_v16  ;;  %v2918_v12 = vld [vmem:[%s3520_s7 + $0x20] sm:$0xff] }
 0x3aa   :  { %2401 = vrcp.f32 %v703_v17  ;;  %v715_v21 = vand.u32 2147483648, %v703_v17  ;;  %v713_v24 = vand.u32 2147483647, %v703_v17  ;;  %vm709_vm11 = vweird.f32 %v703_v17 }
 0x3ac   :  { %v716_v26 = vor.u32 1.1754944e-38, %v715_v21  ;;  %vm714_vm13 = vcmp.eq.f32.partialorder %v713_v24, 8.507059e+37  ;;  %v2379_v24 = vld [vmem:[%s3519_s9 + $0x1] ss:$0 sm:$0xff] }
 0x3b0   :  { %v2402_v18 = vpop.eup %2401 }
 0x3b1   :  { %v705_v19 = vmul.f32 %v2402_v18, %v703_v17  ;;  %vm710_vm10 = vweird.f32 %v2402_v18  ;;  %v2308_v17 = vld [vmem:[%s3522_s1 + $0x8] sm:$0xff] }
 0x3b2   :  { %vm711_vm12 = vmor %vm709_vm11, %vm710_vm10 }
 0x3b3   :  { %v706_v20 = vsub.f32 1.0, %v705_v19 }
 0x3b5   :  { %v707_v22 = vmul.f32 %v2402_v18, %v706_v20 }
 0x3b7   :  { %v708_v25 = vadd.f32 %v2402_v18, %v707_v22 }
 0x3b9   :  { %v712_v28 = vsel %vm711_vm12, %v2402_v18, %v708_v25 }
 0x3ba   :  { %v717_v29 = vsel %vm714_vm13, %v716_v26, %v712_v28 }
 0x3bb   :  { %v729_v30 = vmul.f32 %v727_v27, %v717_v29  ;;  %v736_v41 = vsub.f32 1.0, %v717_v29 }
 0x3bd   :  { %731 = vrot.lane.b32.xlu1 %v729_v30, %s2545_s25 }
 0x3c5   :  { %742 = vrot.lane.b32.xlu1 %v2786_v1, %s2546_s17 }
 0x41b   :  { %v402_v33 = vpop.xlane.xlu2 %401 }
 0x41c   :  { %v422_v35 = vmul.f32 %v402_v33, %v2687_v34 }
 0x41e   :  { %v430_v36 = vsub.f32 %v377_v11, %v422_v35  ;;  %v2911_v11 = vld [vmem:[%s3520_s7 + $0x28] sm:$0xff] }
 0x41f   :  { %1164 = vmatpush.msrb.mxu1 %v2911_v11  ;;  %1316 = vmatpush.msrb.mxu0 %v2911_v11 }
 0x420   :  { %v438_v37 = vmul.f32 %v430_v36, %v430_v36 }
 0x421   :  { %1165 = vmatpush.msrb.mxu1 %v2918_v12  ;;  %1317 = vmatpush.msrb.mxu0 %v2918_v12 }
 0x422   :  { %v448_v39 = vsel %vm132_vm2, %v438_v37, 0.0 }
 0x423   :  { %1384 = vmatpush.msra.mxu1 %v2756_v54  ;;  %1536 = vmatpush.msra.mxu0 %v2756_v54 }
 0x425   :  { %1385 = vmatpush.msra.mxu1 %v2766_v60  ;;  %1537 = vmatpush.msra.mxu0 %v2766_v60 }
 0x427   :  { %1386 = vmatpush.msra.mxu1 %v2771_v61  ;;  %1538 = vmatpush.msra.mxu0 %v2771_v61 }
 0x429   :  { %1387 = vmatpush.msra.mxu1 %v2777_v62  ;;  %1539 = vmatpush.msra.mxu0 %v2777_v62 }
 0x42f   :  { %v732_v31 = vpop.permute.xlu1 %731 }
 0x430   :  { %v734_v53 = vadd.f32 %v732_v31, %v650_v7  ;;  %v2881_v7 = vld [vmem:[%s3521_s6 + $0x28] sm:$0xff] }
 0x431   :  { %829 = vmatpush.msrb.mxu3 %v2881_v7  ;;  %1446 = vmatpush.msrb.mxu2 %v2881_v7 }
 0x432   :  { %2403 = vtanh.f32 %v734_v53 }
 0x433   :  { %830 = vmatpush.msrb.mxu3 %v2888_v6  ;;  %1447 = vmatpush.msrb.mxu2 %v2888_v6 }
 0x437   :  { %v743_v40 = vpop.permute.xlu1 %742 }
 0x438   :  { %v2404_v32 = vpop.eup %2403  ;;  %v745_v43 = vmul.f32 %v743_v40, %v717_v29 }
 0x439   :  { %738 = vrot.lane.b32.xlu0 %v2404_v32, %s2547_s18 }
 0x463   :  { %449 = vadd.xlane.f32.xlu0 %v448_v39 }
 0x4ab   :  { %v739_v42 = vpop.permute.xlu0 %738 }
 0x4ac   :  { %v741_v1 = vmul.f32 %v739_v42, %v736_v41 }
 0x4ae   :  { %v2854_v44 = vadd.f32 %v745_v43, %v741_v1 }
 0x4b0   :  { %748 = vrot.lane.b32.xlu1 %v2854_v44, %s2547_s18 }
 0x4d6   :  { %v450_v46 = vpop.xlane.xlu0 %449 }
 0x4d7   :  { %v470_v48 = vmul.f32 %v450_v46, %v2687_v34 }
 0x4d9   :  { %v478_v49 = vadd.f32 1e-05, %v470_v48 }
 0x4da   :  { %140 = vadd.xlane.f32.xlu1 %v139_v23 }
 0x4db   :  { %2405 = vrsqrt.f32 %v478_v49  ;;  %vm501_vm15 = vweird.f32 %v478_v49 }
 0x4e1   :  { %v2406_v50 = vpop.eup %2405 }
 0x4e2   :  { %v496_v51 = vmul.f32 %v2406_v50, %v478_v49  ;;  %vm502_vm14 = vweird.f32 %v2406_v50 }
 0x4e3   :  { %vm503_vm0 = vmor %vm501_vm15, %vm502_vm14 }
 0x4e4   :  { %v497_v13 = vmul.f32 %v2406_v50, %v496_v51 }
 0x4e6   :  { %v498_v55 = vmul.f32 0.5, %v497_v13 }
 0x4e8   :  { %v499_v56 = vsub.f32 1.5, %v498_v55  ;;  %v2968_v55 = vld [vmem:[%s3523_s8 + $0x1] ss:$0 sm:$0xff] }
 0x4ea   :  { %v500_v57 = vmul.f32 %v2406_v50, %v499_v56 }
 0x4ec   :  { %v504_v14 = vsel %vm503_vm0, %v2406_v50, %v500_v57 }
 0x4ed   :  { %v566_v52 = vmul.f32 %v504_v14, %v430_v36 }
 0x4ef   :  { %v574_v58 = vmax.f32 %v566_v52, 0.0 }
 0x4f1   :  { %2301 = vmatmul.msk.f32.gmra.mxu2 %vm132_vm2, %v574_v58 }
 0x522   :  { %v749_v16 = vpop.permute.xlu1 %748 }
 0x523   :  { %2311 = vmatmul.msk.f32.vlgmr.msra.gmra.mxu3 %vm132_vm2, %v749_v16 }
 0x524   :  { %850 = vmatpush.msra.mxu3 %v2897_v8 }
 0x526   :  { %851 = vmatpush.msra.mxu3 %v2904_v10 }
 0x528   :  { %852 = vmatpush.msra.mxu3 %v2911_v11 }
 0x52a   :  { %853 = vmatpush.msra.mxu3 %v2918_v12 }
 0x52b   :  { %2313 = vmatmul.msk.f32.vlgmr.msrb.gmra.mxu3 %vm132_vm2, %v749_v16 }
 0x52c   :  { %928 = vmatpush.msrb.mxu3 %v2756_v54 }
 0x52e   :  { %929 = vmatpush.msrb.mxu3 %v2766_v60 }
 0x530   :  { %930 = vmatpush.msrb.mxu3 %v2771_v61 }
 0x532   :  { %931 = vmatpush.msrb.mxu3 %v2777_v62 }
 0x533   :  { %2314 = vmatmul.msk.f32.vlgmr.msra.gmra.mxu3 %vm132_vm2, %v2308_v17 }
 0x534   :  { %988 = vmatpush.msra.mxu3 %v2869_v59 }
 0x536   :  { %989 = vmatpush.msra.mxu3 %v2874_v5 }
 0x538   :  { %990 = vmatpush.msra.mxu3 %v2881_v7 }
 0x53a   :  { %991 = vmatpush.msra.mxu3 %v2888_v6 }
 0x54d   :  { %v141_v18 = vpop.xlane.xlu1 %140 }
 0x54e   :  { %v166_v19 = vmul.f32 %v2687_v34, %v141_v18 }
 0x550   :  { %v174_v20 = vsub.f32 %v2860_v45, %v166_v19 }
 0x552   :  { %v182_v21 = vmul.f32 %v174_v20, %v174_v20 }
 0x554   :  { %v194_v22 = vsel %vm132_vm2, %v182_v21, 0.0 }
 0x555   :  { %195 = vadd.xlane.f32.xlu2 %v194_v22 }
 0x56d   :  { %880 = vrot.lane.b32.xlu2 %v2379_v24, %s2545_s25 }
 0x574   :  { %v652_v1 = vpop.f32.mrf.mxu2 }
 0x575   :  { %v653_v45 = vadd.f32 %v2843_v4, %v652_v1 }
 0x5a6   :  { %v769_v25 = vpop.f32.mrf.mxu3 }
 0x5a7   :  { %v792_v26 = vadd.f32 %v769_v25, %v2825_v47  ;;  %v772_v46 = vadd.f32 %v769_v25, %v653_v45 }
 0x5a9   :  { %794 = vrot.lane.b32.xlu0 %v792_v26, %s2545_s25  ;;  %v2312_v48 = vmul.f32 -1.442695, %v772_v46 }
 0x5ae   :  { %v832_v27 = vpop.f32.mrf.mxu3 }
 0x5af   :  { %v833_v57 = vadd.f32 %v2968_v55, %v832_v27 }
 0x5b6   :  { %v855_v31 = vpop.f32.mrf.mxu3 }
 0x5b7   :  { %v858_v14 = vadd.f32 %v855_v31, %v833_v57 }
 0x5c8   :  { %v196_v28 = vpop.xlane.xlu2 %195 }
 0x5c9   :  { %v214_v29 = vmul.f32 %v196_v28, %v2687_v34 }
 0x5cb   :  { %v222_v30 = vadd.f32 1e-05, %v214_v29 }
 0x5cd   :  { %2407 = vrsqrt.f32 %v222_v30  ;;  %vm254_vm3 = vweird.f32 %v222_v30 }
 0x5ce   :  { %2409 = vpow2.f32 %v2312_v48 }
 0x5d0   :  { %v2958_v53 = vpop.permute.xlu2 %880 }
 0x5d1   :  { %v883_v32 = vadd.f32 %v2958_v53, %v855_v31 }
 0x5d3   :  { %v2408_v33 = vpop.eup %2407  ;;  %885 = vrot.lane.b32.xlu1 %v883_v32, %s2545_s25 }
 0x5d4   :  { %v249_v35 = vmul.f32 %v2408_v33, %v222_v30  ;;  %vm255_vm1 = vweird.f32 %v2408_v33  ;;  %v2410_v49 = vpop.eup %2409 }
 0x5d5   :  { %vm256_vm4 = vmor %vm254_vm3, %vm255_vm1  ;;  %v776_v23 = vadd.f32 1.0, %v2410_v49 }
 0x5d6   :  { %v250_v36 = vmul.f32 %v2408_v33, %v249_v35 }
 0x5d7   :  { %2411 = vrcp.f32 %v776_v23  ;;  %v788_v58 = vand.u32 2147483648, %v776_v23  ;;  %vm782_vm6 = vweird.f32 %v776_v23  ;;  %v786_v16 = vand.u32 2147483647, %v776_v23 }
 0x5d8   :  { %v251_v37 = vmul.f32 0.5, %v250_v36 }
 0x5d9   :  { %v789_v19 = vor.u32 1.1754944e-38, %v788_v58  ;;  %vm787_vm8 = vcmp.eq.f32.partialorder %v786_v16, 8.507059e+37 }
 0x5da   :  { %v252_v39 = vsub.f32 1.5, %v251_v37 }
 0x5db   :  { %901 = vrot.lane.b32.xlu1 %v2308_v17, %s2546_s17  ;;  %v2315_v17 = vmul.f32 -1.442695, %v858_v14 }
 0x5dc   :  { %v253_v40 = vmul.f32 %v2408_v33, %v252_v39 }
 0x5dd   :  { %v2412_v50 = vpop.eup %2411  ;;  %2413 = vpow2.f32 %v2315_v17 }
 0x5de   :  { %v257_v41 = vsel %vm256_vm4, %v2408_v33, %v253_v40  ;;  %v778_v51 = vmul.f32 %v2412_v50, %v776_v23  ;;  %vm783_vm5 = vweird.f32 %v2412_v50 }
 0x5df   :  { %v310_v42 = vmul.f32 %v257_v41, %v174_v20  ;;  %vm784_vm7 = vmor %vm782_vm6, %vm783_vm5 }
 0x5e0   :  { %v779_v13 = vsub.f32 1.0, %v778_v51 }
 0x5e1   :  { %v318_v43 = vmax.f32 %v310_v42, 0.0 }
 0x5e2   :  { %v780_v56 = vmul.f32 %v2412_v50, %v779_v13 }
 0x5e3   :  { %2284 = vmatmul.msk.f32.gmra.mxu1 %vm132_vm2, %v318_v43  ;;  %v2414_v24 = vpop.eup %2413 }
 0x5e4   :  { %v781_v52 = vadd.f32 %v2412_v50, %v780_v56  ;;  %v862_v25 = vadd.f32 1.0, %v2414_v24 }
 0x5e6   :  { %v785_v18 = vsel %vm784_vm7, %v2412_v50, %v781_v52  ;;  %2415 = vrcp.f32 %v862_v25  ;;  %v874_v31 = vand.u32 2147483648, %v862_v25  ;;  %vm868_vm10 = vweird.f32 %v862_v25 }
 0x5e7   :  { %v790_v21 = vsel %vm787_vm8, %v789_v19, %v785_v18  ;;  %v872_v32 = vand.u32 2147483647, %v862_v25 }
 0x5e8   :  { %v875_v35 = vor.u32 1.1754944e-38, %v874_v31  ;;  %v804_v52 = vsub.f32 1.0, %v790_v21  ;;  %v810_v58 = vmul.f32 %v790_v21, %v2854_v44 }
 0x5e9   :  { %vm873_vm12 = vcmp.eq.f32.partialorder %v872_v32, 8.507059e+37 }
 0x5ec   :  { %v2416_v26 = vpop.eup %2415 }
 0x5ed   :  { %v864_v27 = vmul.f32 %v2416_v26, %v862_v25  ;;  %vm869_vm9 = vweird.f32 %v2416_v26 }
 0x5ee   :  { %vm870_vm11 = vmor %vm868_vm10, %vm869_vm9 }
 0x5ef   :  { %v865_v28 = vsub.f32 1.0, %v864_v27 }
 0x5f1   :  { %v866_v29 = vmul.f32 %v2416_v26, %v865_v28 }
 0x5f3   :  { %v867_v30 = vadd.f32 %v2416_v26, %v866_v29 }
 0x5f5   :  { %v871_v33 = vsel %vm870_vm11, %v2416_v26, %v867_v30 }
 0x5f6   :  { %v876_v36 = vsel %vm873_vm12, %v875_v35, %v871_v33 }
 0x61b   :  { %v795_v20 = vpop.permute.xlu0 %794 }
 0x61c   :  { %v797_v22 = vmul.f32 %v795_v20, %v790_v21  ;;  %v895_v20 = vsub.f32 1.0, %v876_v36 }
 0x61e   :  { %799 = vrot.lane.b32.xlu2 %v797_v22, %s2545_s25 }
 0x645   :  { %v886_v37 = vpop.permute.xlu1 %885 }
 0x646   :  { %v888_v39 = vmul.f32 %v886_v37, %v876_v36 }
 0x648   :  { %890 = vrot.lane.b32.xlu0 %v888_v39, %s2545_s25 }
 0x64d   :  { %v902_v19 = vpop.permute.xlu1 %901 }
 0x64e   :  { %v904_v24 = vmul.f32 %v902_v19, %v876_v36 }
 0x660   :  { %v379_v40 = vpop.f32.mrf.mxu1 }
 0x661   :  { %v380_v41 = vadd.f32 %v2734_v38, %v379_v40 }
 0x663   :  { %v403_v42 = vsel %vm132_vm2, %v380_v41, 0.0 }
 0x664   :  { %404 = vadd.xlane.f32.xlu2 %v403_v42 }
 0x678   :  { %v800_v43 = vpop.permute.xlu2 %799 }
 0x679   :  { %v802_v1 = vadd.f32 %v800_v43, %v653_v45 }
 0x67b   :  { %2417 = vtanh.f32 %v802_v1 }
 0x681   :  { %v2418_v46 = vpop.eup %2417 }
 0x682   :  { %806 = vrot.lane.b32.xlu0 %v2418_v46, %s2547_s18 }
 0x6ba   :  { %v891_v48 = vpop.permute.xlu0 %890 }
 0x6bb   :  { %v893_v49 = vadd.f32 %v891_v48, %v833_v57  ;;  %v118_v57 = vadd.f32 %v2666_v9, %v2674_v15 }
 0x6bd   :  { %2419 = vtanh.f32 %v893_v49  ;;  %v142_v18 = vsel %vm132_vm2, %v118_v57, 0.0 }
 0x6c3   :  { %v2420_v23 = vpop.eup %2419 }
 0x6c4   :  { %897 = vrot.lane.b32.xlu0 %v2420_v23, %s2547_s18 }
 0x6d7   :  { %v405_v50 = vpop.xlane.xlu2 %404 }
 0x6d8   :  { %v423_v51 = vmul.f32 %v405_v50, %v2687_v34 }
 0x6da   :  { %v431_v13 = vsub.f32 %v380_v41, %v423_v51 }
 0x6dc   :  { %v439_v56 = vmul.f32 %v431_v13, %v431_v13 }
 0x6de   :  { %v451_v14 = vsel %vm132_vm2, %v439_v56, 0.0 }
 0x6ee   :  { %452 = vadd.xlane.f32.xlu0 %v451_v14 }
 0x6f4   :  { %v807_v45 = vpop.permute.xlu0 %806 }
 0x6f5   :  { %v809_v16 = vmul.f32 %v807_v45, %v804_v52 }
 0x6f7   :  { %v2980_v17 = vadd.f32 %v810_v58, %v809_v16 }
 0x6f9   :  { %912 = vrot.lane.b32.xlu1 %v2980_v17, %s2547_s18 }
 0x723   :  { %143 = vadd.xlane.f32.xlu1 %v142_v18 }
 0x736   :  { %v898_v22 = vpop.permute.xlu0 %897 }
 0x737   :  { %v900_v25 = vmul.f32 %v898_v22, %v895_v20 }
 0x739   :  { %v2987_v26 = vadd.f32 %v904_v24, %v900_v25 }
 0x73b   :  { %907 = vrot.lane.b32.xlu2 %v2987_v26, %s2547_s18 }
 0x761   :  { %v453_v44 = vpop.xlane.xlu0 %452 }
 0x762   :  { %v471_v21 = vmul.f32 %v453_v44, %v2687_v34 }
 0x764   :  { %v479_v27 = vadd.f32 1e-05, %v471_v21 }
 0x766   :  { %2421 = vrsqrt.f32 %v479_v27  ;;  %vm511_vm14 = vweird.f32 %v479_v27 }
 0x76b   :  { %v913_v28 = vpop.permute.xlu1 %912 }
 0x76c   :  { %v2422_v9 = vpop.eup %2421  ;;  %2316 = vmatmul.msk.f32.vlgmr.msrb.gmra.mxu3 %vm132_vm2, %v913_v28 }
 0x76d   :  { %v506_v15 = vmul.f32 %v2422_v9, %v479_v27  ;;  %1010 = vmatpush.msrb.mxu3 %v2897_v8  ;;  %vm512_vm13 = vweird.f32 %v2422_v9 }
 0x76e   :  { %vm513_vm15 = vmor %vm511_vm14, %vm512_vm13 }
 0x76f   :  { %v507_v29 = vmul.f32 %v2422_v9, %v506_v15  ;;  %1011 = vmatpush.msrb.mxu3 %v2904_v10 }
 0x771   :  { %v508_v30 = vmul.f32 0.5, %v507_v29  ;;  %1012 = vmatpush.msrb.mxu3 %v2911_v11 }
 0x773   :  { %v509_v31 = vsub.f32 1.5, %v508_v30  ;;  %1013 = vmatpush.msrb.mxu3 %v2918_v12 }
 0x774   :  { %2318 = vmatmul.msk.f32.vlgmr.msra.gmra.mxu3 %vm132_vm2, %v913_v28 }
 0x775   :  { %v510_v32 = vmul.f32 %v2422_v9, %v509_v31  ;;  %1080 = vmatpush.msra.mxu3 %v2756_v54 }
 0x777   :  { %v514_v33 = vsel %vm513_vm15, %v2422_v9, %v510_v32  ;;  %1081 = vmatpush.msra.mxu3 %v2766_v60 }
 0x778   :  { %v567_v35 = vmul.f32 %v514_v33, %v431_v13 }
 0x779   :  { %1082 = vmatpush.msra.mxu3 %v2771_v61 }
 0x77a   :  { %v575_v36 = vmax.f32 %v567_v35, 0.0 }
 0x77b   :  { %1083 = vmatpush.msra.mxu3 %v2777_v62 }
 0x77c   :  { %2302 = vmatmul.msk.f32.gmra.mxu2 %vm132_vm2, %v575_v36 }
 0x795   :  { %v908_v37 = vpop.permute.xlu2 %907 }
 0x796   :  { %910 = vst.msk [vmem:[#allocation2] sm:$0xff] %vm132_vm2, %v908_v37  ;;  %v144_v39 = vpop.xlane.xlu1 %143  ;;  %2319 = vmatmul.msk.f32.vlgmr.msrb.gmra.mxu3 %vm132_vm2, %v908_v37 }
 0x797   :  { %v167_v54 = vmul.f32 %v2687_v34, %v144_v39  ;;  %1140 = vmatpush.msrb.mxu3 %v2869_v59 }
 0x799   :  { %v175_v40 = vsub.f32 %v118_v57, %v167_v54  ;;  %1141 = vmatpush.msrb.mxu3 %v2874_v5 }
 0x79b   :  { %v183_v60 = vmul.f32 %v175_v40, %v175_v40  ;;  %1142 = vmatpush.msrb.mxu3 %v2881_v7 }
 0x79d   :  { %v197_v61 = vsel %vm132_vm2, %v183_v60, 0.0  ;;  %1143 = vmatpush.msrb.mxu3 %v2888_v6 }
 0x79e   :  { %198 = vadd.xlane.f32.xlu0 %v197_v61 }
 0x7ef   :  { %v933_v62 = vpop.f32.mrf.mxu3 }
 0x7f0   :  { %v956_v41 = vadd.f32 %v933_v62, %v2825_v47 }
 0x7f2   :  { %958 = vrot.lane.b32.xlu2 %v956_v41, %s2545_s25 }
 0x7f7   :  { %v993_v42 = vpop.f32.mrf.mxu3 }
 0x7f8   :  { %v994_v33 = vadd.f32 %v2968_v55, %v993_v42 }
 0x7ff   :  { %v655_v46 = vpop.f32.mrf.mxu2 }
 0x800   :  { %v3015_v49 = vadd.f32 %v2843_v4, %v655_v46 }
 0x802   :  { %v936_v51 = vadd.f32 %v933_v62, %v3015_v49 }
 0x804   :  { %v2317_v14 = vmul.f32 -1.442695, %v936_v51 }
 0x811   :  { %v199_v43 = vpop.xlane.xlu0 %198 }
 0x812   :  { %v215_v1 = vmul.f32 %v199_v43, %v2687_v34 }
 0x814   :  { %v223_v48 = vadd.f32 1e-05, %v215_v1 }
 0x816   :  { %2423 = vrsqrt.f32 %v223_v48  ;;  %vm264_vm1 = vweird.f32 %v223_v48 }
 0x817   :  { %2425 = vpow2.f32 %v2317_v14 }
 0x819   :  { %v1015_v23 = vpop.f32.mrf.mxu3 }
 0x81a   :  { %v1038_v50 = vadd.f32 %v1015_v23, %v2958_v53  ;;  %v1018_v35 = vadd.f32 %v1015_v23, %v994_v33 }
 0x81c   :  { %v2424_v13 = vpop.eup %2423  ;;  %1040 = vrot.lane.b32.xlu0 %v1038_v50, %s2545_s25  ;;  %v2320_v36 = vmul.f32 -1.442695, %v1018_v35 }
 0x81d   :  { %v259_v56 = vmul.f32 %v2424_v13, %v223_v48  ;;  %vm265_vm0 = vweird.f32 %v2424_v13  ;;  %v2426_v19 = vpop.eup %2425 }
 0x81e   :  { %vm266_vm3 = vmor %vm264_vm1, %vm265_vm0  ;;  %v940_v22 = vadd.f32 1.0, %v2426_v19 }
 0x81f   :  { %v260_v52 = vmul.f32 %v2424_v13, %v259_v56 }
 0x820   :  { %2427 = vrcp.f32 %v940_v22  ;;  %v952_v28 = vand.u32 2147483648, %v940_v22  ;;  %vm946_vm5 = vweird.f32 %v940_v22  ;;  %v950_v9 = vand.u32 2147483647, %v940_v22 }
 0x821   :  { %v261_v45 = vmul.f32 0.5, %v260_v52  ;;  %2429 = vpow2.f32 %v2320_v36 }
 0x822   :  { %v953_v29 = vor.u32 1.1754944e-38, %v952_v28  ;;  %vm951_vm7 = vcmp.eq.f32.partialorder %v950_v9, 8.507059e+37 }
 0x823   :  { %v262_v58 = vsub.f32 1.5, %v261_v45 }
 0x825   :  { %v263_v16 = vmul.f32 %v2424_v13, %v262_v58 }
 0x826   :  { %v2428_v24 = vpop.eup %2427 }
 0x827   :  { %v267_v57 = vsel %vm266_vm3, %v2424_v13, %v263_v16  ;;  %v942_v25 = vmul.f32 %v2428_v24, %v940_v22  ;;  %vm947_vm4 = vweird.f32 %v2428_v24  ;;  %v2430_v37 = vpop.eup %2429 }
 0x828   :  { %v311_v18 = vmul.f32 %v267_v57, %v175_v40  ;;  %vm948_vm6 = vmor %vm946_vm5, %vm947_vm4  ;;  %v1022_v39 = vadd.f32 1.0, %v2430_v37 }
 0x829   :  { %v943_v44 = vsub.f32 1.0, %v942_v25 }
 0x82a   :  { %v319_v20 = vmax.f32 %v311_v18, 0.0  ;;  %2431 = vrcp.f32 %v1022_v39  ;;  %v1034_v41 = vand.u32 2147483648, %v1022_v39  ;;  %vm1028_vm9 = vweird.f32 %v1022_v39 }
 0x82b   :  { %v944_v21 = vmul.f32 %v2428_v24, %v943_v44  ;;  %v1032_v43 = vand.u32 2147483647, %v1022_v39 }
 0x82c   :  { %2285 = vmatmul.msk.f32.gmra.mxu1 %vm132_vm2, %v319_v20  ;;  %v1035_v46 = vor.u32 1.1754944e-38, %v1034_v41 }
 0x82d   :  { %v945_v27 = vadd.f32 %v2428_v24, %v944_v21  ;;  %vm1033_vm11 = vcmp.eq.f32.partialorder %v1032_v43, 8.507059e+37 }
 0x82f   :  { %v949_v15 = vsel %vm948_vm6, %v2428_v24, %v945_v27 }
 0x830   :  { %v954_v30 = vsel %vm951_vm7, %v953_v29, %v949_v15  ;;  %v2432_v54 = vpop.eup %2431 }
 0x831   :  { %v1024_v40 = vmul.f32 %v2432_v54, %v1022_v39  ;;  %vm1029_vm8 = vweird.f32 %v2432_v54  ;;  %v968_v24 = vsub.f32 1.0, %v954_v30  ;;  %v974_v21 = vmul.f32 %v954_v30, %v2980_v17 }
 0x832   :  { %vm1030_vm10 = vmor %vm1028_vm9, %vm1029_vm8 }
 0x833   :  { %v1025_v60 = vsub.f32 1.0, %v1024_v40 }
 0x835   :  { %v1026_v61 = vmul.f32 %v2432_v54, %v1025_v60 }
 0x837   :  { %v1027_v62 = vadd.f32 %v2432_v54, %v1026_v61 }
 0x839   :  { %v1031_v1 = vsel %vm1030_vm10, %v2432_v54, %v1027_v62 }
 0x83a   :  { %v1036_v48 = vsel %vm1033_vm11, %v1035_v46, %v1031_v1 }
 0x83b   :  { %v1050_v9 = vsub.f32 1.0, %v1036_v48  ;;  %v1056_v29 = vmul.f32 %v1036_v48, %v2987_v26 }
 0x84c   :  { %v959_v31 = vpop.permute.xlu2 %958 }
 0x84d   :  { %v961_v32 = vmul.f32 %v959_v31, %v954_v30 }
 0x84f   :  { %963 = vrot.lane.b32.xlu1 %v961_v32, %s2545_s25 }
 0x88e   :  { %v1041_v42 = vpop.permute.xlu0 %1040 }
 0x88f   :  { %v1043_v23 = vmul.f32 %v1041_v42, %v1036_v48 }
 0x891   :  { %1045 = vrot.lane.b32.xlu2 %v1043_v23, %s2545_s25 }
 0x8a9   :  { %v382_v50 = vpop.f32.mrf.mxu1 }
 0x8aa   :  { %v383_v51 = vadd.f32 %v2734_v38, %v382_v50 }
 0x8ac   :  { %v406_v13 = vsel %vm132_vm2, %v383_v51, 0.0 }
 0x8ba   :  { %407 = vadd.xlane.f32.xlu2 %v406_v13 }
 0x8c1   :  { %v964_v56 = vpop.permute.xlu1 %963 }
 0x8c2   :  { %v966_v14 = vadd.f32 %v964_v56, %v3015_v49  ;;  %v3034_v49 = vld [vmem:[%s3518_s5] ss:$0 sm:$0xff] }
 0x8c3   :  { %v3038_v22 = vadd.f32 %v3034_v49, %v2834_v0  ;;  %v392_v43 = vadd.f32 %v3034_v49, %v2836_v2  ;;  %v386_v23 = vadd.f32 %v3034_v49, %v2832_v63 }
 0x8c4   :  { %2433 = vtanh.f32 %v966_v14 }
 0x8c5   :  { %v412_v25 = vsel %vm132_vm2, %v3038_v22, 0.0  ;;  %v409_v2 = vsel %vm132_vm2, %v386_v23, 0.0 }
 0x8ca   :  { %v2434_v52 = vpop.eup %2433 }
 0x8cb   :  { %970 = vrot.lane.b32.xlu0 %v2434_v52, %s2547_s18 }
 0x8eb   :  { %v1046_v45 = vpop.permute.xlu2 %1045 }
 0x8ec   :  { %v1048_v58 = vadd.f32 %v1046_v45, %v994_v33 }
 0x8ee   :  { %2435 = vtanh.f32 %v1048_v58 }
 0x8f4   :  { %v2436_v16 = vpop.eup %2435 }
 0x8f5   :  { %1052 = vrot.lane.b32.xlu1 %v2436_v16, %s2547_s18 }
 0x92d   :  { %v408_v57 = vpop.xlane.xlu2 %407 }
 0x92e   :  { %v424_v18 = vmul.f32 %v408_v57, %v2687_v34 }
 0x930   :  { %v432_v38 = vsub.f32 %v383_v51, %v424_v18 }
 0x932   :  { %v440_v19 = vmul.f32 %v432_v38, %v432_v38 }
 0x934   :  { %v454_v20 = vsel %vm132_vm2, %v440_v19, 0.0 }
 0x935   :  { %455 = vadd.xlane.f32.xlu0 %v454_v20 }
 0x93d   :  { %v971_v44 = vpop.permute.xlu0 %970  ;;  %413 = vadd.xlane.f32.xlu0 %v412_v25 }
 0x93e   :  { %v973_v27 = vmul.f32 %v971_v44, %v968_v24 }
 0x940   :  { %v3043_v28 = vadd.f32 %v974_v21, %v973_v27 }
 0x942   :  { %1064 = vrot.lane.b32.xlu1 %v3043_v28, %s2547_s18 }
 0x967   :  { %v1053_v15 = vpop.permute.xlu1 %1052 }
 0x968   :  { %v1055_v0 = vmul.f32 %v1053_v15, %v1050_v9 }
 0x96a   :  { %v3048_v31 = vadd.f32 %v1056_v29, %v1055_v0 }
 0x96c   :  { %1059 = vrot.lane.b32.xlu1 %v3048_v31, %s2547_s18 }
 0x9a8   :  { %v456_v32 = vpop.xlane.xlu0 %455 }
 0x9a9   :  { %v472_v33 = vmul.f32 %v456_v32, %v2687_v34 }
 0x9ab   :  { %v480_v17 = vadd.f32 1e-05, %v472_v33 }
 0x9ad   :  { %2437 = vrsqrt.f32 %v480_v17  ;;  %vm521_vm13 = vweird.f32 %v480_v17 }
 0x9b3   :  { %v2438_v30 = vpop.eup %2437 }
 0x9b4   :  { %v516_v35 = vmul.f32 %v2438_v30, %v480_v17  ;;  %v1065_v36 = vpop.permute.xlu1 %1064  ;;  %vm522_vm12 = vweird.f32 %v2438_v30 }
 0x9b5   :  { %2321 = vmatmul.msk.f32.vlgmr.msra.gmra.mxu3 %vm132_vm2, %v1065_v36  ;;  %vm523_vm14 = vmor %vm521_vm13, %vm522_vm12 }
 0x9b6   :  { %v517_v37 = vmul.f32 %v2438_v30, %v516_v35  ;;  %1292 = vmatpush.msra.mxu3 %v2869_v59 }
 0x9b8   :  { %v518_v26 = vmul.f32 0.5, %v517_v37  ;;  %1293 = vmatpush.msra.mxu3 %v2874_v5 }
 0x9ba   :  { %v519_v39 = vsub.f32 1.5, %v518_v26  ;;  %1294 = vmatpush.msra.mxu3 %v2881_v7 }
 0x9bc   :  { %v520_v54 = vmul.f32 %v2438_v30, %v519_v39  ;;  %1295 = vmatpush.msra.mxu3 %v2888_v6 }
 0x9bd   :  { %2323 = vmatmul.msk.f32.vlgmr.msrb.gmra.mxu3 %vm132_vm2, %v1065_v36 }
 0x9be   :  { %v524_v40 = vsel %vm523_vm14, %v2438_v30, %v520_v54  ;;  %1466 = vmatpush.msrb.mxu3 %v2897_v8 }
 0x9bf   :  { %v568_v60 = vmul.f32 %v524_v40, %v432_v38  ;;  %v395_v40 = vadd.f32 %v3034_v49, %v2838_v3 }
 0x9c0   :  { %1467 = vmatpush.msrb.mxu3 %v2904_v10 }
 0x9c1   :  { %v576_v61 = vmax.f32 %v568_v60, 0.0 }
 0x9c2   :  { %1468 = vmatpush.msrb.mxu3 %v2911_v11 }
 0x9c3   :  { %2303 = vmatmul.msk.f32.gmra.mxu2 %vm132_vm2, %v576_v61  ;;  %v414_v61 = vpop.xlane.xlu0 %413 }
 0x9c4   :  { %1469 = vmatpush.msrb.mxu3 %v2918_v12 }
 0x9de   :  { %v1060_v62 = vpop.permute.xlu1 %1059 }
 0x9df   :  { %1062 = vst.msk [vmem:[#allocation2 + $0x8] sm:$0xff] %vm132_vm2, %v1060_v62  ;;  %2324 = vmatmul.msk.f32.vlgmr.msrb.gmra.mxu1 %vm132_vm2, %v1060_v62 }
 0x9e0   :  { %1596 = vmatpush.msrb.mxu1 %v2869_v59 }
 0x9e2   :  { %1597 = vmatpush.msrb.mxu1 %v2874_v5  ;;  %v415_v5 = vsel %vm132_vm2, %v392_v43, 0.0 }
 0x9e4   :  { %1598 = vmatpush.msrb.mxu1 %v2881_v7 }
 0x9e6   :  { %1599 = vmatpush.msrb.mxu1 %v2888_v6 }
 0xa38   :  { %v1085_v8 = vpop.f32.mrf.mxu3 }
 0xa39   :  { %v1108_v10 = vadd.f32 %v1085_v8, %v2825_v47 }
 0xa3b   :  { %1110 = vrot.lane.b32.xlu2 %v1108_v10, %s2545_s25  ;;  %v418_v10 = vsel %vm132_vm2, %v395_v40, 0.0 }
 0xa40   :  { %v1145_v63 = vpop.f32.mrf.mxu3 }
 0xa41   :  { %v1146_v57 = vadd.f32 %v2968_v55, %v1145_v63 }
 0xa46   :  { %v658_v12 = vpop.f32.mrf.mxu2 }
 0xa47   :  { %v659_v59 = vadd.f32 %v2843_v4, %v658_v12 }
 0xa49   :  { %v1088_v7 = vadd.f32 %v1085_v8, %v659_v59 }
 0xa4b   :  { %v2322_v6 = vmul.f32 -1.442695, %v1088_v7 }
 0xa4d   :  { %2439 = vpow2.f32 %v2322_v6 }
 0xa53   :  { %v2440_v1 = vpop.eup %2439 }
 0xa54   :  { %v1092_v46 = vadd.f32 1.0, %v2440_v1 }
 0xa56   :  { %2441 = vrcp.f32 %v1092_v46  ;;  %v1104_v13 = vand.u32 2147483648, %v1092_v46  ;;  %vm1098_vm0 = vweird.f32 %v1092_v46  ;;  %v1102_v56 = vand.u32 2147483647, %v1092_v46 }
 0xa58   :  { %v1105_v52 = vor.u32 1.1754944e-38, %v1104_v13  ;;  %vm1103_vm3 = vcmp.eq.f32.partialorder %v1102_v56, 8.507059e+37 }
 0xa5c   :  { %v1167_v11 = vpop.f32.mrf.mxu1  ;;  %v2442_v42 = vpop.eup %2441 }
 0xa5d   :  { %v1190_v41 = vadd.f32 %v1167_v11, %v2958_v53  ;;  %v1094_v48 = vmul.f32 %v2442_v42, %v1092_v46  ;;  %vm1099_vm15 = vweird.f32 %v2442_v42  ;;  %v1170_v18 = vadd.f32 %v1167_v11, %v1146_v57 }
 0xa5e   :  { %vm1100_vm1 = vmor %vm1098_vm0, %vm1099_vm15  ;;  %v426_v11 = vmul.f32 %v414_v61, %v2687_v34 }
 0xa5f   :  { %1192 = vrot.lane.b32.xlu1 %v1190_v41, %s2545_s25  ;;  %v1095_v50 = vsub.f32 1.0, %v1094_v48  ;;  %v2325_v38 = vmul.f32 -1.442695, %v1170_v18 }
 0xa61   :  { %v1096_v51 = vmul.f32 %v2442_v42, %v1095_v50  ;;  %2443 = vpow2.f32 %v2325_v38 }
 0xa63   :  { %v1097_v4 = vadd.f32 %v2442_v42, %v1096_v51 }
 0xa64   :  { %416 = vadd.xlane.f32.xlu2 %v415_v5 }
 0xa65   :  { %v1101_v14 = vsel %vm1100_vm1, %v2442_v42, %v1097_v4 }
 0xa66   :  { %v3081_v45 = vsel %vm1103_vm3, %v1105_v52, %v1101_v14 }
 0xa67   :  { %v2444_v19 = vpop.eup %2443  ;;  %v1120_v38 = vsub.f32 1.0, %v3081_v45 }
 0xa68   :  { %v1174_v20 = vadd.f32 1.0, %v2444_v19 }
 0xa6a   :  { %2445 = vrcp.f32 %v1174_v20  ;;  %v1186_v9 = vand.u32 2147483648, %v1174_v20  ;;  %vm1180_vm5 = vweird.f32 %v1174_v20  ;;  %v1184_v15 = vand.u32 2147483647, %v1174_v20 }
 0xa6c   :  { %v1187_v0 = vor.u32 1.1754944e-38, %v1186_v9  ;;  %vm1185_vm7 = vcmp.eq.f32.partialorder %v1184_v15, 8.507059e+37 }
 0xa70   :  { %v2446_v24 = vpop.eup %2445 }
 0xa71   :  { %v1176_v25 = vmul.f32 %v2446_v24, %v1174_v20  ;;  %vm1181_vm4 = vweird.f32 %v2446_v24 }
 0xa72   :  { %vm1182_vm6 = vmor %vm1180_vm5, %vm1181_vm4 }
 0xa73   :  { %v1177_v44 = vsub.f32 1.0, %v1176_v25 }
 0xa75   :  { %v1178_v21 = vmul.f32 %v2446_v24, %v1177_v44  ;;  %v1126_v44 = vmul.f32 %v3081_v45, %v3043_v28 }
 0xa77   :  { %v1179_v27 = vadd.f32 %v2446_v24, %v1178_v21 }
 0xa79   :  { %v1183_v29 = vsel %vm1182_vm6, %v2446_v24, %v1179_v27 }
 0xa7a   :  { %v3086_v33 = vsel %vm1185_vm7, %v1187_v0, %v1183_v29 }
 0xa89   :  { %410 = vadd.xlane.f32.xlu1 %v409_v2 }
 0xa95   :  { %v1111_v58 = vpop.permute.xlu2 %1110 }
 0xa96   :  { %v1113_v16 = vmul.f32 %v1111_v58, %v3081_v45 }
 0xa98   :  { %1115 = vrot.lane.b32.xlu2 %v1113_v16, %s2545_s25 }
 0xad1   :  { %v1193_v32 = vpop.permute.xlu1 %1192 }
 0xad2   :  { %v1195_v17 = vmul.f32 %v1193_v32, %v3086_v33 }
 0xad4   :  { %1197 = vrot.lane.b32.xlu0 %v1195_v17, %s2545_s25 }
 0xad7   :  { %v417_v30 = vpop.xlane.xlu2 %416 }
 0xad8   :  { %v427_v35 = vmul.f32 %v417_v30, %v2687_v34 }
 0xada   :  { %v3091_v36 = vsub.f32 %v392_v43, %v427_v35  ;;  %v3103_v43 = vsub.f32 %v3038_v22, %v426_v11 }
 0xadc   :  { %v443_v37 = vmul.f32 %v3091_v36, %v3091_v36  ;;  %v442_v3 = vmul.f32 %v3103_v43, %v3103_v43 }
 0xade   :  { %v463_v26 = vsel %vm132_vm2, %v443_v37, 0.0  ;;  %v460_v49 = vsel %vm132_vm2, %v442_v3, 0.0 }
 0xadf   :  { %464 = vadd.xlane.f32.xlu2 %v463_v26 }
 0xaf2   :  { %v1116_v39 = vpop.permute.xlu2 %1115 }
 0xaf3   :  { %v1118_v54 = vadd.f32 %v1116_v39, %v659_v59 }
 0xaf5   :  { %2447 = vtanh.f32 %v1118_v54 }
 0xafb   :  { %v2448_v60 = vpop.eup %2447 }
 0xafc   :  { %v411_v62 = vpop.xlane.xlu1 %410  ;;  %1122 = vrot.lane.b32.xlu2 %v2448_v60, %s2547_s18 }
 0xafd   :  { %v425_v8 = vmul.f32 %v411_v62, %v2687_v34 }
 0xafe   :  { %419 = vadd.xlane.f32.xlu0 %v418_v10  ;;  %v1202_v10 = vsub.f32 1.0, %v3086_v33 }
 0xaff   :  { %v433_v12 = vsub.f32 %v386_v23, %v425_v8 }
 0xb01   :  { %v441_v41 = vmul.f32 %v433_v12, %v433_v12 }
 0xb03   :  { %v457_v59 = vsel %vm132_vm2, %v441_v41, 0.0 }
 0xb04   :  { %458 = vadd.xlane.f32.xlu1 %v457_v59 }
 0xb0c   :  { %461 = vadd.xlane.f32.xlu1 %v460_v49 }
 0xb46   :  { %v1198_v5 = vpop.permute.xlu0 %1197 }
 0xb47   :  { %v1200_v7 = vadd.f32 %v1198_v5, %v1146_v57 }
 0xb49   :  { %2449 = vtanh.f32 %v1200_v7 }
 0xb4f   :  { %v2450_v6 = vpop.eup %2449 }
 0xb50   :  { %1204 = vrot.lane.b32.xlu1 %v2450_v6, %s2547_s18 }
 0xb52   :  { %v465_v1 = vpop.xlane.xlu2 %464 }
 0xb53   :  { %v475_v42 = vmul.f32 %v465_v1, %v2687_v34 }
 0xb55   :  { %v483_v50 = vadd.f32 1e-05, %v475_v42 }
 0xb57   :  { %2451 = vrsqrt.f32 %v483_v50  ;;  %vm551_vm15 = vweird.f32 %v483_v50 }
 0xb5a   :  { %v1123_v57 = vpop.permute.xlu2 %1122 }
 0xb5b   :  { %v1125_v20 = vmul.f32 %v1123_v57, %v1120_v38 }
 0xb5d   :  { %v2452_v52 = vpop.eup %2451  ;;  %v3122_v9 = vadd.f32 %v1126_v44, %v1125_v20 }
 0xb5e   :  { %v546_v18 = vmul.f32 %v2452_v52, %v483_v50  ;;  %vm552_vm14 = vweird.f32 %v2452_v52 }
 0xb5f   :  { %vm553_vm0 = vmor %vm551_vm15, %vm552_vm14 }
 0xb60   :  { %v547_v25 = vmul.f32 %v2452_v52, %v546_v18 }
 0xb62   :  { %v548_v0 = vmul.f32 0.5, %v547_v25 }
 0xb64   :  { %v549_v26 = vsub.f32 1.5, %v548_v0  ;;  %v3219_v0 = vld [vmem:[%s3523_s8] ss:$0 sm:$0xff] }
 0xb66   :  { %v550_v54 = vmul.f32 %v2452_v52, %v549_v26 }
 0xb68   :  { %v554_v61 = vsel %vm553_vm0, %v2452_v52, %v550_v54  ;;  %v3184_v52 = vld [vmem:[%s3521_s6 + $0x38] sm:$0xff] }
 0xb69   :  { %v571_v62 = vmul.f32 %v554_v61, %v3091_v36 }
 0xb6b   :  { %v579_v8 = vmax.f32 %v571_v62, 0.0 }
 0xb71   :  { %v420_v46 = vpop.xlane.xlu0 %419 }
 0xb72   :  { %v428_v22 = vmul.f32 %v420_v46, %v2687_v34 }
 0xb74   :  { %v3112_v48 = vsub.f32 %v395_v40, %v428_v22 }
 0xb76   :  { %v444_v23 = vmul.f32 %v3112_v48, %v3112_v48 }
 0xb77   :  { %v459_v2 = vpop.xlane.xlu1 %458 }
 0xb78   :  { %v473_v51 = vmul.f32 %v459_v2, %v2687_v34  ;;  %v466_v4 = vsel %vm132_vm2, %v444_v23, 0.0  ;;  %v2531_v23 = vld [vmem:[%s3520_s7 + $0x10] sm:$0xff]  ;;  %v2532_v2 = vld [vmem:[%s3520_s7 + $0x8] sm:$0xff] }
 0xb79   :  { %467 = vadd.xlane.f32.xlu0 %v466_v4  ;;  %v3164_v4 = vld [vmem:[%s3520_s7 + $0x30] sm:$0xff] }
 0xb7a   :  { %v481_v13 = vadd.f32 1e-05, %v473_v51  ;;  %v2533_v51 = vld [vmem:[%s3520_s7] sm:$0xff] }
 0xb7c   :  { %2453 = vrsqrt.f32 %v481_v13  ;;  %vm531_vm9 = vweird.f32 %v481_v13 }
 0xb7f   :  { %v462_v56 = vpop.xlane.xlu1 %461 }
 0xb80   :  { %v474_v14 = vmul.f32 %v462_v56, %v2687_v34  ;;  %v3176_v56 = vld [vmem:[%s3520_s7 + $0x20] sm:$0xff] }
 0xb82   :  { %v2454_v58 = vpop.eup %2453  ;;  %v482_v16 = vadd.f32 1e-05, %v474_v14 }
 0xb83   :  { %v526_v63 = vmul.f32 %v2454_v58, %v481_v13  ;;  %vm532_vm8 = vweird.f32 %v2454_v58  ;;  %v3170_v13 = vld [vmem:[%s3520_s7 + $0x28] sm:$0xff] }
 0xb84   :  { %2455 = vrsqrt.f32 %v482_v16  ;;  %vm533_vm10 = vmor %vm531_vm9, %vm532_vm8  ;;  %vm541_vm12 = vweird.f32 %v482_v16 }
 0xb85   :  { %v527_v19 = vmul.f32 %v2454_v58, %v526_v63  ;;  %v3202_v63 = vld [vmem:[%s3521_s6 + $0x20] sm:$0xff] }
 0xb87   :  { %v528_v24 = vmul.f32 0.5, %v527_v19 }
 0xb89   :  { %v529_v21 = vsub.f32 1.5, %v528_v24 }
 0xb8a   :  { %v2456_v27 = vpop.eup %2455 }
 0xb8b   :  { %v536_v15 = vmul.f32 %v2456_v27, %v482_v16  ;;  %v530_v29 = vmul.f32 %v2454_v58, %v529_v21  ;;  %vm542_vm11 = vweird.f32 %v2456_v27  ;;  %v3196_v16 = vld [vmem:[%s3521_s6 + $0x28] sm:$0xff] }
 0xb8c   :  { %vm543_vm13 = vmor %vm541_vm12, %vm542_vm11 }
 0xb8d   :  { %v537_v32 = vmul.f32 %v2456_v27, %v536_v15  ;;  %1216 = vrot.lane.b32.xlu0 %v3122_v9, %s2547_s18  ;;  %v534_v17 = vsel %vm533_vm10, %v2454_v58, %v530_v29  ;;  %v3190_v58 = vld [vmem:[%s3521_s6 + $0x30] sm:$0xff] }
 0xb8e   :  { %v569_v30 = vmul.f32 %v534_v17, %v433_v12  ;;  %v1208_v12 = vmul.f32 %v3086_v33, %v3048_v31  ;;  %v2530_v33 = vld [vmem:[%s3520_s7 + $0x18] sm:$0xff] }
 0xb8f   :  { %v538_v35 = vmul.f32 0.5, %v537_v32 }
 0xb90   :  { %v577_v37 = vmax.f32 %v569_v30, 0.0 }
 0xb91   :  { %v539_v28 = vsub.f32 1.5, %v538_v35 }
 0xb92   :  { %2304 = vmatmul.msk.f32.gmra.mxu2 %vm132_vm2, %v577_v37 }
 0xb93   :  { %v540_v45 = vmul.f32 %v2456_v27, %v539_v28 }
 0xb95   :  { %v544_v39 = vsel %vm543_vm13, %v2456_v27, %v540_v45 }
 0xb96   :  { %v570_v40 = vmul.f32 %v544_v39, %v3103_v43 }
 0xb98   :  { %v578_v60 = vmax.f32 %v570_v40, 0.0 }
 0xb9a   :  { %2305 = vmatmul.msk.f32.gmra.mxu2 %vm132_vm2, %v578_v60 }
 0xba2   :  { %2306 = vmatmul.msk.f32.gmra.mxu2 %vm132_vm2, %v579_v8 }
 0xbc2   :  { %v1205_v11 = vpop.permute.xlu1 %1204 }
 0xbc3   :  { %v1207_v41 = vmul.f32 %v1205_v11, %v1202_v10 }
 0xbc5   :  { %v3134_v59 = vadd.f32 %v1208_v12, %v1207_v41 }
 0xbc7   :  { %1211 = vrot.lane.b32.xlu1 %v3134_v59, %s2547_s18 }
 0xbec   :  { %v468_v43 = vpop.xlane.xlu0 %467 }
 0xbed   :  { %v476_v3 = vmul.f32 %v468_v43, %v2687_v34 }
 0xbef   :  { %v484_v49 = vadd.f32 1e-05, %v476_v3 }
 0xbf1   :  { %2457 = vrsqrt.f32 %v484_v49  ;;  %vm561_vm3 = vweird.f32 %v484_v49 }
 0xbf7   :  { %v2458_v36 = vpop.eup %2457 }
 0xbf8   :  { %v556_v5 = vmul.f32 %v2458_v36, %v484_v49  ;;  %vm562_vm1 = vweird.f32 %v2458_v36 }
 0xbf9   :  { %vm563_vm4 = vmor %vm561_vm3, %vm562_vm1 }
 0xbfa   :  { %v557_v7 = vmul.f32 %v2458_v36, %v556_v5 }
 0xbfc   :  { %v558_v6 = vmul.f32 0.5, %v557_v7 }
 0xbfe   :  { %v559_v1 = vsub.f32 1.5, %v558_v6 }
 0xbff   :  { %v1217_v46 = vpop.permute.xlu0 %1216 }
 0xc00   :  { %2328 = vmatmul.msk.f32.vlgmr.msra.gmra.mxu3 %vm132_vm2, %v1217_v46  ;;  %v560_v31 = vmul.f32 %v2458_v36, %v559_v1 }
 0xc01   :  { %1688 = vmatpush.msra.mxu3 %v2530_v33 }
 0xc02   :  { %v564_v22 = vsel %vm563_vm4, %v2458_v36, %v560_v31 }
 0xc03   :  { %v572_v42 = vmul.f32 %v564_v22, %v3112_v48  ;;  %1689 = vmatpush.msra.mxu3 %v2531_v23  ;;  %v3158_v48 = vld [vmem:[%s3520_s7 + $0x38] sm:$0xff] }
 0xc05   :  { %v580_v50 = vmax.f32 %v572_v42, 0.0  ;;  %1690 = vmatpush.msra.mxu3 %v2532_v2 }
 0xc07   :  { %2307 = vmatmul.msk.f32.gmra.mxu2 %vm132_vm2, %v580_v50  ;;  %1691 = vmatpush.msra.mxu3 %v2533_v51 }
 0xc0f   :  { %2326 = vmatmul.msk.f32.vlgmr.msra.gmra.mxu2 %vm132_vm2, %v1217_v46 }
 0xc10   :  { %1618 = vmatpush.msra.mxu2 %v3158_v48 }
 0xc12   :  { %1619 = vmatpush.msra.mxu2 %v3164_v4 }
 0xc14   :  { %1620 = vmatpush.msra.mxu2 %v3170_v13 }
 0xc15   :  { %v661_v57 = vpop.f32.mrf.mxu2 }
 0xc16   :  { %1621 = vmatpush.msra.mxu2 %v3176_v56  ;;  %v662_v32 = vadd.f32 %v3219_v0, %v661_v57 }
 0xc1d   :  { %v3205_v18 = vpop.f32.mrf.mxu2 }
 0xc25   :  { %v3207_v38 = vpop.f32.mrf.mxu2 }
 0xc39   :  { %v1212_v14 = vpop.permute.xlu1 %1211 }
 0xc3a   :  { %1214 = vst.msk [vmem:[#allocation2 + $0x10] sm:$0xff] %vm132_vm2, %v1212_v14  ;;  %2329 = vmatmul.msk.f32.vlgmr.msrb.gmra.mxu0 %vm132_vm2, %v1212_v14 }
 0xc3b   :  { %1748 = vmatpush.msrb.mxu0 %v3184_v52 }
 0xc3d   :  { %1749 = vmatpush.msrb.mxu0 %v3190_v58 }
 0xc3f   :  { %1750 = vmatpush.msrb.mxu0 %v3196_v16 }
 0xc41   :  { %1751 = vmatpush.msrb.mxu0 %v3202_v63 }
 0xc83   :  { %v1297_v21 = vpop.f32.mrf.mxu3 }
 0xc84   :  { %v1298_v27 = vadd.f32 %v2968_v55, %v1297_v21 }
 0xc8a   :  { %v3209_v19 = vpop.f32.mrf.mxu2 }
 0xc92   :  { %v1237_v25 = vpop.f32.mrf.mxu2 }
 0xc93   :  { %v1260_v44 = vadd.f32 %v1237_v25, %v2825_v47  ;;  %v1240_v17 = vadd.f32 %v1237_v25, %v662_v32 }
 0xc95   :  { %v2327_v30 = vmul.f32 -1.442695, %v1240_v17 }
 0xcb7   :  { %v1319_v20 = vpop.f32.mrf.mxu0 }
 0xcb8   :  { %v1342_v24 = vadd.f32 %v1319_v20, %v2958_v53  ;;  %v1322_v15 = vadd.f32 %v1319_v20, %v1298_v27 }
 0xcba   :  { %1344 = vrot.lane.b32.xlu1 %v1342_v24, %s2545_s25  ;;  %v2330_v29 = vmul.f32 -1.442695, %v1322_v15 }
 0xcbc   :  { %2459 = vpow2.f32 %v2330_v29 }
 0xcbd   :  { %2461 = vpow2.f32 %v2327_v30 }
 0xcc2   :  { %1262 = vrot.lane.b32.xlu1 %v1260_v44, %s2545_s25  ;;  %v2460_v35 = vpop.eup %2459 }
 0xcc3   :  { %v1326_v37 = vadd.f32 1.0, %v2460_v35  ;;  %v2462_v26 = vpop.eup %2461  ;;  %v665_v35 = vadd.f32 %v3219_v0, %v3205_v18 }
 0xcc4   :  { %v1244_v28 = vadd.f32 1.0, %v2462_v26 }
 0xcc5   :  { %2463 = vrcp.f32 %v1326_v37  ;;  %v1338_v8 = vand.u32 2147483648, %v1326_v37  ;;  %vm1332_vm6 = vweird.f32 %v1326_v37  ;;  %v1336_v10 = vand.u32 2147483647, %v1326_v37 }
 0xcc6   :  { %2465 = vrcp.f32 %v1244_v28  ;;  %v1256_v5 = vand.u32 2147483648, %v1244_v28  ;;  %vm1250_vm10 = vweird.f32 %v1244_v28  ;;  %v1254_v7 = vand.u32 2147483647, %v1244_v28 }
 0xcc7   :  { %v1339_v41 = vor.u32 1.1754944e-38, %v1338_v8  ;;  %vm1337_vm8 = vcmp.eq.f32.partialorder %v1336_v10, 8.507059e+37 }
 0xcc8   :  { %v1257_v1 = vor.u32 1.1754944e-38, %v1256_v5  ;;  %vm1255_vm12 = vcmp.eq.f32.partialorder %v1254_v7, 8.507059e+37 }
 0xccb   :  { %v2464_v45 = vpop.eup %2463 }
 0xccc   :  { %v1328_v55 = vmul.f32 %v2464_v45, %v1326_v37  ;;  %v2466_v54 = vpop.eup %2465  ;;  %vm1333_vm5 = vweird.f32 %v2464_v45 }
 0xccd   :  { %v1246_v60 = vmul.f32 %v2466_v54, %v1244_v28  ;;  %vm1334_vm7 = vmor %vm1332_vm6, %vm1333_vm5  ;;  %vm1251_vm9 = vweird.f32 %v2466_v54 }
 0xcce   :  { %v1329_v39 = vsub.f32 1.0, %v1328_v55  ;;  %vm1252_vm11 = vmor %vm1250_vm10, %vm1251_vm9 }
 0xccf   :  { %v1247_v62 = vsub.f32 1.0, %v1246_v60 }
 0xcd0   :  { %v1330_v40 = vmul.f32 %v2464_v45, %v1329_v39 }
 0xcd1   :  { %v1248_v12 = vmul.f32 %v2466_v54, %v1247_v62 }
 0xcd2   :  { %v1331_v61 = vadd.f32 %v2464_v45, %v1330_v40 }
 0xcd3   :  { %v1249_v36 = vadd.f32 %v2466_v54, %v1248_v12 }
 0xcd4   :  { %v1335_v11 = vsel %vm1334_vm7, %v2464_v45, %v1331_v61 }
 0xcd5   :  { %v1340_v3 = vsel %vm1337_vm8, %v1339_v41, %v1335_v11  ;;  %v1253_v6 = vsel %vm1252_vm11, %v2466_v54, %v1249_v36 }
 0xcd6   :  { %v1258_v31 = vsel %vm1255_vm12, %v1257_v1, %v1253_v6  ;;  %v1354_v14 = vsub.f32 1.0, %v1340_v3  ;;  %v1360_v20 = vmul.f32 %v1340_v3, %v3134_v59 }
 0xcd7   :  { %v1272_v44 = vsub.f32 1.0, %v1258_v31 }
 0xd2c   :  { %v1345_v43 = vpop.permute.xlu1 %1344 }
 0xd2d   :  { %v1347_v49 = vmul.f32 %v1345_v43, %v1340_v3 }
 0xd2f   :  { %1349 = vrot.lane.b32.xlu2 %v1347_v49, %s2545_s25 }
 0xd34   :  { %v1263_v46 = vpop.permute.xlu1 %1262 }
 0xd35   :  { %v1265_v33 = vmul.f32 %v1263_v46, %v1258_v31 }
 0xd37   :  { %1267 = vrot.lane.b32.xlu1 %v1265_v33, %s2545_s25 }
 0xd89   :  { %v1350_v22 = vpop.permute.xlu2 %1349 }
 0xd8a   :  { %v1352_v42 = vadd.f32 %v1350_v22, %v1298_v27  ;;  %v1278_v27 = vmul.f32 %v1258_v31, %v3122_v9 }
 0xd8c   :  { %2467 = vtanh.f32 %v1352_v42 }
 0xd92   :  { %v2468_v23 = vpop.eup %2467 }
 0xd93   :  { %1356 = vrot.lane.b32.xlu0 %v2468_v23, %s2547_s18 }
 0xda9   :  { %v1268_v50 = vpop.permute.xlu1 %1267 }
 0xdaa   :  { %v1270_v2 = vadd.f32 %v1268_v50, %v662_v32 }
 0xdac   :  { %2469 = vtanh.f32 %v1270_v2 }
 0xdb2   :  { %v2470_v51 = vpop.eup %2469 }
 0xdb3   :  { %1274 = vrot.lane.b32.xlu2 %v2470_v51, %s2547_s18 }
 0xe05   :  { %v1357_v57 = vpop.permute.xlu0 %1356 }
 0xe06   :  { %v1359_v24 = vmul.f32 %v1357_v57, %v1354_v14 }
 0xe08   :  { %v3227_v25 = vadd.f32 %v1360_v20, %v1359_v24 }
 0xe0a   :  { %1363 = vrot.lane.b32.xlu1 %v3227_v25, %s2547_s18 }
 0xe0d   :  { %v1275_v21 = vpop.permute.xlu2 %1274 }
 0xe0e   :  { %v1277_v15 = vmul.f32 %v1275_v21, %v1272_v44 }
 0xe10   :  { %v3232_v29 = vadd.f32 %v1278_v27, %v1277_v15 }
 0xe12   :  { %1368 = vrot.lane.b32.xlu0 %v3232_v29, %s2547_s18 }
 0xe7c   :  { %v1364_v32 = vpop.permute.xlu1 %1363 }
 0xe7d   :  { %1366 = vst.msk [vmem:[#allocation2 + $0x18] sm:$0xff] %vm132_vm2, %v1364_v32  ;;  %2334 = vmatmul.msk.f32.vlgmr.msrb.gmra.mxu3 %vm132_vm2, %v1364_v32 }
 0xe7e   :  { %1862 = vmatpush.msrb.mxu3 %v3158_v48 }
 0xe80   :  { %1863 = vmatpush.msrb.mxu3 %v3164_v4 }
 0xe82   :  { %1864 = vmatpush.msrb.mxu3 %v3170_v13 }
 0xe84   :  { %v1369_v59 = vpop.permute.xlu0 %1368  ;;  %1865 = vmatpush.msrb.mxu3 %v3176_v56 }
 0xe85   :  { %2331 = vmatmul.msk.f32.vlgmr.msra.gmra.mxu1 %vm132_vm2, %v1369_v59  ;;  %2333 = vmatmul.msk.f32.vlgmr.msrb.gmra.mxu2 %vm132_vm2, %v1369_v59 }
 0xe86   :  { %1770 = vmatpush.msra.mxu1 %v3158_v48  ;;  %1840 = vmatpush.msrb.mxu2 %v3184_v52 }
 0xe88   :  { %1771 = vmatpush.msra.mxu1 %v3164_v4  ;;  %1841 = vmatpush.msrb.mxu2 %v3190_v58 }
 0xe8a   :  { %1772 = vmatpush.msra.mxu1 %v3170_v13  ;;  %1842 = vmatpush.msrb.mxu2 %v3196_v16  ;;  %v3259_v13 = vld [vmem:[%s3523_s8 + $0x1] ss:$0 sm:$0xff] }
 0xe8c   :  { %1773 = vmatpush.msra.mxu1 %v3176_v56  ;;  %1843 = vmatpush.msrb.mxu2 %v3202_v63 }
 0xf00   :  { %v1471_v9 = vpop.f32.mrf.mxu3 }
 0xf01   :  { %v1494_v17 = vadd.f32 %v1471_v9, %v2958_v53 }
 0xf02   :  { %v1389_v30 = vpop.f32.mrf.mxu1 }
 0xf03   :  { %v1412_v48 = vadd.f32 %v1389_v30, %v2825_v47  ;;  %1496 = vrot.lane.b32.xlu2 %v1494_v17, %s2545_s25  ;;  %v1392_v37 = vadd.f32 %v1389_v30, %v665_v35 }
 0xf05   :  { %1414 = vrot.lane.b32.xlu1 %v1412_v48, %s2545_s25  ;;  %v2332_v28 = vmul.f32 -1.442695, %v1392_v37 }
 0xf08   :  { %v1449_v4 = vpop.f32.mrf.mxu2 }
 0xf09   :  { %v1450_v56 = vadd.f32 %v3259_v13, %v1449_v4 }
 0xf0b   :  { %v1474_v52 = vadd.f32 %v1471_v9, %v1450_v56 }
 0xf0d   :  { %v2335_v58 = vmul.f32 -1.442695, %v1474_v52 }
 0xf0f   :  { %2471 = vpow2.f32 %v2335_v58 }
 0xf15   :  { %v2472_v16 = vpop.eup %2471 }
 0xf16   :  { %v1478_v63 = vadd.f32 1.0, %v2472_v16 }
 0xf18   :  { %2473 = vrcp.f32 %v1478_v63  ;;  %v1490_v61 = vand.u32 2147483648, %v1478_v63  ;;  %vm1484_vm14 = vweird.f32 %v1478_v63  ;;  %v1488_v62 = vand.u32 2147483647, %v1478_v63 }
 0xf19   :  { %2475 = vpow2.f32 %v2332_v28 }
 0xf1a   :  { %v1491_v10 = vor.u32 1.1754944e-38, %v1490_v61  ;;  %vm1489_vm0 = vcmp.eq.f32.partialorder %v1488_v62, 8.507059e+37 }
 0xf1e   :  { %v2474_v26 = vpop.eup %2473 }
 0xf1f   :  { %v1480_v45 = vmul.f32 %v2474_v26, %v1478_v63  ;;  %v2476_v54 = vpop.eup %2475  ;;  %vm1485_vm13 = vweird.f32 %v2474_v26 }
 0xf20   :  { %v1396_v60 = vadd.f32 1.0, %v2476_v54  ;;  %vm1486_vm15 = vmor %vm1484_vm14, %vm1485_vm13 }
 0xf21   :  { %v1481_v55 = vsub.f32 1.0, %v1480_v45 }
 0xf22   :  { %2477 = vrcp.f32 %v1396_v60  ;;  %v1408_v5 = vand.u32 2147483648, %v1396_v60  ;;  %vm1402_vm3 = vweird.f32 %v1396_v60  ;;  %v1406_v7 = vand.u32 2147483647, %v1396_v60 }
 0xf23   :  { %v1482_v39 = vmul.f32 %v2474_v26, %v1481_v55 }
 0xf24   :  { %v1409_v1 = vor.u32 1.1754944e-38, %v1408_v5  ;;  %vm1407_vm5 = vcmp.eq.f32.partialorder %v1406_v7, 8.507059e+37 }
 0xf25   :  { %v1483_v40 = vadd.f32 %v2474_v26, %v1482_v39 }
 0xf27   :  { %v1487_v8 = vsel %vm1486_vm15, %v2474_v26, %v1483_v40 }
 0xf28   :  { %v1492_v11 = vsel %vm1489_vm0, %v1491_v10, %v1487_v8  ;;  %v2478_v41 = vpop.eup %2477 }
 0xf29   :  { %v1398_v43 = vmul.f32 %v2478_v41, %v1396_v60  ;;  %vm1403_vm1 = vweird.f32 %v2478_v41  ;;  %v1506_v14 = vsub.f32 1.0, %v1492_v11  ;;  %v1512_v20 = vmul.f32 %v1492_v11, %v3227_v25 }
 0xf2a   :  { %vm1404_vm4 = vmor %vm1402_vm3, %vm1403_vm1 }
 0xf2b   :  { %v1399_v3 = vsub.f32 1.0, %v1398_v43 }
 0xf2d   :  { %v1400_v49 = vmul.f32 %v2478_v41, %v1399_v3 }
 0xf2f   :  { %v1401_v36 = vadd.f32 %v2478_v41, %v1400_v49 }
 0xf31   :  { %v1405_v6 = vsel %vm1404_vm4, %v2478_v41, %v1401_v36 }
 0xf32   :  { %v1410_v46 = vsel %vm1407_vm5, %v1409_v1, %v1405_v6 }
 0xf33   :  { %v1424_v44 = vsub.f32 1.0, %v1410_v46  ;;  %v1430_v15 = vmul.f32 %v1410_v46, %v3232_v29 }
 0xf5d   :  { %v1497_v18 = vpop.permute.xlu2 %1496 }
 0xf5e   :  { %v1499_v12 = vmul.f32 %v1497_v18, %v1492_v11 }
 0xf60   :  { %1501 = vrot.lane.b32.xlu0 %v1499_v12, %s2545_s25 }
 0xf77   :  { %v1415_v31 = vpop.permute.xlu1 %1414 }
 0xf78   :  { %v1417_v33 = vmul.f32 %v1415_v31, %v1410_v46 }
 0xf7a   :  { %1419 = vrot.lane.b32.xlu2 %v1417_v33, %s2545_s25 }
 0xfd2   :  { %v1502_v22 = vpop.permute.xlu0 %1501 }
 0xfd3   :  { %v1504_v42 = vadd.f32 %v1502_v22, %v1450_v56  ;;  %v668_v56 = vadd.f32 %v3219_v0, %v3207_v38 }
 0xfd4   :  { %v1420_v23 = vpop.permute.xlu2 %1419 }
 0xfd5   :  { %2479 = vtanh.f32 %v1504_v42  ;;  %v1422_v50 = vadd.f32 %v1420_v23, %v665_v35 }
 0xfd7   :  { %2481 = vtanh.f32 %v1422_v50 }
 0xfdb   :  { %v2480_v2 = vpop.eup %2479 }
 0xfdc   :  { %1508 = vrot.lane.b32.xlu1 %v2480_v2, %s2547_s18 }
 0xfdd   :  { %v2482_v51 = vpop.eup %2481 }
 0xfde   :  { %1426 = vrot.lane.b32.xlu0 %v2482_v51, %s2547_s18 }
0x104e   :  { %v1509_v57 = vpop.permute.xlu1 %1508 }
0x104f   :  { %v1511_v24 = vmul.f32 %v1509_v57, %v1506_v14 }
0x1050   :  { %v1427_v21 = vpop.permute.xlu0 %1426 }
0x1051   :  { %v3269_v27 = vadd.f32 %v1512_v20, %v1511_v24  ;;  %v1429_v32 = vmul.f32 %v1427_v21, %v1424_v44 }
0x1053   :  { %v3272_v59 = vadd.f32 %v1430_v15, %v1429_v32  ;;  %1515 = vrot.lane.b32.xlu2 %v3269_v27, %s2547_s18 }
0x1055   :  { %1520 = vrot.lane.b32.xlu1 %v3272_v59, %s2547_s18 }
0x10ad   :  { %v1516_v9 = vpop.permute.xlu2 %1515 }
0x10ae   :  { %1518 = vst.msk [vmem:[#allocation2 + $0x20] sm:$0xff] %vm132_vm2, %v1516_v9  ;;  %2339 = vmatmul.msk.f32.vlgmr.msra.gmra.mxu2 %vm132_vm2, %v1516_v9 }
0x10c7   :  { %v1521_v25 = vpop.permute.xlu1 %1520 }
0x10c8   :  { %2336 = vmatmul.msk.f32.vlgmr.msra.gmra.mxu0 %vm132_vm2, %v1521_v25  ;;  %2338 = vmatmul.msk.f32.vlgmr.msrb.gmra.mxu1 %vm132_vm2, %v1521_v25  ;;  %v1929_v25 = vld [vmem:[%s3524_s10 + $0x10] sm:$0xff] }
0x1131   :  { %v1623_v29 = vpop.f32.mrf.mxu2 }
0x1132   :  { %v1646_v17 = vadd.f32 %v1623_v29, %v2958_v53 }
0x1134   :  { %1648 = vrot.lane.b32.xlu0 %v1646_v17, %s2545_s25 }
0x1145   :  { %v1541_v30 = vpop.f32.mrf.mxu0  ;;  %v1601_v4 = vpop.f32.mrf.mxu1 }
0x1146   :  { %v1564_v48 = vadd.f32 %v1541_v30, %v2825_v47  ;;  %v1544_v52 = vadd.f32 %v1541_v30, %v668_v56  ;;  %v1602_v58 = vadd.f32 %v3259_v13, %v1601_v4  ;;  %v1920_v4 = vld [vmem:[#allocation2 + $0x8] sm:$0xff] }
0x1148   :  { %1566 = vrot.lane.b32.xlu2 %v1564_v48, %s2545_s25  ;;  %v2337_v16 = vmul.f32 -1.442695, %v1544_v52  ;;  %v1626_v63 = vadd.f32 %v1623_v29, %v1602_v58  ;;  %v1927_v29 = vld [vmem:[%s3524_s10] sm:$0xff]  ;;  %v1922_v52 = vld [vmem:[#allocation2 + $0x18] sm:$0xff] }
0x1149   :  { %v1919_v48 = vld [vmem:[#allocation2] sm:$0xff] }
0x114a   :  { %2483 = vpow2.f32 %v2337_v16  ;;  %v2340_v35 = vmul.f32 -1.442695, %v1626_v63 }
0x114c   :  { %2485 = vpow2.f32 %v2340_v35 }
0x1150   :  { %v2484_v37 = vpop.eup %2483 }
0x1151   :  { %v1548_v26 = vadd.f32 1.0, %v2484_v37 }
0x1152   :  { %v2486_v28 = vpop.eup %2485 }
0x1153   :  { %2487 = vrcp.f32 %v1548_v26  ;;  %v1630_v45 = vadd.f32 1.0, %v2486_v28  ;;  %v1560_v10 = vand.u32 2147483648, %v1548_v26  ;;  %vm1554_vm7 = vweird.f32 %v1548_v26 }
0x1154   :  { %v1558_v18 = vand.u32 2147483647, %v1548_v26 }
0x1155   :  { %2489 = vrcp.f32 %v1630_v45  ;;  %v1561_v41 = vor.u32 1.1754944e-38, %v1560_v10  ;;  %v1642_v43 = vand.u32 2147483648, %v1630_v45  ;;  %vm1636_vm11 = vweird.f32 %v1630_v45 }
0x1156   :  { %vm1559_vm10 = vcmp.eq.f32.partialorder %v1558_v18, 8.507059e+37  ;;  %v1640_v3 = vand.u32 2147483647, %v1630_v45 }
0x1157   :  { %v1643_v6 = vor.u32 1.1754944e-38, %v1642_v43 }
0x1158   :  { %vm1641_vm13 = vcmp.eq.f32.partialorder %v1640_v3, 8.507059e+37 }
0x1159   :  { %v2488_v55 = vpop.eup %2487 }
0x115a   :  { %v1550_v39 = vmul.f32 %v2488_v55, %v1548_v26  ;;  %vm1555_vm6 = vweird.f32 %v2488_v55 }
0x115b   :  { %v2490_v54 = vpop.eup %2489  ;;  %vm1556_vm8 = vmor %vm1554_vm7, %vm1555_vm6 }
0x115c   :  { %v1551_v40 = vsub.f32 1.0, %v1550_v39  ;;  %v1632_v60 = vmul.f32 %v2490_v54, %v1630_v45  ;;  %vm1637_vm9 = vweird.f32 %v2490_v54 }
0x115d   :  { %vm1638_vm12 = vmor %vm1636_vm11, %vm1637_vm9 }
0x115e   :  { %v1552_v38 = vmul.f32 %v2488_v55, %v1551_v40  ;;  %v1633_v61 = vsub.f32 1.0, %v1632_v60 }
0x1160   :  { %v1553_v62 = vadd.f32 %v2488_v55, %v1552_v38  ;;  %v1634_v8 = vmul.f32 %v2490_v54, %v1633_v61 }
0x1162   :  { %v1557_v11 = vsel %vm1556_vm8, %v2488_v55, %v1553_v62  ;;  %v1635_v12 = vadd.f32 %v2490_v54, %v1634_v8  ;;  %v671_v55 = vadd.f32 %v3219_v0, %v3209_v19 }
0x1163   :  { %v1562_v36 = vsel %vm1559_vm10, %v1561_v41, %v1557_v11 }
0x1164   :  { %v1639_v7 = vsel %vm1638_vm12, %v2490_v54, %v1635_v12  ;;  %v1576_v44 = vsub.f32 1.0, %v1562_v36  ;;  %v1582_v15 = vmul.f32 %v1562_v36, %v3272_v59  ;;  %v1928_v59 = vld [vmem:[%s3524_s10 + $0x8] sm:$0xff] }
0x1165   :  { %v1644_v46 = vsel %vm1641_vm13, %v1643_v6, %v1639_v7 }
0x1166   :  { %v1658_v51 = vsub.f32 1.0, %v1644_v46  ;;  %v1664_v57 = vmul.f32 %v1644_v46, %v3269_v27  ;;  %v1930_v27 = vld [vmem:[%s3524_s10 + $0x18] sm:$0xff] }
0x1167   :  { %1971 = vmatpush.msra.mxu0 %v1930_v27 }
0x1169   :  { %1972 = vmatpush.msra.mxu0 %v1929_v25 }
0x116b   :  { %1973 = vmatpush.msra.mxu0 %v1928_v59 }
0x116d   :  { %1974 = vmatpush.msra.mxu0 %v1927_v29 }
0x11a2   :  { %v1567_v49 = vpop.permute.xlu2 %1566 }
0x11a3   :  { %v1569_v5 = vmul.f32 %v1567_v49, %v1562_v36 }
0x11a5   :  { %1571 = vrot.lane.b32.xlu0 %v1569_v5, %s2545_s25 }
0x11a6   :  { %v1649_v1 = vpop.permute.xlu0 %1648 }
0x11a7   :  { %v1651_v31 = vmul.f32 %v1649_v1, %v1644_v46 }
0x11a9   :  { %1653 = vrot.lane.b32.xlu1 %v1651_v31, %s2545_s25 }
0x1217   :  { %v1572_v33 = vpop.permute.xlu0 %1571 }
0x1218   :  { %v1574_v22 = vadd.f32 %v1572_v33, %v668_v56  ;;  %v1921_v56 = vld [vmem:[#allocation2 + $0x10] sm:$0xff] }
0x121a   :  { %2491 = vtanh.f32 %v1574_v22 }
0x121b   :  { %v1654_v42 = vpop.permute.xlu1 %1653 }
0x121c   :  { %v1656_v23 = vadd.f32 %v1654_v42, %v1602_v58  ;;  %v1923_v58 = vld [vmem:[#allocation2 + $0x20] sm:$0xff] }
0x121e   :  { %2493 = vtanh.f32 %v1656_v23 }
0x1220   :  { %v2492_v50 = vpop.eup %2491 }
0x1221   :  { %1578 = vrot.lane.b32.xlu1 %v2492_v50, %s2547_s18 }
0x1224   :  { %v2494_v2 = vpop.eup %2493 }
0x1225   :  { %1660 = vrot.lane.b32.xlu2 %v2494_v2, %s2547_s18 }
0x127f   :  { %v1661_v14 = vpop.permute.xlu2 %1660 }
0x1280   :  { %v1663_v20 = vmul.f32 %v1661_v14, %v1658_v51 }
0x1282   :  { %v3294_v24 = vadd.f32 %v1664_v57, %v1663_v20 }
0x1284   :  { %1667 = vrot.lane.b32.xlu0 %v3294_v24, %s2547_s18 }
0x1293   :  { %v1579_v21 = vpop.permute.xlu1 %1578 }
0x1294   :  { %v1581_v32 = vmul.f32 %v1579_v21, %v1576_v44 }
0x1296   :  { %v3299_v9 = vadd.f32 %v1582_v15, %v1581_v32 }
0x1298   :  { %1672 = vrot.lane.b32.xlu2 %v3299_v9, %s2547_s18 }
0x12f2   :  { %v1673_v17 = vpop.permute.xlu2 %1672 }
0x12f3   :  { %2341 = vmatmul.msk.f32.vlgmr.msra.gmra.mxu3 %vm132_vm2, %v1673_v17  ;;  %2343 = vmatmul.msk.f32.vlgmr.msrb.gmra.mxu0 %vm132_vm2, %v1673_v17 }
0x12f6   :  { %v1668_v30 = vpop.permute.xlu0 %1667 }
0x12f7   :  { %1670 = vst.msk [vmem:[#allocation2 + $0x28] sm:$0xff] %vm132_vm2, %v1668_v30  ;;  %2344 = vmatmul.msk.f32.vlgmr.msra.gmra.mxu1 %vm132_vm2, %v1668_v30 }
0x12fb   :  { %2350 = vmatmul.msk.f32.vlgmr.msra.gmra.mxu0 %vm132_vm2, %v1919_v48 }
0x12fe   :  { %v1924_v16 = vld [vmem:[#allocation2 + $0x28] sm:$0xff] }
0x1303   :  { %2351 = vmatmul.msk.f32.gmra.mxu0 %vm132_vm2, %v1920_v4 }
0x130b   :  { %2352 = vmatmul.msk.f32.gmra.mxu0 %vm132_vm2, %v1921_v56 }
0x1313   :  { %2353 = vmatmul.msk.f32.gmra.mxu0 %vm132_vm2, %v1922_v52 }
0x131b   :  { %2354 = vmatmul.msk.f32.gmra.mxu0 %vm132_vm2, %v1923_v58 }
0x1323   :  { %2355 = vmatmul.msk.f32.gmra.mxu0 %vm132_vm2, %v1924_v16 }
0x1370   :  { %v1753_v28 = vpop.f32.mrf.mxu0 }
0x1371   :  { %v1754_v45 = vadd.f32 %v3259_v13, %v1753_v28 }
0x1374   :  { %v1775_v63 = vpop.f32.mrf.mxu1 }
0x1375   :  { %v1798_v35 = vadd.f32 %v1775_v63, %v2958_v53  ;;  %v1778_v39 = vadd.f32 %v1775_v63, %v1754_v45 }
0x1376   :  { %v1693_v37 = vpop.f32.mrf.mxu3 }
0x1377   :  { %v1716_v26 = vadd.f32 %v1693_v37, %v2825_v47  ;;  %1800 = vrot.lane.b32.xlu1 %v1798_v35, %s2545_s25  ;;  %v1696_v54 = vadd.f32 %v1693_v37, %v671_v55  ;;  %v2345_v40 = vmul.f32 -1.442695, %v1778_v39 }
0x1379   :  { %1718 = vrot.lane.b32.xlu0 %v1716_v26, %s2545_s25  ;;  %v2342_v60 = vmul.f32 -1.442695, %v1696_v54  ;;  %2495 = vpow2.f32 %v2345_v40 }
0x137b   :  { %2497 = vpow2.f32 %v2342_v60 }
0x137f   :  { %v2496_v38 = vpop.eup %2495 }
0x1380   :  { %v1782_v62 = vadd.f32 1.0, %v2496_v38 }
0x1381   :  { %v2498_v61 = vpop.eup %2497 }
0x1382   :  { %v1700_v47 = vadd.f32 1.0, %v2498_v61  ;;  %2499 = vrcp.f32 %v1782_v62  ;;  %v1794_v3 = vand.u32 2147483648, %v1782_v62  ;;  %vm1788_vm15 = vweird.f32 %v1782_v62 }
0x1383   :  { %v1792_v49 = vand.u32 2147483647, %v1782_v62 }
0x1384   :  { %2501 = vrcp.f32 %v1700_v47  ;;  %v1712_v5 = vand.u32 2147483648, %v1700_v47  ;;  %vm1706_vm3 = vweird.f32 %v1700_v47  ;;  %v1710_v6 = vand.u32 2147483647, %v1700_v47 }
0x1385   :  { %v1795_v1 = vor.u32 1.1754944e-38, %v1794_v3  ;;  %vm1793_vm5 = vcmp.eq.f32.partialorder %v1792_v49, 8.507059e+37 }
0x1386   :  { %v1713_v22 = vor.u32 1.1754944e-38, %v1712_v5  ;;  %vm1711_vm6 = vcmp.eq.f32.partialorder %v1710_v6, 8.507059e+37 }
0x1388   :  { %v2500_v8 = vpop.eup %2499 }
0x1389   :  { %v1784_v18 = vmul.f32 %v2500_v8, %v1782_v62  ;;  %vm1789_vm14 = vweird.f32 %v2500_v8 }
0x138a   :  { %v2502_v10 = vpop.eup %2501  ;;  %vm1790_vm1 = vmor %vm1788_vm15, %vm1789_vm14 }
0x138b   :  { %v1702_v11 = vmul.f32 %v2502_v10, %v1700_v47  ;;  %v1785_v12 = vsub.f32 1.0, %v1784_v18  ;;  %vm1707_vm0 = vweird.f32 %v2502_v10 }
0x138c   :  { %vm1708_vm4 = vmor %vm1706_vm3, %vm1707_vm0 }
0x138d   :  { %v1703_v41 = vsub.f32 1.0, %v1702_v11  ;;  %v1786_v43 = vmul.f32 %v2500_v8, %v1785_v12  ;;  %v3358_v11 = vld [vmem:[%s3525_s11] ss:$0 sm:$0xff] }
0x138f   :  { %v1704_v19 = vmul.f32 %v2502_v10, %v1703_v41  ;;  %v1787_v0 = vadd.f32 %v2500_v8, %v1786_v43 }
0x1391   :  { %v1705_v36 = vadd.f32 %v2502_v10, %v1704_v19  ;;  %v1791_v7 = vsel %vm1790_vm1, %v2500_v8, %v1787_v0  ;;  %v1976_v8 = vpop.f32.mrf.mxu0 }
0x1392   :  { %v1796_v33 = vsel %vm1793_vm5, %v1795_v1, %v1791_v7  ;;  %v1977_v12 = vadd.f32 %v3358_v11, %v1976_v8 }
0x1393   :  { %v1709_v46 = vsel %vm1708_vm4, %v2502_v10, %v1705_v36  ;;  %v1810_v15 = vsub.f32 1.0, %v1796_v33  ;;  %v1816_v27 = vmul.f32 %v1796_v33, %v3294_v24 }
0x1394   :  { %v1714_v23 = vsel %vm1711_vm6, %v1713_v22, %v1709_v46  ;;  %v2000_v41 = vsel %vm132_vm2, %v1977_v12, 0.0 }
0x1395   :  { %v1728_v59 = vsub.f32 1.0, %v1714_v23  ;;  %v1734_v30 = vmul.f32 %v1714_v23, %v3299_v9 }
0x1399   :  { %v1979_v10 = vpop.f32.mrf.mxu0 }
0x139a   :  { %v1980_v46 = vadd.f32 %v3358_v11, %v1979_v10 }
0x139c   :  { %v2003_v22 = vsel %vm132_vm2, %v1980_v46, 0.0 }
0x13a1   :  { %v1982_v18 = vpop.f32.mrf.mxu0 }
0x13a9   :  { %v1985_v43 = vpop.f32.mrf.mxu0 }
0x13aa   :  { %v1986_v19 = vadd.f32 %v3358_v11, %v1985_v43 }
0x13ac   :  { %v2009_v0 = vsel %vm132_vm2, %v1986_v19, 0.0 }
0x13b1   :  { %v1988_v5 = vpop.f32.mrf.mxu0 }
0x13e9   :  { %v1801_v31 = vpop.permute.xlu1 %1800 }
0x13ea   :  { %v1803_v42 = vmul.f32 %v1801_v31, %v1796_v33 }
0x13eb   :  { %v1719_v50 = vpop.permute.xlu0 %1718 }
0x13ec   :  { %v1721_v2 = vmul.f32 %v1719_v50, %v1714_v23  ;;  %1805 = vrot.lane.b32.xlu2 %v1803_v42, %s2545_s25  ;;  %v1991_v42 = vpop.f32.mrf.mxu0 }
0x13ed   :  { %v3374_v23 = vadd.f32 %v3358_v11, %v1991_v42 }
0x13ee   :  { %1723 = vrot.lane.b32.xlu1 %v1721_v2, %s2545_s25 }
0x13ef   :  { %v2015_v50 = vsel %vm132_vm2, %v3374_v23, 0.0 }
0x1446   :  { %v1806_v51 = vpop.permute.xlu2 %1805 }
0x1447   :  { %v1808_v14 = vadd.f32 %v1806_v51, %v1754_v45 }
0x1449   :  { %2503 = vtanh.f32 %v1808_v14 }
0x144f   :  { %v2504_v57 = vpop.eup %2503 }
0x1450   :  { %1812 = vrot.lane.b32.xlu0 %v2504_v57, %s2547_s18 }
0x1460   :  { %v1724_v20 = vpop.permute.xlu1 %1723 }
0x1461   :  { %v1726_v44 = vadd.f32 %v1724_v20, %v671_v55 }
0x1463   :  { %2505 = vtanh.f32 %v1726_v44  ;;  %v2187_v44 = vld [vmem:[%s3527_s12 + $0x18] sm:$0xff] }
0x1464   :  { %2228 = vmatpush.msrb.mxu1 %v2187_v44 }
0x1469   :  { %v2506_v21 = vpop.eup %2505 }
0x146a   :  { %1730 = vrot.lane.b32.xlu2 %v2506_v21, %s2547_s18  ;;  %v2186_v21 = vld [vmem:[%s3527_s12 + $0x10] sm:$0xff] }
0x146b   :  { %2229 = vmatpush.msrb.mxu1 %v2186_v21  ;;  %v3446_v21 = vld [vmem:[%s3528_s13] ss:$0 sm:$0xff] }
0x14c2   :  { %v1813_v32 = vpop.permute.xlu0 %1812 }
0x14c3   :  { %v1815_v25 = vmul.f32 %v1813_v32, %v1810_v15  ;;  %v2185_v32 = vld [vmem:[%s3527_s12 + $0x8] sm:$0xff] }
0x14c4   :  { %v1731_v29 = vpop.permute.xlu2 %1730  ;;  %2230 = vmatpush.msrb.mxu1 %v2185_v32 }
0x14c5   :  { %v3337_v17 = vadd.f32 %v1816_v27, %v1815_v25  ;;  %v1733_v48 = vmul.f32 %v1731_v29, %v1728_v59  ;;  %v2184_v27 = vld [vmem:[%s3527_s12] sm:$0xff]  ;;  %v1983_v25 = vadd.f32 %v3358_v11, %v1982_v18 }
0x14c6   :  { %2231 = vmatpush.msrb.mxu1 %v2184_v27 }
0x14c7   :  { %v1735_v4 = vadd.f32 %v1734_v30, %v1733_v48  ;;  %1819 = vrot.lane.b32.xlu1 %v3337_v17, %s2547_s18 }
0x14c9   :  { %1824 = vrot.lane.b32.xlu0 %v1735_v4, %s2547_s18  ;;  %v2006_v4 = vsel %vm132_vm2, %v1983_v25, 0.0 }
0x1539   :  { %v1820_v56 = vpop.permute.xlu1 %1819 }
0x153a   :  { %1822 = vst.msk [vmem:[#allocation2 + $0x30] sm:$0xff] %vm132_vm2, %v1820_v56  ;;  %2347 = vmatmul.msk.f32.vlgmr.msrb.gmra.mxu3 %vm132_vm2, %v1820_v56 }
0x153b   :  { %v1825_v24 = vpop.permute.xlu0 %1824 }
0x153c   :  { %1916 = vst.msk [vmem:[%s3526_s15] sm:$0xff] %vm132_vm2, %v1825_v24  ;;  %2346 = vmatmul.msk.f32.vlgmr.msrb.gmra.mxu2 %vm132_vm2, %v1825_v24 }
0x1541   :  { %v1925_v9 = vld [vmem:[#allocation2 + $0x30] sm:$0xff] }
0x1542   :  { %2356 = vmatmul.msk.f32.gmra.mxu0 %vm132_vm2, %v1925_v9 }
0x15bd   :  { %v1867_v52 = vpop.f32.mrf.mxu3 }
0x15be   :  { %v1890_v58 = vadd.f32 %v1867_v52, %v2958_v53 }
0x15bf   :  { %v1845_v16 = vpop.f32.mrf.mxu2 }
0x15c0   :  { %1892 = vrot.lane.b32.xlu2 %v1890_v58, %s2545_s25  ;;  %v1846_v63 = vadd.f32 %v3259_v13, %v1845_v16 }
0x15c2   :  { %v1870_v35 = vadd.f32 %v1867_v52, %v1846_v63  ;;  %v3402_v52 = vadd.f32 %v3358_v11, %v1988_v5 }
0x15c4   :  { %v2348_v37 = vmul.f32 -1.442695, %v1870_v35  ;;  %v2012_v35 = vsel %vm132_vm2, %v3402_v52, 0.0 }
0x15c6   :  { %2507 = vpow2.f32 %v2348_v37  ;;  %v1994_v37 = vpop.f32.mrf.mxu0 }
0x15cc   :  { %v2508_v26 = vpop.eup %2507 }
0x15cd   :  { %v1874_v28 = vadd.f32 1.0, %v2508_v26 }
0x15cf   :  { %2509 = vrcp.f32 %v1874_v28  ;;  %v1886_v60 = vand.u32 2147483648, %v1874_v28  ;;  %vm1880_vm8 = vweird.f32 %v1874_v28  ;;  %v1884_v53 = vand.u32 2147483647, %v1874_v28 }
0x15d1   :  { %v1887_v61 = vor.u32 1.1754944e-38, %v1886_v60  ;;  %vm1885_vm10 = vcmp.eq.f32.partialorder %v1884_v53, 8.507059e+37 }
0x15d5   :  { %v2510_v45 = vpop.eup %2509 }
0x15d6   :  { %v1876_v55 = vmul.f32 %v2510_v45, %v1874_v28  ;;  %vm1881_vm7 = vweird.f32 %v2510_v45 }
0x15d7   :  { %vm1882_vm9 = vmor %vm1880_vm8, %vm1881_vm7 }
0x15d8   :  { %v1877_v39 = vsub.f32 1.0, %v1876_v55  ;;  %v1995_v55 = vadd.f32 %v3358_v11, %v1994_v37 }
0x15da   :  { %v1878_v54 = vmul.f32 %v2510_v45, %v1877_v39  ;;  %v2018_v60 = vsel %vm132_vm2, %v1995_v55, 0.0 }
0x15dc   :  { %v1879_v40 = vadd.f32 %v2510_v45, %v1878_v54 }
0x15de   :  { %v1883_v38 = vsel %vm1882_vm9, %v2510_v45, %v1879_v40 }
0x15df   :  { %v1888_v62 = vsel %vm1885_vm10, %v1887_v61, %v1883_v38 }
0x15e0   :  { %v1902_v2 = vsub.f32 1.0, %v1888_v62  ;;  %v1908_v14 = vmul.f32 %v1888_v62, %v3337_v17 }
0x161a   :  { %v1893_v13 = vpop.permute.xlu2 %1892 }
0x161b   :  { %v1895_v47 = vmul.f32 %v1893_v13, %v1888_v62 }
0x161d   :  { %1897 = vrot.lane.b32.xlu1 %v1895_v47, %s2545_s25 }
0x1647   :  { %2001 = vadd.xlane.f32.xlu1 %v2000_v41 }
0x164f   :  { %2010 = vadd.xlane.f32.xlu1 %v2009_v0 }
0x168f   :  { %v1898_v3 = vpop.permute.xlu1 %1897 }
0x1690   :  { %v1900_v49 = vadd.f32 %v1898_v3, %v1846_v63 }
0x1692   :  { %2511 = vtanh.f32 %v1900_v49 }
0x1698   :  { %v2512_v36 = vpop.eup %2511 }
0x1699   :  { %1904 = vrot.lane.b32.xlu0 %v2512_v36, %s2547_s18 }
0x16ba   :  { %v2002_v7 = vpop.xlane.xlu1 %2001 }
0x16bb   :  { %v2024_v6 = vmul.f32 %v2002_v7, %v2687_v34 }
0x16bd   :  { %v3366_v1 = vsub.f32 %v1977_v12, %v2024_v6 }
0x16bf   :  { %v2040_v31 = vmul.f32 %v3366_v1, %v3366_v1 }
0x16c1   :  { %v2048_v33 = vsel %vm132_vm2, %v2040_v31, 0.0 }
0x16c2   :  { %2049 = vadd.xlane.f32.xlu1 %v2048_v33  ;;  %v2011_v15 = vpop.xlane.xlu1 %2010 }
0x16c3   :  { %2004 = vadd.xlane.f32.xlu0 %v2003_v22  ;;  %v2027_v56 = vmul.f32 %v2011_v15, %v2687_v34 }
0x16c5   :  { %v3404_v58 = vsub.f32 %v1986_v19, %v2027_v56 }
0x16c7   :  { %v2043_v28 = vmul.f32 %v3404_v58, %v3404_v58 }
0x16c9   :  { %v2057_v54 = vsel %vm132_vm2, %v2043_v28, 0.0 }
0x16cb   :  { %2016 = vadd.xlane.f32.xlu0 %v2015_v50 }
0x170b   :  { %v1905_v51 = vpop.permute.xlu0 %1904 }
0x170c   :  { %v1907_v57 = vmul.f32 %v1905_v51, %v1902_v2 }
0x170e   :  { %v1909_v20 = vadd.f32 %v1908_v14, %v1907_v57 }
0x1710   :  { %1911 = vrot.lane.b32.xlu2 %v1909_v20, %s2547_s18 }
0x1735   :  { %v2050_v59 = vpop.xlane.xlu1 %2049 }
0x1736   :  { %v2072_v29 = vmul.f32 %v2050_v59, %v2687_v34  ;;  %v2005_v17 = vpop.xlane.xlu0 %2004 }
0x1737   :  { %v2025_v30 = vmul.f32 %v2005_v17, %v2687_v34 }
0x1738   :  { %v2080_v48 = vadd.f32 1e-05, %v2072_v29 }
0x1739   :  { %v3397_v24 = vsub.f32 %v1980_v46, %v2025_v30  ;;  %2007 = vadd.xlane.f32.xlu2 %v2006_v4 }
0x173a   :  { %2513 = vrsqrt.f32 %v2080_v48  ;;  %vm2094_vm12 = vweird.f32 %v2080_v48 }
0x173b   :  { %v2041_v9 = vmul.f32 %v3397_v24, %v3397_v24 }
0x173d   :  { %v2051_v16 = vsel %vm132_vm2, %v2041_v9, 0.0 }
0x173e   :  { %2052 = vadd.xlane.f32.xlu0 %v2051_v16  ;;  %v2017_v8 = vpop.xlane.xlu0 %2016 }
0x173f   :  { %v2029_v12 = vmul.f32 %v2017_v8, %v2687_v34 }
0x1740   :  { %v2514_v63 = vpop.eup %2513 }
0x1741   :  { %v2089_v26 = vmul.f32 %v2514_v63, %v2080_v48  ;;  %2013 = vadd.xlane.f32.xlu2 %v2012_v35  ;;  %vm2095_vm11 = vweird.f32 %v2514_v63  ;;  %v3430_v3 = vsub.f32 %v3374_v23, %v2029_v12 }
0x1742   :  { %vm2096_vm13 = vmor %vm2094_vm12, %vm2095_vm11 }
0x1743   :  { %v2090_v45 = vmul.f32 %v2514_v63, %v2089_v26  ;;  %v2045_v7 = vmul.f32 %v3430_v3, %v3430_v3 }
0x1745   :  { %v2091_v39 = vmul.f32 0.5, %v2090_v45  ;;  %v2063_v6 = vsel %vm132_vm2, %v2045_v7, 0.0 }
0x1746   :  { %2058 = vadd.xlane.f32.xlu0 %v2057_v54 }
0x1747   :  { %v2092_v40 = vsub.f32 1.5, %v2091_v39 }
0x1749   :  { %v2093_v53 = vmul.f32 %v2514_v63, %v2092_v40  ;;  %2019 = vadd.xlane.f32.xlu2 %v2018_v60 }
0x174b   :  { %v2097_v38 = vsel %vm2096_vm13, %v2514_v63, %v2093_v53 }
0x174c   :  { %v2168_v61 = vmul.f32 %v2097_v38, %v3366_v1 }
0x174e   :  { %v2176_v13 = vmax.f32 %v2168_v61, 0.0 }
0x1750   :  { %2358 = vmatmul.msk.f32.vlgmr.msrb.gmra.mxu1 %vm132_vm2, %v2176_v13 }
0x176a   :  { %v1912_v62 = vpop.permute.xlu2 %1911 }
0x176b   :  { %1914 = vst.msk [vmem:[#allocation2 + $0x38] sm:$0xff] %vm132_vm2, %v1912_v62 }
0x176c   :  { %2349 = vst.msk [vmem:[%s3526_s15 + $0x8] sm:$0xff] %vm132_vm2, %v1912_v62 }
0x1772   :  { %v1926_v47 = vld [vmem:[#allocation2 + $0x38] sm:$0xff] }
0x1773   :  { %2357 = vmatmul.msk.f32.gmra.mxu0 %vm132_vm2, %v1926_v47 }
0x17ac   :  { %v2008_v10 = vpop.xlane.xlu2 %2007 }
0x17ad   :  { %v2026_v18 = vmul.f32 %v2008_v10, %v2687_v34 }
0x17af   :  { %v3424_v41 = vsub.f32 %v1983_v25, %v2026_v18 }
0x17b1   :  { %v2053_v43 = vpop.xlane.xlu0 %2052  ;;  %v2042_v19 = vmul.f32 %v3424_v41, %v3424_v41 }
0x17b2   :  { %v2073_v0 = vmul.f32 %v2053_v43, %v2687_v34 }
0x17b3   :  { %v2054_v49 = vsel %vm132_vm2, %v2042_v19, 0.0 }
0x17b4   :  { %v2081_v36 = vadd.f32 1e-05, %v2073_v0  ;;  %2055 = vadd.xlane.f32.xlu2 %v2054_v49  ;;  %v2014_v5 = vpop.xlane.xlu2 %2013 }
0x17b5   :  { %v2028_v27 = vmul.f32 %v2014_v5, %v2687_v34 }
0x17b6   :  { %2515 = vrsqrt.f32 %v2081_v36  ;;  %vm2104_vm15 = vweird.f32 %v2081_v36 }
0x17b7   :  { %v3456_v29 = vsub.f32 %v3402_v52, %v2028_v27 }
0x17b9   :  { %v2044_v30 = vmul.f32 %v3456_v29, %v3456_v29  ;;  %v2059_v4 = vpop.xlane.xlu0 %2058 }
0x17ba   :  { %v2075_v56 = vmul.f32 %v2059_v4, %v2687_v34 }
0x17bb   :  { %v2060_v48 = vsel %vm132_vm2, %v2044_v30, 0.0 }
0x17bc   :  { %v2516_v1 = vpop.eup %2515  ;;  %v2020_v46 = vpop.xlane.xlu2 %2019  ;;  %2064 = vadd.xlane.f32.xlu2 %v2063_v6 }
0x17bd   :  { %v2099_v31 = vmul.f32 %v2516_v1, %v2081_v36  ;;  %v2030_v33 = vmul.f32 %v2020_v46, %v2687_v34  ;;  %vm2105_vm14 = vweird.f32 %v2516_v1 }
0x17be   :  { %vm2106_vm0 = vmor %vm2104_vm15, %vm2105_vm14 }
0x17bf   :  { %v2100_v22 = vmul.f32 %v2516_v1, %v2099_v31  ;;  %v3437_v42 = vsub.f32 %v1995_v55, %v2030_v33 }
0x17c1   :  { %v2101_v23 = vmul.f32 0.5, %v2100_v22  ;;  %v2046_v50 = vmul.f32 %v3437_v42, %v3437_v42 }
0x17c3   :  { %v2102_v2 = vsub.f32 1.5, %v2101_v23  ;;  %v2066_v51 = vsel %vm132_vm2, %v2046_v50, 0.0 }
0x17c4   :  { %2067 = vadd.xlane.f32.xlu0 %v2066_v51 }
0x17c5   :  { %v2103_v14 = vmul.f32 %v2516_v1, %v2102_v2 }
0x17c7   :  { %v2107_v57 = vsel %vm2106_vm0, %v2516_v1, %v2103_v14 }
0x17c8   :  { %v2169_v20 = vmul.f32 %v2107_v57, %v3397_v24  ;;  %v2083_v24 = vadd.f32 1e-05, %v2075_v56 }
0x17ca   :  { %v2177_v44 = vmax.f32 %v2169_v20, 0.0  ;;  %2517 = vrsqrt.f32 %v2083_v24  ;;  %vm2124_vm6 = vweird.f32 %v2083_v24 }
0x17cc   :  { %2359 = vmatmul.msk.f32.gmra.mxu1 %vm132_vm2, %v2177_v44 }
0x17cd   :  { %v2233_v15 = vpop.f32.mrf.mxu1 }
0x17ce   :  { %v2234_v32 = vadd.f32 %v3446_v21, %v2233_v15 }
0x17d0   :  { %2257 = vst [vmem:[%s3529_s14] sm:$0xff] %v2234_v32  ;;  %v2518_v16 = vpop.eup %2517 }
0x17d1   :  { %v2119_v63 = vmul.f32 %v2518_v16, %v2083_v24  ;;  %vm2125_vm5 = vweird.f32 %v2518_v16 }
0x17d2   :  { %vm2126_vm7 = vmor %vm2124_vm6, %vm2125_vm5 }
0x17d3   :  { %v2120_v35 = vmul.f32 %v2518_v16, %v2119_v63 }
0x17d5   :  { %v2121_v28 = vmul.f32 0.5, %v2120_v35 }
0x17d7   :  { %v2122_v39 = vsub.f32 1.5, %v2121_v28 }
0x17d9   :  { %v2123_v53 = vmul.f32 %v2518_v16, %v2122_v39 }
0x17db   :  { %v2127_v13 = vsel %vm2126_vm7, %v2518_v16, %v2123_v53 }
0x17dc   :  { %v2171_v62 = vmul.f32 %v2127_v13, %v3404_v58 }
0x17de   :  { %v2179_v47 = vmax.f32 %v2171_v62, 0.0 }
0x17f0   :  { %v1997_v25 = vpop.f32.mrf.mxu0 }
0x17f1   :  { %v1998_v59 = vadd.f32 %v3358_v11, %v1997_v25 }
0x17f3   :  { %v2021_v17 = vsel %vm132_vm2, %v1998_v59, 0.0 }
0x17f4   :  { %2022 = vadd.xlane.f32.xlu1 %v2021_v17 }
0x17fc   :  { %2061 = vadd.xlane.f32.xlu1 %v2060_v48 }
0x1827   :  { %v2056_v9 = vpop.xlane.xlu2 %2055 }
0x1828   :  { %v2074_v11 = vmul.f32 %v2056_v9, %v2687_v34 }
0x182a   :  { %v2082_v52 = vadd.f32 1e-05, %v2074_v11 }
0x182c   :  { %2519 = vrsqrt.f32 %v2082_v52  ;;  %vm2114_vm3 = vweird.f32 %v2082_v52 }
0x182f   :  { %v2065_v18 = vpop.xlane.xlu2 %2064 }
0x1830   :  { %v2077_v12 = vmul.f32 %v2065_v18, %v2687_v34 }
0x1832   :  { %v2520_v37 = vpop.eup %2519  ;;  %v2085_v43 = vadd.f32 1e-05, %v2077_v12 }
0x1833   :  { %v2109_v26 = vmul.f32 %v2520_v37, %v2082_v52  ;;  %vm2115_vm1 = vweird.f32 %v2520_v37 }
0x1834   :  { %vm2116_vm4 = vmor %vm2114_vm3, %vm2115_vm1  ;;  %2521 = vrsqrt.f32 %v2085_v43  ;;  %vm2144_vm12 = vweird.f32 %v2085_v43 }
0x1835   :  { %v2110_v45 = vmul.f32 %v2520_v37, %v2109_v26 }
0x1837   :  { %v2111_v55 = vmul.f32 0.5, %v2110_v45  ;;  %v2068_v19 = vpop.xlane.xlu0 %2067 }
0x1838   :  { %v2078_v58 = vmul.f32 %v2068_v19, %v2687_v34 }
0x1839   :  { %v2112_v54 = vsub.f32 1.5, %v2111_v55 }
0x183a   :  { %v2086_v7 = vadd.f32 1e-05, %v2078_v58  ;;  %v2522_v46 = vpop.eup %2521 }
0x183b   :  { %v2113_v40 = vmul.f32 %v2520_v37, %v2112_v54  ;;  %v2139_v33 = vmul.f32 %v2522_v46, %v2085_v43  ;;  %vm2145_vm11 = vweird.f32 %v2522_v46 }
0x183c   :  { %2523 = vrsqrt.f32 %v2086_v7  ;;  %vm2146_vm13 = vmor %vm2144_vm12, %vm2145_vm11  ;;  %vm2154_vm15 = vweird.f32 %v2086_v7 }
0x183d   :  { %v2117_v60 = vsel %vm2116_vm4, %v2520_v37, %v2113_v40  ;;  %v2140_v23 = vmul.f32 %v2522_v46, %v2139_v33 }
0x183e   :  { %v2170_v38 = vmul.f32 %v2117_v60, %v3424_v41 }
0x183f   :  { %v2141_v51 = vmul.f32 0.5, %v2140_v23 }
0x1840   :  { %v2178_v61 = vmax.f32 %v2170_v38, 0.0 }
0x1841   :  { %v2142_v44 = vsub.f32 1.5, %v2141_v51 }
0x1842   :  { %2360 = vmatmul.msk.f32.gmra.mxu1 %vm132_vm2, %v2178_v61  ;;  %v2524_v22 = vpop.eup %2523 }
0x1843   :  { %v2149_v14 = vmul.f32 %v2524_v22, %v2086_v7  ;;  %v2143_v17 = vmul.f32 %v2522_v46, %v2142_v44  ;;  %vm2155_vm14 = vweird.f32 %v2524_v22 }
0x1844   :  { %vm2156_vm0 = vmor %vm2154_vm15, %vm2155_vm14 }
0x1845   :  { %v2150_v15 = vmul.f32 %v2524_v22, %v2149_v14  ;;  %v2147_v56 = vsel %vm2146_vm13, %v2522_v46, %v2143_v17 }
0x1846   :  { %v2173_v24 = vmul.f32 %v2147_v56, %v3430_v3 }
0x1847   :  { %v2151_v25 = vmul.f32 0.5, %v2150_v15 }
0x1848   :  { %v2181_v11 = vmax.f32 %v2173_v24, 0.0 }
0x1849   :  { %v2236_v8 = vpop.f32.mrf.mxu1  ;;  %v2152_v4 = vsub.f32 1.5, %v2151_v25 }
0x184a   :  { %v2237_v10 = vadd.f32 %v3446_v21, %v2236_v8  ;;  %2361 = vmatmul.msk.f32.gmra.mxu1 %vm132_vm2, %v2179_v47 }
0x184b   :  { %v2153_v9 = vmul.f32 %v2524_v22, %v2152_v4 }
0x184c   :  { %2258 = vst [vmem:[%s3529_s14 + $0x8] sm:$0xff] %v2237_v10 }
0x184d   :  { %v2157_v16 = vsel %vm2156_vm0, %v2524_v22, %v2153_v9 }
0x184e   :  { %v2174_v52 = vmul.f32 %v2157_v16, %v3437_v42 }
0x1867   :  { %v2023_v41 = vpop.xlane.xlu1 %2022 }
0x1868   :  { %v2031_v0 = vmul.f32 %v2023_v41, %v2687_v34 }
0x186a   :  { %v3474_v49 = vsub.f32 %v1998_v59, %v2031_v0 }
0x186c   :  { %v2047_v36 = vmul.f32 %v3474_v49, %v3474_v49 }
0x186e   :  { %v2069_v5 = vsel %vm132_vm2, %v2047_v36, 0.0 }
0x186f   :  { %2070 = vadd.xlane.f32.xlu1 %v2069_v5  ;;  %v2062_v6 = vpop.xlane.xlu1 %2061 }
0x1870   :  { %v2076_v1 = vmul.f32 %v2062_v6, %v2687_v34 }
0x1872   :  { %v2084_v31 = vadd.f32 1e-05, %v2076_v1 }
0x1874   :  { %2525 = vrsqrt.f32 %v2084_v31  ;;  %vm2134_vm9 = vweird.f32 %v2084_v31 }
0x187a   :  { %v2526_v50 = vpop.eup %2525 }
0x187b   :  { %v2129_v2 = vmul.f32 %v2526_v50, %v2084_v31  ;;  %vm2135_vm8 = vweird.f32 %v2526_v50 }
0x187c   :  { %vm2136_vm10 = vmor %vm2134_vm9, %vm2135_vm8 }
0x187d   :  { %v2130_v57 = vmul.f32 %v2526_v50, %v2129_v2 }
0x187f   :  { %v2131_v20 = vmul.f32 0.5, %v2130_v57 }
0x1881   :  { %v2132_v32 = vsub.f32 1.5, %v2131_v20 }
0x1883   :  { %v2133_v27 = vmul.f32 %v2526_v50, %v2132_v32 }
0x1885   :  { %v2137_v59 = vsel %vm2136_vm10, %v2526_v50, %v2133_v27 }
0x1886   :  { %v2172_v30 = vmul.f32 %v2137_v59, %v3456_v29  ;;  %v2182_v29 = vmax.f32 %v2174_v52, 0.0 }
0x1888   :  { %v2180_v48 = vmax.f32 %v2172_v30, 0.0 }
0x188a   :  { %2362 = vmatmul.msk.f32.gmra.mxu1 %vm132_vm2, %v2180_v48 }
0x1892   :  { %2363 = vmatmul.msk.f32.gmra.mxu1 %vm132_vm2, %v2181_v11 }
0x189a   :  { %2364 = vmatmul.msk.f32.gmra.mxu1 %vm132_vm2, %v2182_v29 }
0x18bf   :  { %v2239_v63 = vpop.f32.mrf.mxu1 }
0x18c0   :  { %v2240_v35 = vadd.f32 %v3446_v21, %v2239_v63 }
0x18c2   :  { %2259 = vst [vmem:[%s3529_s14 + $0x10] sm:$0xff] %v2240_v35 }
0x18c7   :  { %v2242_v3 = vpop.f32.mrf.mxu1 }
0x18c8   :  { %v2243_v37 = vadd.f32 %v3446_v21, %v2242_v3 }
0x18ca   :  { %2260 = vst [vmem:[%s3529_s14 + $0x18] sm:$0xff] %v2243_v37 }
0x18e2   :  { %v2071_v26 = vpop.xlane.xlu1 %2070 }
0x18e3   :  { %v2079_v42 = vmul.f32 %v2071_v26, %v2687_v34 }
0x18e5   :  { %v2087_v28 = vadd.f32 1e-05, %v2079_v42 }
0x18e7   :  { %2527 = vrsqrt.f32 %v2087_v28  ;;  %vm2164_vm3 = vweird.f32 %v2087_v28 }
0x18ed   :  { %v2528_v45 = vpop.eup %2527 }
0x18ee   :  { %v2159_v55 = vmul.f32 %v2528_v45, %v2087_v28  ;;  %vm2165_vm1 = vweird.f32 %v2528_v45 }
0x18ef   :  { %vm2166_vm4 = vmor %vm2164_vm3, %vm2165_vm1 }
0x18f0   :  { %v2160_v39 = vmul.f32 %v2528_v45, %v2159_v55 }
0x18f2   :  { %v2161_v54 = vmul.f32 0.5, %v2160_v39 }
0x18f4   :  { %v2162_v40 = vsub.f32 1.5, %v2161_v54 }
0x18f6   :  { %v2163_v60 = vmul.f32 %v2528_v45, %v2162_v40 }
0x18f8   :  { %v2167_v53 = vsel %vm2166_vm4, %v2528_v45, %v2163_v60 }
0x18f9   :  { %v2175_v38 = vmul.f32 %v2167_v53, %v3474_v49 }
0x18fb   :  { %v2183_v61 = vmax.f32 %v2175_v38, 0.0 }
0x18fd   :  { %2365 = vmatmul.msk.f32.gmra.mxu1 %vm132_vm2, %v2183_v61 }
0x1907   :  { %v2245_v13 = vpop.f32.mrf.mxu1 }
0x1908   :  { %v2246_v34 = vadd.f32 %v3446_v21, %v2245_v13 }
0x190a   :  { %2261 = vst [vmem:[%s3529_s14 + $0x20] sm:$0xff] %v2246_v34 }
0x190f   :  { %v2248_v62 = vpop.f32.mrf.mxu1 }
0x1910   :  { %v2249_v47 = vadd.f32 %v3446_v21, %v2248_v62 }
0x1912   :  { %2262 = vst [vmem:[%s3529_s14 + $0x28] sm:$0xff] %v2249_v47 }
0x1917   :  { %v2251_v8 = vpop.f32.mrf.mxu1 }
0x1918   :  { %v2252_v10 = vadd.f32 %v3446_v21, %v2251_v8 }
0x191a   :  { %2263 = vst [vmem:[%s3529_s14 + $0x30] sm:$0xff] %v2252_v10 }
0x197a   :  { %v2254_v18 = vpop.f32.mrf.mxu1 }
0x197b   :  { %v2255_v12 = vadd.f32 %v3446_v21, %v2254_v18 }
0x197d   :  { %2264 = vst [vmem:[%s3529_s14 + $0x38] sm:$0xff] %v2255_v12 }

</bundles_post_ra>
